<compile_context>
chip_gen: v6e
topology: v6e:2x2x1
jax: 0.10.0
libtpu: 0.0.40
codegen_flags: <defaults>
</compile_context>

<pallas_src>
import math

import numpy as np
import jax
import jax.numpy as jnp
from jax.experimental import pallas as pl
from jax.experimental.pallas import tpu as pltpu

_COMPUTE_DTYPE = jnp.bfloat16     # MXU-native operand dtype; accumulate in f32.


# --------------------------- in-kernel helpers ------------------------------

def _col_masks(total, W, dtype):
    """In-register column masks over the padded flat buffer (no HBM input).

    mask_l zeroes padded positions with (pos % W == 0)  -> kills kx=-1 row wrap.
    mask_r zeroes padded positions with (pos % W == 1)  -> kills kx=+1 row wrap.
    (Offsets account for the tap start offsets ky*W + kx; see _conv3x3.)
    """
    col = jax.lax.broadcasted_iota(jnp.int32, (1, total), 1) % W
    return (col != 0).astype(dtype), (col != 1).astype(dtype)


def _assemble_padded(per_image_pieces, C, W, dtype):
    """Build [W+1 zeros | img0 data | 2W zero gap | img1 data | 2W gap | ... | W+1 zeros].

    The 2-row zero gap between images makes vertical (ky=+-1) taps of one image
    read zeros instead of the neighbouring image, so the batch block folds into
    the lane axis of a single conv.  One concatenate per buffer (no pads+rows
    multi-copy assembly)."""
    zpad = jnp.zeros((C, W + 1), dtype)
    zgap = jnp.zeros((C, 2 * W), dtype)
    pieces = [zpad]
    for img in per_image_pieces:
        pieces.extend(img)
        pieces.append(zgap)
    pieces.append(zpad)
    return jnp.concatenate(pieces, axis=1)


def _conv3x3(xpad, w_ref, b_ref, W, mask_l, mask_r):
    """relu(conv3x3(x) + bias) via 9 per-tap MXU dots (f32 accumulation).

    xpad   : (Cin, L) compute dtype, L = HW_D + 2W + 2 where HW_D is the gapped
             data-region length (NB * (H+2) * W).
    w_ref  : (9, Cout, Cin) ref, taps packed ky-major, kx minor.
    b_ref  : (Cout, 1) f32 ref.
    Returns (Cout, HW_D) float32.
    """
    _, total = xpad.shape
    hw_d = total - 2 * W - 2
    # Two pre-masked copies replace 6 per-tap mask multiplies.
    srcs = (xpad * mask_l, xpad, xpad * mask_r)         # kx = 0 / 1 / 2 sources
    acc = None
    for ky in range(3):
        for kx in range(3):
            start = ky * W + kx
            tap = srcs[kx][:, start:start + hw_d]       # (Cin, HW_D), lane slice
            part = jnp.dot(w_ref[3 * ky + kx], tap,
                           preferred_element_type=jnp.float32)
            acc = part if acc is None else acc + part
    return jnp.maximum(acc + b_ref[...], 0.0)           # (Cout, HW_D) f32


def _upsample_rows(x_img, h, w, H, W):
    """Nearest-neighbour upsample of a (C, h*w) row-flat map to H rows of shape
    (C, W), using src = floor(dst * in / out) (torch F.interpolate 'nearest').
    All indices are trace-time constants; duplicate rows are built once."""
    C = x_img.shape[0]
    hi = [(y * h) // H for y in range(H)]
    wi = [(x * w) // W for x in range(W)]

    def build_row(sy):
        src = x_img[:, sy * w:(sy + 1) * w]             # (C, w)
        pieces, x = [], 0
        while x < W:                                    # run-length replicate
            sx = wi[x]
            run = 1
            while x + run < W and wi[x + run] == sx:
                run += 1
            pieces.append(jnp.broadcast_to(src[:, sx:sx + 1], (C, run)))
            x += run
        return pieces[0] if len(pieces) == 1 else jnp.concatenate(pieces, axis=1)

    cache, rows = {}, []
    for y in range(H):
        sy = hi[y]
        if sy not in cache:
            cache[sy] = build_row(sy)
        rows.append(cache[sy])
    return rows


# ------------------------------ kernel body ----------------------------------

def _make_neck_kernel(shapes, channels, NB):
    """Whole-pyramid fused kernel: upsample+conv+lateral+add per level, then last."""
    L = len(channels)
    dt = _COMPUTE_DTYPE

    def kernel(*refs):
        feat = refs[:L]                       # per-level (NB, C, H*W) bf16 blocks
        prm = refs[L:-1]                      # up_w, up_b, lat_w, lat_b per level; last_w, last_b
        o_ref = refs[-1]
        last_w, last_b = prm[4 * (L - 1)], prm[4 * (L - 1) + 1]

        def level_conv(per_image_pieces, c_in, W, w_ref, b_ref, m_l, m_r):
            xpad = _assemble_padded(per_image_pieces, c_in, W, dt)
            return _conv3x3(xpad, w_ref, b_ref, W, m_l, m_r)

        # Start from the deepest feature: per-image row-flat maps (bf16).
        h, w = shapes[L - 1]
        x_imgs = [feat[L - 1][n] for n in range(NB)]

        for lvl in range(L - 1, 0, -1):
            i = lvl - 1
            H, W = shapes[i]
            stride = (H + 2) * W                       # per-image gapped length
            m_l, m_r = _col_masks(NB * stride + 2 * W + 2, W, dt)
            # --- upsample branch: relu(bn(conv3x3(nearest_resize(x)))) ---
            up_pieces = [_upsample_rows(x_imgs[n], h, w, H, W) for n in range(NB)]
            up = level_conv(up_pieces, channels[lvl], W,
                            prm[4 * i], prm[4 * i + 1], m_l, m_r)
            # --- lateral branch: relu(bn(conv3x3(fine feature))) ---
            lat_pieces = [[feat[i][n]] for n in range(NB)]
            lat = level_conv(lat_pieces, channels[i], W,
                             prm[4 * i + 2], prm[4 * i + 3], m_l, m_r)
            y = (up + lat).astype(dt)                  # (C_i, NB*stride) bf16
            x_imgs = [y[:, n * stride:n * stride + H * W] for n in range(NB)]
            h, w = H, W

        # --- last conv at level-0 resolution ---
        H, W = shapes[0]
        stride = (H + 2) * W
        m_l, m_r = _col_masks(NB * stride + 2 * W + 2, W, dt)
        y = level_conv([[x_imgs[n]] for n in range(NB)], channels[0], W,
                       last_w, last_b, m_l, m_r)        # (Cout, NB*stride) f32
        for n in range(NB):
            o_ref[n] = y[:, n * stride:n * stride + H * W].astype(o_ref.dtype)

    return kernel


# ------------------------------ host wrapper ---------------------------------

def rsna2024_keypoint_neck(features_nchw, params):
    """Forward pass. Inputs: tuple of NCHW features; output NCHW float32."""
    L = len(features_nchw)
    N = int(features_nchw[0].shape[0])
    shapes = [(int(f.shape[2]), int(f.shape[3])) for f in features_nchw]
    channels = [int(f.shape[1]) for f in features_nchw]
    out_channel = int(params["last"]["w"].shape[1])
    H0, W0 = shapes[0]

    # Grid policy: 2-way "parallel" split over batch (keeps both v7x TCs busy);
    # the remaining batch is folded into the lane axis inside each step.
    G = 2 if (N >= 2 and N % 2 == 0) else 1
    NB = N // G

    # NCHW -> (N, C, H*W) bf16: free reshape + host-side cast (halves input DMA).
    flats = [f.astype(_COMPUTE_DTYPE).reshape(f.shape[0], f.shape[1], -1)
             for f in features_nchw]

    inputs = list(flats)
    in_specs = [pl.BlockSpec((NB, c, h * w), lambda g: (g, 0, 0))
                for c, (h, w) in zip(channels, shapes)]
    for i in range(L - 1):
        for p in (params["up"][i], params["lat"][i]):
            inputs.extend([p["w"], p["b"]])
            in_specs.extend([
                pl.BlockSpec(p["w"].shape, lambda g: (0, 0, 0)),
                pl.BlockSpec(p["b"].shape, lambda g: (0, 0)),
            ])
    inputs.extend([params["last"]["w"], params["last"]["b"]])
    in_specs.extend([
        pl.BlockSpec(params["last"]["w"].shape, lambda g: (0, 0, 0)),
        pl.BlockSpec(params["last"]["b"].shape, lambda g: (0, 0)),
    ])
    out_spec = pl.BlockSpec((NB, out_channel, H0 * W0), lambda g: (g, 0, 0))

    # Cost estimate + VMEM budget derived from the actual working set.
    flops = 2 * N * H0 * W0 * 9 * channels[0] * out_channel
    for i in range(L - 1):
        H, W = shapes[i]
        flops += 2 * N * H * W * 9 * (channels[i + 1] + channels[i]) * channels[i]
    bytes_in = int(sum(a.size * a.dtype.itemsize for a in inputs))
    bytes_out = N * out_channel * H0 * W0 * 4
    work = 0
    for i in range(L):
        H, W = shapes[i]
        hw_d = NB * (H + 2) * W + 2 * W + 2
        c_up = channels[i + 1] if i + 1 < L else 0
        work = max(work, 3 * (channels[i] + c_up) * hw_d * 2
                   + 3 * max(channels[i], out_channel) * hw_d * 4)
    vmem_bytes = int(min(48 * 2 ** 20,
                         max(32 * 2 ** 20, 4 * (work + bytes_in + bytes_out))))

    kernel = _make_neck_kernel(shapes, channels, NB)

    out = pl.pallas_call(
        kernel,
        out_shape=jax.ShapeDtypeStruct((N, out_channel, H0 * W0), jnp.float32),
        grid_spec=pltpu.PrefetchScalarGridSpec(
            num_scalar_prefetch=0,
            grid=(G,),
            in_specs=in_specs,
            out_specs=out_spec),
        compiler_params=pltpu.CompilerParams(
            dimension_semantics=("parallel",),
            vmem_limit_bytes=vmem_bytes),
        cost_estimate=pl.CostEstimate(
            flops=int(flops), transcendentals=0,
            bytes_accessed=bytes_in + bytes_out),
    )(*inputs)
    return out.reshape(N, out_channel, H0, W0)          # free reshape to NCHW


# ------------------------- parameter construction ---------------------------

def _init_conv_bn(key, cin, cout):
    """Deterministic synthetic Conv2d(3x3)+BN params with BN folded (eval)."""
    k1, k2, k3, k4, k5, k6 = jax.random.split(key, 6)
    w = jax.random.normal(k1, (cout, cin, 3, 3), jnp.float32) / math.sqrt(cin * 9)
    b = 0.05 * jax.random.normal(k2, (cout,), jnp.float32)
    gamma = 1.0 + 0.1 * jax.random.normal(k3, (cout,), jnp.float32)
    beta = 0.1 * jax.random.normal(k4, (cout,), jnp.float32)
    rmean = 0.05 * jax.random.normal(k5, (cout,), jnp.float32)
    rvar = 1.0 + 0.1 * jax.random.uniform(k6, (cout,), jnp.float32)
    eps = 1e-5
    s = gamma / jnp.sqrt(rvar + eps)
    w_folded = w * s[:, None, None, None]
    b_folded = (b - rmean) * s + beta
    # (Cout, Cin, ky, kx) -> (ky, kx, Cout, Cin) -> (9, Cout, Cin), bf16 for MXU.
    w_packed = jnp.transpose(w_folded, (2, 3, 0, 1)).reshape(9, cout, cin)
    return {
        "w": w_packed.astype(_COMPUTE_DTYPE),
        "b": b_folded.reshape(cout, 1).astype(jnp.float32),
        "w_ref": w_folded,          # f32 OIHW for the pure-JAX reference
        "b_ref": b_folded,
    }


def init_neck_params(key, in_channels, out_channel):
    params = {"lat": [], "up": []}
    keys = jax.random.split(key, 2 * (len(in_channels) - 1) + 1)
    ki = 0
    for i in range(len(in_channels) - 1):
        params["lat"].append(_init_conv_bn(keys[ki], in_channels[i], in_channels[i]))
        ki += 1
    for i in range(len(in_channels) - 1):
        params["up"].append(_init_conv_bn(keys[ki], in_channels[i + 1], in_channels[i]))
        ki += 1
    params["last"] = _init_conv_bn(keys[ki], in_channels[0], out_channel)
    return params


# --------------------------- pure-JAX reference -----------------------------

def _ref_conv_bn_relu(x, w, b):
    y = jax.lax.conv_general_dilated(
        x, w, (1, 1), "SAME", dimension_numbers=("NCHW", "OIHW", "NCHW"))
    return jnp.maximum(y + b[None, :, None, None], 0.0)


def _ref_nearest_resize(x, H, W):
    h, w = x.shape[2], x.shape[3]
    hi = np.array([(y * h) // H for y in range(H)])
    wi = np.array([(xx * w) // W for xx in range(W)])
    return x[:, :, hi][:, :, :, wi]


def _ref_forward(features_nchw, params):
    x = features_nchw[-1]
    for i in range(len(features_nchw) - 1, 0, -1):
        H, W = features_nchw[i - 1].shape[2], features_nchw[i - 1].shape[3]
        x = _ref_nearest_resize(x, H, W)
        x = _ref_conv_bn_relu(x, params["up"][i - 1]["w_ref"],
                              params["up"][i - 1]["b_ref"])
        lat = _ref_conv_bn_relu(features_nchw[i - 1],
                                params["lat"][i - 1]["w_ref"],
                                params["lat"][i - 1]["b_ref"])
        x = x + lat
    return _ref_conv_bn_relu(x, params["last"]["w_ref"], params["last"]["b_ref"])


# ---------------------------------- main -------------------------------------

if __name__ == "__main__":
    # Small synthetic config (same structure as the module defaults, scaled down).
    in_channels = [8, 16, 24, 32]
    out_channel = 8
    batch = 2
    spatial = [16, 8, 4, 2]        # feature-pyramid resolutions

    root = jax.random.PRNGKey(0)
    k_param, k_data = jax.random.split(root)
    params = init_neck_params(k_param, in_channels, out_channel)

    data_keys = jax.random.split(k_data, len(in_channels))
    features = tuple(
        jax.random.normal(dk, (batch, c, s, s), jnp.float32)
        for dk, c, s in zip(data_keys, in_channels, spatial)
    )

    out = jax.block_until_ready(rsna2024_keypoint_neck(features, params))
    assert out.shape == (batch, out_channel, spatial[0], spatial[0]), out.shape
    assert out.dtype == jnp.float32

    ref = jax.block_until_ready(_ref_forward(features, params))
    assert jnp.allclose(out, ref, rtol=5e-2, atol=5e-2), (
        float(jnp.max(jnp.abs(out - ref))))

    print("KERNEL_OK")
</pallas_src>

<mosaic_0001>
module attributes {stable_mosaic.version = 11 : i64} {
  func.func @kernel(%arg0: i32, %arg1: memref<1x8x256xbf16, #tpu.memory_space<vmem>>, %arg2: memref<1x16x64xbf16, #tpu.memory_space<vmem>>, %arg3: memref<1x24x16xbf16, #tpu.memory_space<vmem>>, %arg4: memref<1x32x4xbf16, #tpu.memory_space<vmem>>, %arg5: memref<9x8x16xbf16, #tpu.memory_space<vmem>>, %arg6: memref<8x1xf32, #tpu.memory_space<vmem>>, %arg7: memref<9x8x8xbf16, #tpu.memory_space<vmem>>, %arg8: memref<8x1xf32, #tpu.memory_space<vmem>>, %arg9: memref<9x16x24xbf16, #tpu.memory_space<vmem>>, %arg10: memref<16x1xf32, #tpu.memory_space<vmem>>, %arg11: memref<9x16x16xbf16, #tpu.memory_space<vmem>>, %arg12: memref<16x1xf32, #tpu.memory_space<vmem>>, %arg13: memref<9x24x32xbf16, #tpu.memory_space<vmem>>, %arg14: memref<24x1xf32, #tpu.memory_space<vmem>>, %arg15: memref<9x24x24xbf16, #tpu.memory_space<vmem>>, %arg16: memref<24x1xf32, #tpu.memory_space<vmem>>, %arg17: memref<9x8x8xbf16, #tpu.memory_space<vmem>>, %arg18: memref<8x1xf32, #tpu.memory_space<vmem>>, %arg19: memref<1x8x256xf32, #tpu.memory_space<vmem>>) attributes {dimension_semantics = [#tpu.dimension_semantics<parallel>], iteration_bounds = array<i64: 2>, scalar_prefetch = 0 : i64, scratch_operands = 0 : i64, tpu.core_type = #tpu.core_type<tc>, window_params = [{transform_indices = @transform_0, window_bounds = array<i64: 1, 8, 256>}, {transform_indices = @transform_1, window_bounds = array<i64: 1, 16, 64>}, {transform_indices = @transform_2, window_bounds = array<i64: 1, 24, 16>}, {transform_indices = @transform_3, window_bounds = array<i64: 1, 32, 4>}, {pipeline_mode = #tpu.pipeline_mode<synchronous>, transform_indices = @transform_4, window_bounds = array<i64: 9, 8, 16>}, {pipeline_mode = #tpu.pipeline_mode<synchronous>, transform_indices = @transform_5, window_bounds = array<i64: 8, 1>}, {pipeline_mode = #tpu.pipeline_mode<synchronous>, transform_indices = @transform_6, window_bounds = array<i64: 9, 8, 8>}, {pipeline_mode = #tpu.pipeline_mode<synchronous>, transform_indices = @transform_7, window_bounds = array<i64: 8, 1>}, {pipeline_mode = #tpu.pipeline_mode<synchronous>, transform_indices = @transform_8, window_bounds = array<i64: 9, 16, 24>}, {pipeline_mode = #tpu.pipeline_mode<synchronous>, transform_indices = @transform_9, window_bounds = array<i64: 16, 1>}, {pipeline_mode = #tpu.pipeline_mode<synchronous>, transform_indices = @transform_10, window_bounds = array<i64: 9, 16, 16>}, {pipeline_mode = #tpu.pipeline_mode<synchronous>, transform_indices = @transform_11, window_bounds = array<i64: 16, 1>}, {pipeline_mode = #tpu.pipeline_mode<synchronous>, transform_indices = @transform_12, window_bounds = array<i64: 9, 24, 32>}, {pipeline_mode = #tpu.pipeline_mode<synchronous>, transform_indices = @transform_13, window_bounds = array<i64: 24, 1>}, {pipeline_mode = #tpu.pipeline_mode<synchronous>, transform_indices = @transform_14, window_bounds = array<i64: 9, 24, 24>}, {pipeline_mode = #tpu.pipeline_mode<synchronous>, transform_indices = @transform_15, window_bounds = array<i64: 24, 1>}, {pipeline_mode = #tpu.pipeline_mode<synchronous>, transform_indices = @transform_16, window_bounds = array<i64: 9, 8, 8>}, {pipeline_mode = #tpu.pipeline_mode<synchronous>, transform_indices = @transform_17, window_bounds = array<i64: 8, 1>}, {transform_indices = @transform_18, window_bounds = array<i64: 1, 8, 256>}]} {
    %c0 = arith.constant 0 : index
    %c0_0 = arith.constant 0 : index
    %c0_1 = arith.constant 0 : index
    %0 = vector.load %arg4[%c0, %c0_0, %c0_1] : memref<1x32x4xbf16, #tpu.memory_space<vmem>>, vector<1x32x4xbf16>
    %1 = vector.shape_cast %0 : vector<1x32x4xbf16> to vector<32x4xbf16>
    %2 = tpu.iota {dimensions = array<i32: 1>} : vector<1x34xi32>
    %c4_i32 = arith.constant 4 : i32
    %c0_i32 = arith.constant 0 : i32
    %3 = arith.cmpi eq, %c4_i32, %c0_i32 : i32
    %c1_i32 = arith.constant 1 : i32
    %4 = arith.select %3, %c1_i32, %c4_i32 : i32
    %5 = vector.broadcast %4 : i32 to vector<1x34xi32>
    %6 = arith.remsi %2, %5 : vector<1x34xi32>
    %c0_i32_2 = arith.constant 0 : i32
    %7 = vector.broadcast %c0_i32_2 : i32 to vector<1x34xi32>
    %8 = arith.cmpi ne, %6, %7 : vector<1x34xi32>
    %c0_i32_3 = arith.constant 0 : i32
    %9 = vector.broadcast %c0_i32_3 : i32 to vector<1x34xi32>
    %10 = arith.cmpi slt, %6, %9 : vector<1x34xi32>
    %c0_i32_4 = arith.constant 0 : i32
    %11 = arith.cmpi slt, %4, %c0_i32_4 : i32
    %12 = vector.broadcast %11 : i1 to vector<1x34xi1>
    %13 = vector.broadcast %12 : vector<1x34xi1> to vector<1x34xi1>
    %14 = arith.xori %10, %13 : vector<1x34xi1>
    %15 = arith.andi %14, %8 : vector<1x34xi1>
    %16 = vector.broadcast %4 : i32 to vector<1x34xi32>
    %17 = arith.addi %6, %16 : vector<1x34xi32>
    %18 = arith.select %15, %17, %6 : vector<1x34xi1>, vector<1x34xi32>
    %c0_i32_5 = arith.constant 0 : i32
    %19 = vector.broadcast %c0_i32_5 : i32 to vector<1x34xi32>
    %20 = arith.cmpi ne, %18, %19 : vector<1x34xi32>
    %21 = arith.extui %20 : vector<1x34xi1> to vector<1x34xi32>
    %22 = arith.sitofp %21 : vector<1x34xi32> to vector<1x34xf32>
    %23 = arith.truncf %22 : vector<1x34xf32> to vector<1x34xbf16>
    %c1_i32_6 = arith.constant 1 : i32
    %24 = vector.broadcast %c1_i32_6 : i32 to vector<1x34xi32>
    %25 = arith.cmpi ne, %18, %24 : vector<1x34xi32>
    %26 = arith.extui %25 : vector<1x34xi1> to vector<1x34xi32>
    %27 = arith.sitofp %26 : vector<1x34xi32> to vector<1x34xf32>
    %28 = arith.truncf %27 : vector<1x34xf32> to vector<1x34xbf16>
    %29 = vector.extract_strided_slice %1 {offsets = [0, 0], sizes = [32, 2], strides = [1, 1]} : vector<32x4xbf16> to vector<32x2xbf16>
    %30 = vector.extract_strided_slice %29 {offsets = [0, 0], sizes = [32, 1], strides = [1, 1]} : vector<32x2xbf16> to vector<32x1xbf16>
    %31 = vector.shape_cast %30 : vector<32x1xbf16> to vector<32x1xbf16>
    %32 = vector.broadcast %31 : vector<32x1xbf16> to vector<32x2xbf16>
    %33 = vector.extract_strided_slice %29 {offsets = [0, 1], sizes = [32, 1], strides = [1, 1]} : vector<32x2xbf16> to vector<32x1xbf16>
    %34 = vector.shape_cast %33 : vector<32x1xbf16> to vector<32x1xbf16>
    %35 = vector.broadcast %34 : vector<32x1xbf16> to vector<32x2xbf16>
    %36 = tpu.concatenate %32, %35 in 1 : vector<32x2xbf16>, vector<32x2xbf16> -> vector<32x4xbf16>
    %37 = vector.extract_strided_slice %1 {offsets = [0, 2], sizes = [32, 2], strides = [1, 1]} : vector<32x4xbf16> to vector<32x2xbf16>
    %38 = vector.extract_strided_slice %37 {offsets = [0, 0], sizes = [32, 1], strides = [1, 1]} : vector<32x2xbf16> to vector<32x1xbf16>
    %39 = vector.shape_cast %38 : vector<32x1xbf16> to vector<32x1xbf16>
    %40 = vector.broadcast %39 : vector<32x1xbf16> to vector<32x2xbf16>
    %41 = vector.extract_strided_slice %37 {offsets = [0, 1], sizes = [32, 1], strides = [1, 1]} : vector<32x2xbf16> to vector<32x1xbf16>
    %42 = vector.shape_cast %41 : vector<32x1xbf16> to vector<32x1xbf16>
    %43 = vector.broadcast %42 : vector<32x1xbf16> to vector<32x2xbf16>
    %44 = tpu.concatenate %40, %43 in 1 : vector<32x2xbf16>, vector<32x2xbf16> -> vector<32x4xbf16>
    %cst = arith.constant 0.000000e+00 : bf16
    %45 = vector.broadcast %cst : bf16 to vector<32x5xbf16>
    %cst_7 = arith.constant 0.000000e+00 : bf16
    %46 = vector.broadcast %cst_7 : bf16 to vector<32x8xbf16>
    %47 = tpu.concatenate %45, %36, %36, %44, %44, %46, %45 in 1 : vector<32x5xbf16>, vector<32x4xbf16>, vector<32x4xbf16>, vector<32x4xbf16>, vector<32x4xbf16>, vector<32x8xbf16>, vector<32x5xbf16> -> vector<32x34xbf16>
    %48 = vector.broadcast %23 : vector<1x34xbf16> to vector<32x34xbf16>
    %49 = arith.mulf %47, %48 : vector<32x34xbf16>
    %50 = vector.broadcast %28 : vector<1x34xbf16> to vector<32x34xbf16>
    %51 = arith.mulf %47, %50 : vector<32x34xbf16>
    %52 = vector.extract_strided_slice %49 {offsets = [0, 0], sizes = [32, 24], strides = [1, 1]} : vector<32x34xbf16> to vector<32x24xbf16>
    %c0_8 = arith.constant 0 : index
    %c0_9 = arith.constant 0 : index
    %c0_10 = arith.constant 0 : index
    %53 = vector.load %arg13[%c0_8, %c0_9, %c0_10] : memref<9x24x32xbf16, #tpu.memory_space<vmem>>, vector<1x24x32xbf16>
    %54 = vector.shape_cast %53 : vector<1x24x32xbf16> to vector<24x32xbf16>
    %cst_11 = arith.constant dense<0.000000e+00> : vector<24x24xf32>
    %55 = tpu.matmul %54, %52, %cst_11 {dimension_numbers = #tpu.dot_dimension_numbers<[1], [0], [0], [1], [0, 0, 1, 1], [], []>} : vector<24x32xbf16>, vector<32x24xbf16>, vector<24x24xf32> -> vector<24x24xf32>
    %56 = vector.extract_strided_slice %47 {offsets = [0, 1], sizes = [32, 24], strides = [1, 1]} : vector<32x34xbf16> to vector<32x24xbf16>
    %c1 = arith.constant 1 : index
    %c0_12 = arith.constant 0 : index
    %c0_13 = arith.constant 0 : index
    %57 = vector.load %arg13[%c1, %c0_12, %c0_13] : memref<9x24x32xbf16, #tpu.memory_space<vmem>>, vector<1x24x32xbf16>
    %58 = vector.shape_cast %57 : vector<1x24x32xbf16> to vector<24x32xbf16>
    %cst_14 = arith.constant dense<0.000000e+00> : vector<24x24xf32>
    %59 = tpu.matmul %58, %56, %cst_14 {dimension_numbers = #tpu.dot_dimension_numbers<[1], [0], [0], [1], [0, 0, 1, 1], [], []>} : vector<24x32xbf16>, vector<32x24xbf16>, vector<24x24xf32> -> vector<24x24xf32>
    %60 = arith.addf %55, %59 : vector<24x24xf32>
    %61 = vector.extract_strided_slice %51 {offsets = [0, 2], sizes = [32, 24], strides = [1, 1]} : vector<32x34xbf16> to vector<32x24xbf16>
    %c2 = arith.constant 2 : index
    %c0_15 = arith.constant 0 : index
    %c0_16 = arith.constant 0 : index
    %62 = vector.load %arg13[%c2, %c0_15, %c0_16] : memref<9x24x32xbf16, #tpu.memory_space<vmem>>, vector<1x24x32xbf16>
    %63 = vector.shape_cast %62 : vector<1x24x32xbf16> to vector<24x32xbf16>
    %cst_17 = arith.constant dense<0.000000e+00> : vector<24x24xf32>
    %64 = tpu.matmul %63, %61, %cst_17 {dimension_numbers = #tpu.dot_dimension_numbers<[1], [0], [0], [1], [0, 0, 1, 1], [], []>} : vector<24x32xbf16>, vector<32x24xbf16>, vector<24x24xf32> -> vector<24x24xf32>
    %65 = arith.addf %60, %64 : vector<24x24xf32>
    %66 = vector.extract_strided_slice %49 {offsets = [0, 4], sizes = [32, 24], strides = [1, 1]} : vector<32x34xbf16> to vector<32x24xbf16>
    %c3 = arith.constant 3 : index
    %c0_18 = arith.constant 0 : index
    %c0_19 = arith.constant 0 : index
    %67 = vector.load %arg13[%c3, %c0_18, %c0_19] : memref<9x24x32xbf16, #tpu.memory_space<vmem>>, vector<1x24x32xbf16>
    %68 = vector.shape_cast %67 : vector<1x24x32xbf16> to vector<24x32xbf16>
    %cst_20 = arith.constant dense<0.000000e+00> : vector<24x24xf32>
    %69 = tpu.matmul %68, %66, %cst_20 {dimension_numbers = #tpu.dot_dimension_numbers<[1], [0], [0], [1], [0, 0, 1, 1], [], []>} : vector<24x32xbf16>, vector<32x24xbf16>, vector<24x24xf32> -> vector<24x24xf32>
    %70 = arith.addf %65, %69 : vector<24x24xf32>
    %71 = vector.extract_strided_slice %47 {offsets = [0, 5], sizes = [32, 24], strides = [1, 1]} : vector<32x34xbf16> to vector<32x24xbf16>
    %c4 = arith.constant 4 : index
    %c0_21 = arith.constant 0 : index
    %c0_22 = arith.constant 0 : index
    %72 = vector.load %arg13[%c4, %c0_21, %c0_22] : memref<9x24x32xbf16, #tpu.memory_space<vmem>>, vector<1x24x32xbf16>
    %73 = vector.shape_cast %72 : vector<1x24x32xbf16> to vector<24x32xbf16>
    %cst_23 = arith.constant dense<0.000000e+00> : vector<24x24xf32>
    %74 = tpu.matmul %73, %71, %cst_23 {dimension_numbers = #tpu.dot_dimension_numbers<[1], [0], [0], [1], [0, 0, 1, 1], [], []>} : vector<24x32xbf16>, vector<32x24xbf16>, vector<24x24xf32> -> vector<24x24xf32>
    %75 = arith.addf %70, %74 : vector<24x24xf32>
    %76 = vector.extract_strided_slice %51 {offsets = [0, 6], sizes = [32, 24], strides = [1, 1]} : vector<32x34xbf16> to vector<32x24xbf16>
    %c5 = arith.constant 5 : index
    %c0_24 = arith.constant 0 : index
    %c0_25 = arith.constant 0 : index
    %77 = vector.load %arg13[%c5, %c0_24, %c0_25] : memref<9x24x32xbf16, #tpu.memory_space<vmem>>, vector<1x24x32xbf16>
    %78 = vector.shape_cast %77 : vector<1x24x32xbf16> to vector<24x32xbf16>
    %cst_26 = arith.constant dense<0.000000e+00> : vector<24x24xf32>
    %79 = tpu.matmul %78, %76, %cst_26 {dimension_numbers = #tpu.dot_dimension_numbers<[1], [0], [0], [1], [0, 0, 1, 1], [], []>} : vector<24x32xbf16>, vector<32x24xbf16>, vector<24x24xf32> -> vector<24x24xf32>
    %80 = arith.addf %75, %79 : vector<24x24xf32>
    %81 = vector.extract_strided_slice %49 {offsets = [0, 8], sizes = [32, 24], strides = [1, 1]} : vector<32x34xbf16> to vector<32x24xbf16>
    %c6 = arith.constant 6 : index
    %c0_27 = arith.constant 0 : index
    %c0_28 = arith.constant 0 : index
    %82 = vector.load %arg13[%c6, %c0_27, %c0_28] : memref<9x24x32xbf16, #tpu.memory_space<vmem>>, vector<1x24x32xbf16>
    %83 = vector.shape_cast %82 : vector<1x24x32xbf16> to vector<24x32xbf16>
    %cst_29 = arith.constant dense<0.000000e+00> : vector<24x24xf32>
    %84 = tpu.matmul %83, %81, %cst_29 {dimension_numbers = #tpu.dot_dimension_numbers<[1], [0], [0], [1], [0, 0, 1, 1], [], []>} : vector<24x32xbf16>, vector<32x24xbf16>, vector<24x24xf32> -> vector<24x24xf32>
    %85 = arith.addf %80, %84 : vector<24x24xf32>
    %86 = vector.extract_strided_slice %47 {offsets = [0, 9], sizes = [32, 24], strides = [1, 1]} : vector<32x34xbf16> to vector<32x24xbf16>
    %c7 = arith.constant 7 : index
    %c0_30 = arith.constant 0 : index
    %c0_31 = arith.constant 0 : index
    %87 = vector.load %arg13[%c7, %c0_30, %c0_31] : memref<9x24x32xbf16, #tpu.memory_space<vmem>>, vector<1x24x32xbf16>
    %88 = vector.shape_cast %87 : vector<1x24x32xbf16> to vector<24x32xbf16>
    %cst_32 = arith.constant dense<0.000000e+00> : vector<24x24xf32>
    %89 = tpu.matmul %88, %86, %cst_32 {dimension_numbers = #tpu.dot_dimension_numbers<[1], [0], [0], [1], [0, 0, 1, 1], [], []>} : vector<24x32xbf16>, vector<32x24xbf16>, vector<24x24xf32> -> vector<24x24xf32>
    %90 = arith.addf %85, %89 : vector<24x24xf32>
    %91 = vector.extract_strided_slice %51 {offsets = [0, 10], sizes = [32, 24], strides = [1, 1]} : vector<32x34xbf16> to vector<32x24xbf16>
    %c8 = arith.constant 8 : index
    %c0_33 = arith.constant 0 : index
    %c0_34 = arith.constant 0 : index
    %92 = vector.load %arg13[%c8, %c0_33, %c0_34] : memref<9x24x32xbf16, #tpu.memory_space<vmem>>, vector<1x24x32xbf16>
    %93 = vector.shape_cast %92 : vector<1x24x32xbf16> to vector<24x32xbf16>
    %cst_35 = arith.constant dense<0.000000e+00> : vector<24x24xf32>
    %94 = tpu.matmul %93, %91, %cst_35 {dimension_numbers = #tpu.dot_dimension_numbers<[1], [0], [0], [1], [0, 0, 1, 1], [], []>} : vector<24x32xbf16>, vector<32x24xbf16>, vector<24x24xf32> -> vector<24x24xf32>
    %95 = arith.addf %90, %94 : vector<24x24xf32>
    %c0_36 = arith.constant 0 : index
    %c0_37 = arith.constant 0 : index
    %96 = vector.load %arg14[%c0_36, %c0_37] : memref<24x1xf32, #tpu.memory_space<vmem>>, vector<24x1xf32>
    %97 = vector.broadcast %96 : vector<24x1xf32> to vector<24x24xf32>
    %98 = arith.addf %95, %97 : vector<24x24xf32>
    %cst_38 = arith.constant 0.000000e+00 : f32
    %99 = vector.broadcast %cst_38 : f32 to vector<24x24xf32>
    %100 = arith.maximumf %98, %99 : vector<24x24xf32>
    %c0_39 = arith.constant 0 : index
    %c0_40 = arith.constant 0 : index
    %c0_41 = arith.constant 0 : index
    %101 = vector.load %arg3[%c0_39, %c0_40, %c0_41] : memref<1x24x16xbf16, #tpu.memory_space<vmem>>, vector<1x24x16xbf16>
    %102 = vector.shape_cast %101 : vector<1x24x16xbf16> to vector<24x16xbf16>
    %cst_42 = arith.constant 0.000000e+00 : bf16
    %103 = vector.broadcast %cst_42 : bf16 to vector<24x5xbf16>
    %cst_43 = arith.constant 0.000000e+00 : bf16
    %104 = vector.broadcast %cst_43 : bf16 to vector<24x8xbf16>
    %105 = tpu.concatenate %103, %102, %104, %103 in 1 : vector<24x5xbf16>, vector<24x16xbf16>, vector<24x8xbf16>, vector<24x5xbf16> -> vector<24x34xbf16>
    %106 = vector.broadcast %23 : vector<1x34xbf16> to vector<24x34xbf16>
    %107 = arith.mulf %105, %106 : vector<24x34xbf16>
    %108 = vector.broadcast %28 : vector<1x34xbf16> to vector<24x34xbf16>
    %109 = arith.mulf %105, %108 : vector<24x34xbf16>
    %110 = vector.extract_strided_slice %107 {offsets = [0, 0], sizes = [24, 24], strides = [1, 1]} : vector<24x34xbf16> to vector<24x24xbf16>
    %c0_44 = arith.constant 0 : index
    %c0_45 = arith.constant 0 : index
    %c0_46 = arith.constant 0 : index
    %111 = vector.load %arg15[%c0_44, %c0_45, %c0_46] : memref<9x24x24xbf16, #tpu.memory_space<vmem>>, vector<1x24x24xbf16>
    %112 = vector.shape_cast %111 : vector<1x24x24xbf16> to vector<24x24xbf16>
    %cst_47 = arith.constant dense<0.000000e+00> : vector<24x24xf32>
    %113 = tpu.matmul %112, %110, %cst_47 {dimension_numbers = #tpu.dot_dimension_numbers<[1], [0], [0], [1], [0, 0, 1, 1], [], []>} : vector<24x24xbf16>, vector<24x24xbf16>, vector<24x24xf32> -> vector<24x24xf32>
    %114 = vector.extract_strided_slice %105 {offsets = [0, 1], sizes = [24, 24], strides = [1, 1]} : vector<24x34xbf16> to vector<24x24xbf16>
    %c1_48 = arith.constant 1 : index
    %c0_49 = arith.constant 0 : index
    %c0_50 = arith.constant 0 : index
    %115 = vector.load %arg15[%c1_48, %c0_49, %c0_50] : memref<9x24x24xbf16, #tpu.memory_space<vmem>>, vector<1x24x24xbf16>
    %116 = vector.shape_cast %115 : vector<1x24x24xbf16> to vector<24x24xbf16>
    %cst_51 = arith.constant dense<0.000000e+00> : vector<24x24xf32>
    %117 = tpu.matmul %116, %114, %cst_51 {dimension_numbers = #tpu.dot_dimension_numbers<[1], [0], [0], [1], [0, 0, 1, 1], [], []>} : vector<24x24xbf16>, vector<24x24xbf16>, vector<24x24xf32> -> vector<24x24xf32>
    %118 = arith.addf %113, %117 : vector<24x24xf32>
    %119 = vector.extract_strided_slice %109 {offsets = [0, 2], sizes = [24, 24], strides = [1, 1]} : vector<24x34xbf16> to vector<24x24xbf16>
    %c2_52 = arith.constant 2 : index
    %c0_53 = arith.constant 0 : index
    %c0_54 = arith.constant 0 : index
    %120 = vector.load %arg15[%c2_52, %c0_53, %c0_54] : memref<9x24x24xbf16, #tpu.memory_space<vmem>>, vector<1x24x24xbf16>
    %121 = vector.shape_cast %120 : vector<1x24x24xbf16> to vector<24x24xbf16>
    %cst_55 = arith.constant dense<0.000000e+00> : vector<24x24xf32>
    %122 = tpu.matmul %121, %119, %cst_55 {dimension_numbers = #tpu.dot_dimension_numbers<[1], [0], [0], [1], [0, 0, 1, 1], [], []>} : vector<24x24xbf16>, vector<24x24xbf16>, vector<24x24xf32> -> vector<24x24xf32>
    %123 = arith.addf %118, %122 : vector<24x24xf32>
    %124 = vector.extract_strided_slice %107 {offsets = [0, 4], sizes = [24, 24], strides = [1, 1]} : vector<24x34xbf16> to vector<24x24xbf16>
    %c3_56 = arith.constant 3 : index
    %c0_57 = arith.constant 0 : index
    %c0_58 = arith.constant 0 : index
    %125 = vector.load %arg15[%c3_56, %c0_57, %c0_58] : memref<9x24x24xbf16, #tpu.memory_space<vmem>>, vector<1x24x24xbf16>
    %126 = vector.shape_cast %125 : vector<1x24x24xbf16> to vector<24x24xbf16>
    %cst_59 = arith.constant dense<0.000000e+00> : vector<24x24xf32>
    %127 = tpu.matmul %126, %124, %cst_59 {dimension_numbers = #tpu.dot_dimension_numbers<[1], [0], [0], [1], [0, 0, 1, 1], [], []>} : vector<24x24xbf16>, vector<24x24xbf16>, vector<24x24xf32> -> vector<24x24xf32>
    %128 = arith.addf %123, %127 : vector<24x24xf32>
    %129 = vector.extract_strided_slice %105 {offsets = [0, 5], sizes = [24, 24], strides = [1, 1]} : vector<24x34xbf16> to vector<24x24xbf16>
    %c4_60 = arith.constant 4 : index
    %c0_61 = arith.constant 0 : index
    %c0_62 = arith.constant 0 : index
    %130 = vector.load %arg15[%c4_60, %c0_61, %c0_62] : memref<9x24x24xbf16, #tpu.memory_space<vmem>>, vector<1x24x24xbf16>
    %131 = vector.shape_cast %130 : vector<1x24x24xbf16> to vector<24x24xbf16>
    %cst_63 = arith.constant dense<0.000000e+00> : vector<24x24xf32>
    %132 = tpu.matmul %131, %129, %cst_63 {dimension_numbers = #tpu.dot_dimension_numbers<[1], [0], [0], [1], [0, 0, 1, 1], [], []>} : vector<24x24xbf16>, vector<24x24xbf16>, vector<24x24xf32> -> vector<24x24xf32>
    %133 = arith.addf %128, %132 : vector<24x24xf32>
    %134 = vector.extract_strided_slice %109 {offsets = [0, 6], sizes = [24, 24], strides = [1, 1]} : vector<24x34xbf16> to vector<24x24xbf16>
    %c5_64 = arith.constant 5 : index
    %c0_65 = arith.constant 0 : index
    %c0_66 = arith.constant 0 : index
    %135 = vector.load %arg15[%c5_64, %c0_65, %c0_66] : memref<9x24x24xbf16, #tpu.memory_space<vmem>>, vector<1x24x24xbf16>
    %136 = vector.shape_cast %135 : vector<1x24x24xbf16> to vector<24x24xbf16>
    %cst_67 = arith.constant dense<0.000000e+00> : vector<24x24xf32>
    %137 = tpu.matmul %136, %134, %cst_67 {dimension_numbers = #tpu.dot_dimension_numbers<[1], [0], [0], [1], [0, 0, 1, 1], [], []>} : vector<24x24xbf16>, vector<24x24xbf16>, vector<24x24xf32> -> vector<24x24xf32>
    %138 = arith.addf %133, %137 : vector<24x24xf32>
    %139 = vector.extract_strided_slice %107 {offsets = [0, 8], sizes = [24, 24], strides = [1, 1]} : vector<24x34xbf16> to vector<24x24xbf16>
    %c6_68 = arith.constant 6 : index
    %c0_69 = arith.constant 0 : index
    %c0_70 = arith.constant 0 : index
    %140 = vector.load %arg15[%c6_68, %c0_69, %c0_70] : memref<9x24x24xbf16, #tpu.memory_space<vmem>>, vector<1x24x24xbf16>
    %141 = vector.shape_cast %140 : vector<1x24x24xbf16> to vector<24x24xbf16>
    %cst_71 = arith.constant dense<0.000000e+00> : vector<24x24xf32>
    %142 = tpu.matmul %141, %139, %cst_71 {dimension_numbers = #tpu.dot_dimension_numbers<[1], [0], [0], [1], [0, 0, 1, 1], [], []>} : vector<24x24xbf16>, vector<24x24xbf16>, vector<24x24xf32> -> vector<24x24xf32>
    %143 = arith.addf %138, %142 : vector<24x24xf32>
    %144 = vector.extract_strided_slice %105 {offsets = [0, 9], sizes = [24, 24], strides = [1, 1]} : vector<24x34xbf16> to vector<24x24xbf16>
    %c7_72 = arith.constant 7 : index
    %c0_73 = arith.constant 0 : index
    %c0_74 = arith.constant 0 : index
    %145 = vector.load %arg15[%c7_72, %c0_73, %c0_74] : memref<9x24x24xbf16, #tpu.memory_space<vmem>>, vector<1x24x24xbf16>
    %146 = vector.shape_cast %145 : vector<1x24x24xbf16> to vector<24x24xbf16>
    %cst_75 = arith.constant dense<0.000000e+00> : vector<24x24xf32>
    %147 = tpu.matmul %146, %144, %cst_75 {dimension_numbers = #tpu.dot_dimension_numbers<[1], [0], [0], [1], [0, 0, 1, 1], [], []>} : vector<24x24xbf16>, vector<24x24xbf16>, vector<24x24xf32> -> vector<24x24xf32>
    %148 = arith.addf %143, %147 : vector<24x24xf32>
    %149 = vector.extract_strided_slice %109 {offsets = [0, 10], sizes = [24, 24], strides = [1, 1]} : vector<24x34xbf16> to vector<24x24xbf16>
    %c8_76 = arith.constant 8 : index
    %c0_77 = arith.constant 0 : index
    %c0_78 = arith.constant 0 : index
    %150 = vector.load %arg15[%c8_76, %c0_77, %c0_78] : memref<9x24x24xbf16, #tpu.memory_space<vmem>>, vector<1x24x24xbf16>
    %151 = vector.shape_cast %150 : vector<1x24x24xbf16> to vector<24x24xbf16>
    %cst_79 = arith.constant dense<0.000000e+00> : vector<24x24xf32>
    %152 = tpu.matmul %151, %149, %cst_79 {dimension_numbers = #tpu.dot_dimension_numbers<[1], [0], [0], [1], [0, 0, 1, 1], [], []>} : vector<24x24xbf16>, vector<24x24xbf16>, vector<24x24xf32> -> vector<24x24xf32>
    %153 = arith.addf %148, %152 : vector<24x24xf32>
    %c0_80 = arith.constant 0 : index
    %c0_81 = arith.constant 0 : index
    %154 = vector.load %arg16[%c0_80, %c0_81] : memref<24x1xf32, #tpu.memory_space<vmem>>, vector<24x1xf32>
    %155 = vector.broadcast %154 : vector<24x1xf32> to vector<24x24xf32>
    %156 = arith.addf %153, %155 : vector<24x24xf32>
    %cst_82 = arith.constant 0.000000e+00 : f32
    %157 = vector.broadcast %cst_82 : f32 to vector<24x24xf32>
    %158 = arith.maximumf %156, %157 : vector<24x24xf32>
    %159 = arith.addf %100, %158 : vector<24x24xf32>
    %160 = arith.truncf %159 : vector<24x24xf32> to vector<24x24xbf16>
    %161 = vector.extract_strided_slice %160 {offsets = [0, 0], sizes = [24, 16], strides = [1, 1]} : vector<24x24xbf16> to vector<24x16xbf16>
    %162 = tpu.iota {dimensions = array<i32: 1>} : vector<1x98xi32>
    %c8_i32 = arith.constant 8 : i32
    %c0_i32_83 = arith.constant 0 : i32
    %163 = arith.cmpi eq, %c8_i32, %c0_i32_83 : i32
    %c1_i32_84 = arith.constant 1 : i32
    %164 = arith.select %163, %c1_i32_84, %c8_i32 : i32
    %165 = vector.broadcast %164 : i32 to vector<1x98xi32>
    %166 = arith.remsi %162, %165 : vector<1x98xi32>
    %c0_i32_85 = arith.constant 0 : i32
    %167 = vector.broadcast %c0_i32_85 : i32 to vector<1x98xi32>
    %168 = arith.cmpi ne, %166, %167 : vector<1x98xi32>
    %c0_i32_86 = arith.constant 0 : i32
    %169 = vector.broadcast %c0_i32_86 : i32 to vector<1x98xi32>
    %170 = arith.cmpi slt, %166, %169 : vector<1x98xi32>
    %c0_i32_87 = arith.constant 0 : i32
    %171 = arith.cmpi slt, %164, %c0_i32_87 : i32
    %172 = vector.broadcast %171 : i1 to vector<1x98xi1>
    %173 = vector.broadcast %172 : vector<1x98xi1> to vector<1x98xi1>
    %174 = arith.xori %170, %173 : vector<1x98xi1>
    %175 = arith.andi %174, %168 : vector<1x98xi1>
    %176 = vector.broadcast %164 : i32 to vector<1x98xi32>
    %177 = arith.addi %166, %176 : vector<1x98xi32>
    %178 = arith.select %175, %177, %166 : vector<1x98xi1>, vector<1x98xi32>
    %c0_i32_88 = arith.constant 0 : i32
    %179 = vector.broadcast %c0_i32_88 : i32 to vector<1x98xi32>
    %180 = arith.cmpi ne, %178, %179 : vector<1x98xi32>
    %181 = arith.extui %180 : vector<1x98xi1> to vector<1x98xi32>
    %182 = arith.sitofp %181 : vector<1x98xi32> to vector<1x98xf32>
    %183 = arith.truncf %182 : vector<1x98xf32> to vector<1x98xbf16>
    %c1_i32_89 = arith.constant 1 : i32
    %184 = vector.broadcast %c1_i32_89 : i32 to vector<1x98xi32>
    %185 = arith.cmpi ne, %178, %184 : vector<1x98xi32>
    %186 = arith.extui %185 : vector<1x98xi1> to vector<1x98xi32>
    %187 = arith.sitofp %186 : vector<1x98xi32> to vector<1x98xf32>
    %188 = arith.truncf %187 : vector<1x98xf32> to vector<1x98xbf16>
    %189 = vector.extract_strided_slice %161 {offsets = [0, 0], sizes = [24, 4], strides = [1, 1]} : vector<24x16xbf16> to vector<24x4xbf16>
    %190 = vector.extract_strided_slice %189 {offsets = [0, 0], sizes = [24, 1], strides = [1, 1]} : vector<24x4xbf16> to vector<24x1xbf16>
    %191 = vector.shape_cast %190 : vector<24x1xbf16> to vector<24x1xbf16>
    %192 = vector.broadcast %191 : vector<24x1xbf16> to vector<24x2xbf16>
    %193 = vector.extract_strided_slice %189 {offsets = [0, 1], sizes = [24, 1], strides = [1, 1]} : vector<24x4xbf16> to vector<24x1xbf16>
    %194 = vector.shape_cast %193 : vector<24x1xbf16> to vector<24x1xbf16>
    %195 = vector.broadcast %194 : vector<24x1xbf16> to vector<24x2xbf16>
    %196 = vector.extract_strided_slice %189 {offsets = [0, 2], sizes = [24, 1], strides = [1, 1]} : vector<24x4xbf16> to vector<24x1xbf16>
    %197 = vector.shape_cast %196 : vector<24x1xbf16> to vector<24x1xbf16>
    %198 = vector.broadcast %197 : vector<24x1xbf16> to vector<24x2xbf16>
    %199 = vector.extract_strided_slice %189 {offsets = [0, 3], sizes = [24, 1], strides = [1, 1]} : vector<24x4xbf16> to vector<24x1xbf16>
    %200 = vector.shape_cast %199 : vector<24x1xbf16> to vector<24x1xbf16>
    %201 = vector.broadcast %200 : vector<24x1xbf16> to vector<24x2xbf16>
    %202 = tpu.concatenate %192, %195, %198, %201 in 1 : vector<24x2xbf16>, vector<24x2xbf16>, vector<24x2xbf16>, vector<24x2xbf16> -> vector<24x8xbf16>
    %203 = vector.extract_strided_slice %161 {offsets = [0, 4], sizes = [24, 4], strides = [1, 1]} : vector<24x16xbf16> to vector<24x4xbf16>
    %204 = vector.extract_strided_slice %203 {offsets = [0, 0], sizes = [24, 1], strides = [1, 1]} : vector<24x4xbf16> to vector<24x1xbf16>
    %205 = vector.shape_cast %204 : vector<24x1xbf16> to vector<24x1xbf16>
    %206 = vector.broadcast %205 : vector<24x1xbf16> to vector<24x2xbf16>
    %207 = vector.extract_strided_slice %203 {offsets = [0, 1], sizes = [24, 1], strides = [1, 1]} : vector<24x4xbf16> to vector<24x1xbf16>
    %208 = vector.shape_cast %207 : vector<24x1xbf16> to vector<24x1xbf16>
    %209 = vector.broadcast %208 : vector<24x1xbf16> to vector<24x2xbf16>
    %210 = vector.extract_strided_slice %203 {offsets = [0, 2], sizes = [24, 1], strides = [1, 1]} : vector<24x4xbf16> to vector<24x1xbf16>
    %211 = vector.shape_cast %210 : vector<24x1xbf16> to vector<24x1xbf16>
    %212 = vector.broadcast %211 : vector<24x1xbf16> to vector<24x2xbf16>
    %213 = vector.extract_strided_slice %203 {offsets = [0, 3], sizes = [24, 1], strides = [1, 1]} : vector<24x4xbf16> to vector<24x1xbf16>
    %214 = vector.shape_cast %213 : vector<24x1xbf16> to vector<24x1xbf16>
    %215 = vector.broadcast %214 : vector<24x1xbf16> to vector<24x2xbf16>
    %216 = tpu.concatenate %206, %209, %212, %215 in 1 : vector<24x2xbf16>, vector<24x2xbf16>, vector<24x2xbf16>, vector<24x2xbf16> -> vector<24x8xbf16>
    %217 = vector.extract_strided_slice %161 {offsets = [0, 8], sizes = [24, 4], strides = [1, 1]} : vector<24x16xbf16> to vector<24x4xbf16>
    %218 = vector.extract_strided_slice %217 {offsets = [0, 0], sizes = [24, 1], strides = [1, 1]} : vector<24x4xbf16> to vector<24x1xbf16>
    %219 = vector.shape_cast %218 : vector<24x1xbf16> to vector<24x1xbf16>
    %220 = vector.broadcast %219 : vector<24x1xbf16> to vector<24x2xbf16>
    %221 = vector.extract_strided_slice %217 {offsets = [0, 1], sizes = [24, 1], strides = [1, 1]} : vector<24x4xbf16> to vector<24x1xbf16>
    %222 = vector.shape_cast %221 : vector<24x1xbf16> to vector<24x1xbf16>
    %223 = vector.broadcast %222 : vector<24x1xbf16> to vector<24x2xbf16>
    %224 = vector.extract_strided_slice %217 {offsets = [0, 2], sizes = [24, 1], strides = [1, 1]} : vector<24x4xbf16> to vector<24x1xbf16>
    %225 = vector.shape_cast %224 : vector<24x1xbf16> to vector<24x1xbf16>
    %226 = vector.broadcast %225 : vector<24x1xbf16> to vector<24x2xbf16>
    %227 = vector.extract_strided_slice %217 {offsets = [0, 3], sizes = [24, 1], strides = [1, 1]} : vector<24x4xbf16> to vector<24x1xbf16>
    %228 = vector.shape_cast %227 : vector<24x1xbf16> to vector<24x1xbf16>
    %229 = vector.broadcast %228 : vector<24x1xbf16> to vector<24x2xbf16>
    %230 = tpu.concatenate %220, %223, %226, %229 in 1 : vector<24x2xbf16>, vector<24x2xbf16>, vector<24x2xbf16>, vector<24x2xbf16> -> vector<24x8xbf16>
    %231 = vector.extract_strided_slice %161 {offsets = [0, 12], sizes = [24, 4], strides = [1, 1]} : vector<24x16xbf16> to vector<24x4xbf16>
    %232 = vector.extract_strided_slice %231 {offsets = [0, 0], sizes = [24, 1], strides = [1, 1]} : vector<24x4xbf16> to vector<24x1xbf16>
    %233 = vector.shape_cast %232 : vector<24x1xbf16> to vector<24x1xbf16>
    %234 = vector.broadcast %233 : vector<24x1xbf16> to vector<24x2xbf16>
    %235 = vector.extract_strided_slice %231 {offsets = [0, 1], sizes = [24, 1], strides = [1, 1]} : vector<24x4xbf16> to vector<24x1xbf16>
    %236 = vector.shape_cast %235 : vector<24x1xbf16> to vector<24x1xbf16>
    %237 = vector.broadcast %236 : vector<24x1xbf16> to vector<24x2xbf16>
    %238 = vector.extract_strided_slice %231 {offsets = [0, 2], sizes = [24, 1], strides = [1, 1]} : vector<24x4xbf16> to vector<24x1xbf16>
    %239 = vector.shape_cast %238 : vector<24x1xbf16> to vector<24x1xbf16>
    %240 = vector.broadcast %239 : vector<24x1xbf16> to vector<24x2xbf16>
    %241 = vector.extract_strided_slice %231 {offsets = [0, 3], sizes = [24, 1], strides = [1, 1]} : vector<24x4xbf16> to vector<24x1xbf16>
    %242 = vector.shape_cast %241 : vector<24x1xbf16> to vector<24x1xbf16>
    %243 = vector.broadcast %242 : vector<24x1xbf16> to vector<24x2xbf16>
    %244 = tpu.concatenate %234, %237, %240, %243 in 1 : vector<24x2xbf16>, vector<24x2xbf16>, vector<24x2xbf16>, vector<24x2xbf16> -> vector<24x8xbf16>
    %cst_90 = arith.constant 0.000000e+00 : bf16
    %245 = vector.broadcast %cst_90 : bf16 to vector<24x9xbf16>
    %cst_91 = arith.constant 0.000000e+00 : bf16
    %246 = vector.broadcast %cst_91 : bf16 to vector<24x16xbf16>
    %247 = tpu.concatenate %245, %202, %202, %216, %216, %230, %230, %244, %244, %246, %245 in 1 : vector<24x9xbf16>, vector<24x8xbf16>, vector<24x8xbf16>, vector<24x8xbf16>, vector<24x8xbf16>, vector<24x8xbf16>, vector<24x8xbf16>, vector<24x8xbf16>, vector<24x8xbf16>, vector<24x16xbf16>, vector<24x9xbf16> -> vector<24x98xbf16>
    %248 = vector.broadcast %183 : vector<1x98xbf16> to vector<24x98xbf16>
    %249 = arith.mulf %247, %248 : vector<24x98xbf16>
    %250 = vector.broadcast %188 : vector<1x98xbf16> to vector<24x98xbf16>
    %251 = arith.mulf %247, %250 : vector<24x98xbf16>
    %252 = vector.extract_strided_slice %249 {offsets = [0, 0], sizes = [24, 80], strides = [1, 1]} : vector<24x98xbf16> to vector<24x80xbf16>
    %c0_92 = arith.constant 0 : index
    %c0_93 = arith.constant 0 : index
    %c0_94 = arith.constant 0 : index
    %253 = vector.load %arg9[%c0_92, %c0_93, %c0_94] : memref<9x16x24xbf16, #tpu.memory_space<vmem>>, vector<1x16x24xbf16>
    %254 = vector.shape_cast %253 : vector<1x16x24xbf16> to vector<16x24xbf16>
    %cst_95 = arith.constant dense<0.000000e+00> : vector<16x80xf32>
    %255 = tpu.matmul %254, %252, %cst_95 {dimension_numbers = #tpu.dot_dimension_numbers<[1], [0], [0], [1], [0, 0, 1, 1], [], []>} : vector<16x24xbf16>, vector<24x80xbf16>, vector<16x80xf32> -> vector<16x80xf32>
    %256 = vector.extract_strided_slice %247 {offsets = [0, 1], sizes = [24, 80], strides = [1, 1]} : vector<24x98xbf16> to vector<24x80xbf16>
    %c1_96 = arith.constant 1 : index
    %c0_97 = arith.constant 0 : index
    %c0_98 = arith.constant 0 : index
    %257 = vector.load %arg9[%c1_96, %c0_97, %c0_98] : memref<9x16x24xbf16, #tpu.memory_space<vmem>>, vector<1x16x24xbf16>
    %258 = vector.shape_cast %257 : vector<1x16x24xbf16> to vector<16x24xbf16>
    %cst_99 = arith.constant dense<0.000000e+00> : vector<16x80xf32>
    %259 = tpu.matmul %258, %256, %cst_99 {dimension_numbers = #tpu.dot_dimension_numbers<[1], [0], [0], [1], [0, 0, 1, 1], [], []>} : vector<16x24xbf16>, vector<24x80xbf16>, vector<16x80xf32> -> vector<16x80xf32>
    %260 = arith.addf %255, %259 : vector<16x80xf32>
    %261 = vector.extract_strided_slice %251 {offsets = [0, 2], sizes = [24, 80], strides = [1, 1]} : vector<24x98xbf16> to vector<24x80xbf16>
    %c2_100 = arith.constant 2 : index
    %c0_101 = arith.constant 0 : index
    %c0_102 = arith.constant 0 : index
    %262 = vector.load %arg9[%c2_100, %c0_101, %c0_102] : memref<9x16x24xbf16, #tpu.memory_space<vmem>>, vector<1x16x24xbf16>
    %263 = vector.shape_cast %262 : vector<1x16x24xbf16> to vector<16x24xbf16>
    %cst_103 = arith.constant dense<0.000000e+00> : vector<16x80xf32>
    %264 = tpu.matmul %263, %261, %cst_103 {dimension_numbers = #tpu.dot_dimension_numbers<[1], [0], [0], [1], [0, 0, 1, 1], [], []>} : vector<16x24xbf16>, vector<24x80xbf16>, vector<16x80xf32> -> vector<16x80xf32>
    %265 = arith.addf %260, %264 : vector<16x80xf32>
    %266 = vector.extract_strided_slice %249 {offsets = [0, 8], sizes = [24, 80], strides = [1, 1]} : vector<24x98xbf16> to vector<24x80xbf16>
    %c3_104 = arith.constant 3 : index
    %c0_105 = arith.constant 0 : index
    %c0_106 = arith.constant 0 : index
    %267 = vector.load %arg9[%c3_104, %c0_105, %c0_106] : memref<9x16x24xbf16, #tpu.memory_space<vmem>>, vector<1x16x24xbf16>
    %268 = vector.shape_cast %267 : vector<1x16x24xbf16> to vector<16x24xbf16>
    %cst_107 = arith.constant dense<0.000000e+00> : vector<16x80xf32>
    %269 = tpu.matmul %268, %266, %cst_107 {dimension_numbers = #tpu.dot_dimension_numbers<[1], [0], [0], [1], [0, 0, 1, 1], [], []>} : vector<16x24xbf16>, vector<24x80xbf16>, vector<16x80xf32> -> vector<16x80xf32>
    %270 = arith.addf %265, %269 : vector<16x80xf32>
    %271 = vector.extract_strided_slice %247 {offsets = [0, 9], sizes = [24, 80], strides = [1, 1]} : vector<24x98xbf16> to vector<24x80xbf16>
    %c4_108 = arith.constant 4 : index
    %c0_109 = arith.constant 0 : index
    %c0_110 = arith.constant 0 : index
    %272 = vector.load %arg9[%c4_108, %c0_109, %c0_110] : memref<9x16x24xbf16, #tpu.memory_space<vmem>>, vector<1x16x24xbf16>
    %273 = vector.shape_cast %272 : vector<1x16x24xbf16> to vector<16x24xbf16>
    %cst_111 = arith.constant dense<0.000000e+00> : vector<16x80xf32>
    %274 = tpu.matmul %273, %271, %cst_111 {dimension_numbers = #tpu.dot_dimension_numbers<[1], [0], [0], [1], [0, 0, 1, 1], [], []>} : vector<16x24xbf16>, vector<24x80xbf16>, vector<16x80xf32> -> vector<16x80xf32>
    %275 = arith.addf %270, %274 : vector<16x80xf32>
    %276 = vector.extract_strided_slice %251 {offsets = [0, 10], sizes = [24, 80], strides = [1, 1]} : vector<24x98xbf16> to vector<24x80xbf16>
    %c5_112 = arith.constant 5 : index
    %c0_113 = arith.constant 0 : index
    %c0_114 = arith.constant 0 : index
    %277 = vector.load %arg9[%c5_112, %c0_113, %c0_114] : memref<9x16x24xbf16, #tpu.memory_space<vmem>>, vector<1x16x24xbf16>
    %278 = vector.shape_cast %277 : vector<1x16x24xbf16> to vector<16x24xbf16>
    %cst_115 = arith.constant dense<0.000000e+00> : vector<16x80xf32>
    %279 = tpu.matmul %278, %276, %cst_115 {dimension_numbers = #tpu.dot_dimension_numbers<[1], [0], [0], [1], [0, 0, 1, 1], [], []>} : vector<16x24xbf16>, vector<24x80xbf16>, vector<16x80xf32> -> vector<16x80xf32>
    %280 = arith.addf %275, %279 : vector<16x80xf32>
    %281 = vector.extract_strided_slice %249 {offsets = [0, 16], sizes = [24, 80], strides = [1, 1]} : vector<24x98xbf16> to vector<24x80xbf16>
    %c6_116 = arith.constant 6 : index
    %c0_117 = arith.constant 0 : index
    %c0_118 = arith.constant 0 : index
    %282 = vector.load %arg9[%c6_116, %c0_117, %c0_118] : memref<9x16x24xbf16, #tpu.memory_space<vmem>>, vector<1x16x24xbf16>
    %283 = vector.shape_cast %282 : vector<1x16x24xbf16> to vector<16x24xbf16>
    %cst_119 = arith.constant dense<0.000000e+00> : vector<16x80xf32>
    %284 = tpu.matmul %283, %281, %cst_119 {dimension_numbers = #tpu.dot_dimension_numbers<[1], [0], [0], [1], [0, 0, 1, 1], [], []>} : vector<16x24xbf16>, vector<24x80xbf16>, vector<16x80xf32> -> vector<16x80xf32>
    %285 = arith.addf %280, %284 : vector<16x80xf32>
    %286 = vector.extract_strided_slice %247 {offsets = [0, 17], sizes = [24, 80], strides = [1, 1]} : vector<24x98xbf16> to vector<24x80xbf16>
    %c7_120 = arith.constant 7 : index
    %c0_121 = arith.constant 0 : index
    %c0_122 = arith.constant 0 : index
    %287 = vector.load %arg9[%c7_120, %c0_121, %c0_122] : memref<9x16x24xbf16, #tpu.memory_space<vmem>>, vector<1x16x24xbf16>
    %288 = vector.shape_cast %287 : vector<1x16x24xbf16> to vector<16x24xbf16>
    %cst_123 = arith.constant dense<0.000000e+00> : vector<16x80xf32>
    %289 = tpu.matmul %288, %286, %cst_123 {dimension_numbers = #tpu.dot_dimension_numbers<[1], [0], [0], [1], [0, 0, 1, 1], [], []>} : vector<16x24xbf16>, vector<24x80xbf16>, vector<16x80xf32> -> vector<16x80xf32>
    %290 = arith.addf %285, %289 : vector<16x80xf32>
    %291 = vector.extract_strided_slice %251 {offsets = [0, 18], sizes = [24, 80], strides = [1, 1]} : vector<24x98xbf16> to vector<24x80xbf16>
    %c8_124 = arith.constant 8 : index
    %c0_125 = arith.constant 0 : index
    %c0_126 = arith.constant 0 : index
    %292 = vector.load %arg9[%c8_124, %c0_125, %c0_126] : memref<9x16x24xbf16, #tpu.memory_space<vmem>>, vector<1x16x24xbf16>
    %293 = vector.shape_cast %292 : vector<1x16x24xbf16> to vector<16x24xbf16>
    %cst_127 = arith.constant dense<0.000000e+00> : vector<16x80xf32>
    %294 = tpu.matmul %293, %291, %cst_127 {dimension_numbers = #tpu.dot_dimension_numbers<[1], [0], [0], [1], [0, 0, 1, 1], [], []>} : vector<16x24xbf16>, vector<24x80xbf16>, vector<16x80xf32> -> vector<16x80xf32>
    %295 = arith.addf %290, %294 : vector<16x80xf32>
    %c0_128 = arith.constant 0 : index
    %c0_129 = arith.constant 0 : index
    %296 = vector.load %arg10[%c0_128, %c0_129] : memref<16x1xf32, #tpu.memory_space<vmem>>, vector<16x1xf32>
    %297 = vector.broadcast %296 : vector<16x1xf32> to vector<16x80xf32>
    %298 = arith.addf %295, %297 : vector<16x80xf32>
    %cst_130 = arith.constant 0.000000e+00 : f32
    %299 = vector.broadcast %cst_130 : f32 to vector<16x80xf32>
    %300 = arith.maximumf %298, %299 : vector<16x80xf32>
    %c0_131 = arith.constant 0 : index
    %c0_132 = arith.constant 0 : index
    %c0_133 = arith.constant 0 : index
    %301 = vector.load %arg2[%c0_131, %c0_132, %c0_133] : memref<1x16x64xbf16, #tpu.memory_space<vmem>>, vector<1x16x64xbf16>
    %302 = vector.shape_cast %301 : vector<1x16x64xbf16> to vector<16x64xbf16>
    %cst_134 = arith.constant 0.000000e+00 : bf16
    %303 = vector.broadcast %cst_134 : bf16 to vector<16x9xbf16>
    %cst_135 = arith.constant 0.000000e+00 : bf16
    %304 = vector.broadcast %cst_135 : bf16 to vector<16x16xbf16>
    %305 = tpu.concatenate %303, %302, %304, %303 in 1 : vector<16x9xbf16>, vector<16x64xbf16>, vector<16x16xbf16>, vector<16x9xbf16> -> vector<16x98xbf16>
    %306 = vector.broadcast %183 : vector<1x98xbf16> to vector<16x98xbf16>
    %307 = arith.mulf %305, %306 : vector<16x98xbf16>
    %308 = vector.broadcast %188 : vector<1x98xbf16> to vector<16x98xbf16>
    %309 = arith.mulf %305, %308 : vector<16x98xbf16>
    %310 = vector.extract_strided_slice %307 {offsets = [0, 0], sizes = [16, 80], strides = [1, 1]} : vector<16x98xbf16> to vector<16x80xbf16>
    %c0_136 = arith.constant 0 : index
    %c0_137 = arith.constant 0 : index
    %c0_138 = arith.constant 0 : index
    %311 = vector.load %arg11[%c0_136, %c0_137, %c0_138] : memref<9x16x16xbf16, #tpu.memory_space<vmem>>, vector<1x16x16xbf16>
    %312 = vector.shape_cast %311 : vector<1x16x16xbf16> to vector<16x16xbf16>
    %cst_139 = arith.constant dense<0.000000e+00> : vector<16x80xf32>
    %313 = tpu.matmul %312, %310, %cst_139 {dimension_numbers = #tpu.dot_dimension_numbers<[1], [0], [0], [1], [0, 0, 1, 1], [], []>} : vector<16x16xbf16>, vector<16x80xbf16>, vector<16x80xf32> -> vector<16x80xf32>
    %314 = vector.extract_strided_slice %305 {offsets = [0, 1], sizes = [16, 80], strides = [1, 1]} : vector<16x98xbf16> to vector<16x80xbf16>
    %c1_140 = arith.constant 1 : index
    %c0_141 = arith.constant 0 : index
    %c0_142 = arith.constant 0 : index
    %315 = vector.load %arg11[%c1_140, %c0_141, %c0_142] : memref<9x16x16xbf16, #tpu.memory_space<vmem>>, vector<1x16x16xbf16>
    %316 = vector.shape_cast %315 : vector<1x16x16xbf16> to vector<16x16xbf16>
    %cst_143 = arith.constant dense<0.000000e+00> : vector<16x80xf32>
    %317 = tpu.matmul %316, %314, %cst_143 {dimension_numbers = #tpu.dot_dimension_numbers<[1], [0], [0], [1], [0, 0, 1, 1], [], []>} : vector<16x16xbf16>, vector<16x80xbf16>, vector<16x80xf32> -> vector<16x80xf32>
    %318 = arith.addf %313, %317 : vector<16x80xf32>
    %319 = vector.extract_strided_slice %309 {offsets = [0, 2], sizes = [16, 80], strides = [1, 1]} : vector<16x98xbf16> to vector<16x80xbf16>
    %c2_144 = arith.constant 2 : index
    %c0_145 = arith.constant 0 : index
    %c0_146 = arith.constant 0 : index
    %320 = vector.load %arg11[%c2_144, %c0_145, %c0_146] : memref<9x16x16xbf16, #tpu.memory_space<vmem>>, vector<1x16x16xbf16>
    %321 = vector.shape_cast %320 : vector<1x16x16xbf16> to vector<16x16xbf16>
    %cst_147 = arith.constant dense<0.000000e+00> : vector<16x80xf32>
    %322 = tpu.matmul %321, %319, %cst_147 {dimension_numbers = #tpu.dot_dimension_numbers<[1], [0], [0], [1], [0, 0, 1, 1], [], []>} : vector<16x16xbf16>, vector<16x80xbf16>, vector<16x80xf32> -> vector<16x80xf32>
    %323 = arith.addf %318, %322 : vector<16x80xf32>
    %324 = vector.extract_strided_slice %307 {offsets = [0, 8], sizes = [16, 80], strides = [1, 1]} : vector<16x98xbf16> to vector<16x80xbf16>
    %c3_148 = arith.constant 3 : index
    %c0_149 = arith.constant 0 : index
    %c0_150 = arith.constant 0 : index
    %325 = vector.load %arg11[%c3_148, %c0_149, %c0_150] : memref<9x16x16xbf16, #tpu.memory_space<vmem>>, vector<1x16x16xbf16>
    %326 = vector.shape_cast %325 : vector<1x16x16xbf16> to vector<16x16xbf16>
    %cst_151 = arith.constant dense<0.000000e+00> : vector<16x80xf32>
    %327 = tpu.matmul %326, %324, %cst_151 {dimension_numbers = #tpu.dot_dimension_numbers<[1], [0], [0], [1], [0, 0, 1, 1], [], []>} : vector<16x16xbf16>, vector<16x80xbf16>, vector<16x80xf32> -> vector<16x80xf32>
    %328 = arith.addf %323, %327 : vector<16x80xf32>
    %329 = vector.extract_strided_slice %305 {offsets = [0, 9], sizes = [16, 80], strides = [1, 1]} : vector<16x98xbf16> to vector<16x80xbf16>
    %c4_152 = arith.constant 4 : index
    %c0_153 = arith.constant 0 : index
    %c0_154 = arith.constant 0 : index
    %330 = vector.load %arg11[%c4_152, %c0_153, %c0_154] : memref<9x16x16xbf16, #tpu.memory_space<vmem>>, vector<1x16x16xbf16>
    %331 = vector.shape_cast %330 : vector<1x16x16xbf16> to vector<16x16xbf16>
    %cst_155 = arith.constant dense<0.000000e+00> : vector<16x80xf32>
    %332 = tpu.matmul %331, %329, %cst_155 {dimension_numbers = #tpu.dot_dimension_numbers<[1], [0], [0], [1], [0, 0, 1, 1], [], []>} : vector<16x16xbf16>, vector<16x80xbf16>, vector<16x80xf32> -> vector<16x80xf32>
    %333 = arith.addf %328, %332 : vector<16x80xf32>
    %334 = vector.extract_strided_slice %309 {offsets = [0, 10], sizes = [16, 80], strides = [1, 1]} : vector<16x98xbf16> to vector<16x80xbf16>
    %c5_156 = arith.constant 5 : index
    %c0_157 = arith.constant 0 : index
    %c0_158 = arith.constant 0 : index
    %335 = vector.load %arg11[%c5_156, %c0_157, %c0_158] : memref<9x16x16xbf16, #tpu.memory_space<vmem>>, vector<1x16x16xbf16>
    %336 = vector.shape_cast %335 : vector<1x16x16xbf16> to vector<16x16xbf16>
    %cst_159 = arith.constant dense<0.000000e+00> : vector<16x80xf32>
    %337 = tpu.matmul %336, %334, %cst_159 {dimension_numbers = #tpu.dot_dimension_numbers<[1], [0], [0], [1], [0, 0, 1, 1], [], []>} : vector<16x16xbf16>, vector<16x80xbf16>, vector<16x80xf32> -> vector<16x80xf32>
    %338 = arith.addf %333, %337 : vector<16x80xf32>
    %339 = vector.extract_strided_slice %307 {offsets = [0, 16], sizes = [16, 80], strides = [1, 1]} : vector<16x98xbf16> to vector<16x80xbf16>
    %c6_160 = arith.constant 6 : index
    %c0_161 = arith.constant 0 : index
    %c0_162 = arith.constant 0 : index
    %340 = vector.load %arg11[%c6_160, %c0_161, %c0_162] : memref<9x16x16xbf16, #tpu.memory_space<vmem>>, vector<1x16x16xbf16>
    %341 = vector.shape_cast %340 : vector<1x16x16xbf16> to vector<16x16xbf16>
    %cst_163 = arith.constant dense<0.000000e+00> : vector<16x80xf32>
    %342 = tpu.matmul %341, %339, %cst_163 {dimension_numbers = #tpu.dot_dimension_numbers<[1], [0], [0], [1], [0, 0, 1, 1], [], []>} : vector<16x16xbf16>, vector<16x80xbf16>, vector<16x80xf32> -> vector<16x80xf32>
    %343 = arith.addf %338, %342 : vector<16x80xf32>
    %344 = vector.extract_strided_slice %305 {offsets = [0, 17], sizes = [16, 80], strides = [1, 1]} : vector<16x98xbf16> to vector<16x80xbf16>
    %c7_164 = arith.constant 7 : index
    %c0_165 = arith.constant 0 : index
    %c0_166 = arith.constant 0 : index
    %345 = vector.load %arg11[%c7_164, %c0_165, %c0_166] : memref<9x16x16xbf16, #tpu.memory_space<vmem>>, vector<1x16x16xbf16>
    %346 = vector.shape_cast %345 : vector<1x16x16xbf16> to vector<16x16xbf16>
    %cst_167 = arith.constant dense<0.000000e+00> : vector<16x80xf32>
    %347 = tpu.matmul %346, %344, %cst_167 {dimension_numbers = #tpu.dot_dimension_numbers<[1], [0], [0], [1], [0, 0, 1, 1], [], []>} : vector<16x16xbf16>, vector<16x80xbf16>, vector<16x80xf32> -> vector<16x80xf32>
    %348 = arith.addf %343, %347 : vector<16x80xf32>
    %349 = vector.extract_strided_slice %309 {offsets = [0, 18], sizes = [16, 80], strides = [1, 1]} : vector<16x98xbf16> to vector<16x80xbf16>
    %c8_168 = arith.constant 8 : index
    %c0_169 = arith.constant 0 : index
    %c0_170 = arith.constant 0 : index
    %350 = vector.load %arg11[%c8_168, %c0_169, %c0_170] : memref<9x16x16xbf16, #tpu.memory_space<vmem>>, vector<1x16x16xbf16>
    %351 = vector.shape_cast %350 : vector<1x16x16xbf16> to vector<16x16xbf16>
    %cst_171 = arith.constant dense<0.000000e+00> : vector<16x80xf32>
    %352 = tpu.matmul %351, %349, %cst_171 {dimension_numbers = #tpu.dot_dimension_numbers<[1], [0], [0], [1], [0, 0, 1, 1], [], []>} : vector<16x16xbf16>, vector<16x80xbf16>, vector<16x80xf32> -> vector<16x80xf32>
    %353 = arith.addf %348, %352 : vector<16x80xf32>
    %c0_172 = arith.constant 0 : index
    %c0_173 = arith.constant 0 : index
    %354 = vector.load %arg12[%c0_172, %c0_173] : memref<16x1xf32, #tpu.memory_space<vmem>>, vector<16x1xf32>
    %355 = vector.broadcast %354 : vector<16x1xf32> to vector<16x80xf32>
    %356 = arith.addf %353, %355 : vector<16x80xf32>
    %cst_174 = arith.constant 0.000000e+00 : f32
    %357 = vector.broadcast %cst_174 : f32 to vector<16x80xf32>
    %358 = arith.maximumf %356, %357 : vector<16x80xf32>
    %359 = arith.addf %300, %358 : vector<16x80xf32>
    %360 = arith.truncf %359 : vector<16x80xf32> to vector<16x80xbf16>
    %361 = vector.extract_strided_slice %360 {offsets = [0, 0], sizes = [16, 64], strides = [1, 1]} : vector<16x80xbf16> to vector<16x64xbf16>
    %362 = tpu.iota {dimensions = array<i32: 1>} : vector<1x322xi32>
    %c16_i32 = arith.constant 16 : i32
    %c0_i32_175 = arith.constant 0 : i32
    %363 = arith.cmpi eq, %c16_i32, %c0_i32_175 : i32
    %c1_i32_176 = arith.constant 1 : i32
    %364 = arith.select %363, %c1_i32_176, %c16_i32 : i32
    %365 = vector.broadcast %364 : i32 to vector<1x322xi32>
    %366 = arith.remsi %362, %365 : vector<1x322xi32>
    %c0_i32_177 = arith.constant 0 : i32
    %367 = vector.broadcast %c0_i32_177 : i32 to vector<1x322xi32>
    %368 = arith.cmpi ne, %366, %367 : vector<1x322xi32>
    %c0_i32_178 = arith.constant 0 : i32
    %369 = vector.broadcast %c0_i32_178 : i32 to vector<1x322xi32>
    %370 = arith.cmpi slt, %366, %369 : vector<1x322xi32>
    %c0_i32_179 = arith.constant 0 : i32
    %371 = arith.cmpi slt, %364, %c0_i32_179 : i32
    %372 = vector.broadcast %371 : i1 to vector<1x322xi1>
    %373 = vector.broadcast %372 : vector<1x322xi1> to vector<1x322xi1>
    %374 = arith.xori %370, %373 : vector<1x322xi1>
    %375 = arith.andi %374, %368 : vector<1x322xi1>
    %376 = vector.broadcast %364 : i32 to vector<1x322xi32>
    %377 = arith.addi %366, %376 : vector<1x322xi32>
    %378 = arith.select %375, %377, %366 : vector<1x322xi1>, vector<1x322xi32>
    %c0_i32_180 = arith.constant 0 : i32
    %379 = vector.broadcast %c0_i32_180 : i32 to vector<1x322xi32>
    %380 = arith.cmpi ne, %378, %379 : vector<1x322xi32>
    %381 = arith.extui %380 : vector<1x322xi1> to vector<1x322xi32>
    %382 = arith.sitofp %381 : vector<1x322xi32> to vector<1x322xf32>
    %383 = arith.truncf %382 : vector<1x322xf32> to vector<1x322xbf16>
    %c1_i32_181 = arith.constant 1 : i32
    %384 = vector.broadcast %c1_i32_181 : i32 to vector<1x322xi32>
    %385 = arith.cmpi ne, %378, %384 : vector<1x322xi32>
    %386 = arith.extui %385 : vector<1x322xi1> to vector<1x322xi32>
    %387 = arith.sitofp %386 : vector<1x322xi32> to vector<1x322xf32>
    %388 = arith.truncf %387 : vector<1x322xf32> to vector<1x322xbf16>
    %389 = vector.extract_strided_slice %361 {offsets = [0, 0], sizes = [16, 8], strides = [1, 1]} : vector<16x64xbf16> to vector<16x8xbf16>
    %390 = vector.extract_strided_slice %389 {offsets = [0, 0], sizes = [16, 1], strides = [1, 1]} : vector<16x8xbf16> to vector<16x1xbf16>
    %391 = vector.shape_cast %390 : vector<16x1xbf16> to vector<16x1xbf16>
    %392 = vector.broadcast %391 : vector<16x1xbf16> to vector<16x2xbf16>
    %393 = vector.extract_strided_slice %389 {offsets = [0, 1], sizes = [16, 1], strides = [1, 1]} : vector<16x8xbf16> to vector<16x1xbf16>
    %394 = vector.shape_cast %393 : vector<16x1xbf16> to vector<16x1xbf16>
    %395 = vector.broadcast %394 : vector<16x1xbf16> to vector<16x2xbf16>
    %396 = vector.extract_strided_slice %389 {offsets = [0, 2], sizes = [16, 1], strides = [1, 1]} : vector<16x8xbf16> to vector<16x1xbf16>
    %397 = vector.shape_cast %396 : vector<16x1xbf16> to vector<16x1xbf16>
    %398 = vector.broadcast %397 : vector<16x1xbf16> to vector<16x2xbf16>
    %399 = vector.extract_strided_slice %389 {offsets = [0, 3], sizes = [16, 1], strides = [1, 1]} : vector<16x8xbf16> to vector<16x1xbf16>
    %400 = vector.shape_cast %399 : vector<16x1xbf16> to vector<16x1xbf16>
    %401 = vector.broadcast %400 : vector<16x1xbf16> to vector<16x2xbf16>
    %402 = vector.extract_strided_slice %389 {offsets = [0, 4], sizes = [16, 1], strides = [1, 1]} : vector<16x8xbf16> to vector<16x1xbf16>
    %403 = vector.shape_cast %402 : vector<16x1xbf16> to vector<16x1xbf16>
    %404 = vector.broadcast %403 : vector<16x1xbf16> to vector<16x2xbf16>
    %405 = vector.extract_strided_slice %389 {offsets = [0, 5], sizes = [16, 1], strides = [1, 1]} : vector<16x8xbf16> to vector<16x1xbf16>
    %406 = vector.shape_cast %405 : vector<16x1xbf16> to vector<16x1xbf16>
    %407 = vector.broadcast %406 : vector<16x1xbf16> to vector<16x2xbf16>
    %408 = vector.extract_strided_slice %389 {offsets = [0, 6], sizes = [16, 1], strides = [1, 1]} : vector<16x8xbf16> to vector<16x1xbf16>
    %409 = vector.shape_cast %408 : vector<16x1xbf16> to vector<16x1xbf16>
    %410 = vector.broadcast %409 : vector<16x1xbf16> to vector<16x2xbf16>
    %411 = vector.extract_strided_slice %389 {offsets = [0, 7], sizes = [16, 1], strides = [1, 1]} : vector<16x8xbf16> to vector<16x1xbf16>
    %412 = vector.shape_cast %411 : vector<16x1xbf16> to vector<16x1xbf16>
    %413 = vector.broadcast %412 : vector<16x1xbf16> to vector<16x2xbf16>
    %414 = tpu.concatenate %392, %395, %398, %401, %404, %407, %410, %413 in 1 : vector<16x2xbf16>, vector<16x2xbf16>, vector<16x2xbf16>, vector<16x2xbf16>, vector<16x2xbf16>, vector<16x2xbf16>, vector<16x2xbf16>, vector<16x2xbf16> -> vector<16x16xbf16>
    %415 = vector.extract_strided_slice %361 {offsets = [0, 8], sizes = [16, 8], strides = [1, 1]} : vector<16x64xbf16> to vector<16x8xbf16>
    %416 = vector.extract_strided_slice %415 {offsets = [0, 0], sizes = [16, 1], strides = [1, 1]} : vector<16x8xbf16> to vector<16x1xbf16>
    %417 = vector.shape_cast %416 : vector<16x1xbf16> to vector<16x1xbf16>
    %418 = vector.broadcast %417 : vector<16x1xbf16> to vector<16x2xbf16>
    %419 = vector.extract_strided_slice %415 {offsets = [0, 1], sizes = [16, 1], strides = [1, 1]} : vector<16x8xbf16> to vector<16x1xbf16>
    %420 = vector.shape_cast %419 : vector<16x1xbf16> to vector<16x1xbf16>
    %421 = vector.broadcast %420 : vector<16x1xbf16> to vector<16x2xbf16>
    %422 = vector.extract_strided_slice %415 {offsets = [0, 2], sizes = [16, 1], strides = [1, 1]} : vector<16x8xbf16> to vector<16x1xbf16>
    %423 = vector.shape_cast %422 : vector<16x1xbf16> to vector<16x1xbf16>
    %424 = vector.broadcast %423 : vector<16x1xbf16> to vector<16x2xbf16>
    %425 = vector.extract_strided_slice %415 {offsets = [0, 3], sizes = [16, 1], strides = [1, 1]} : vector<16x8xbf16> to vector<16x1xbf16>
    %426 = vector.shape_cast %425 : vector<16x1xbf16> to vector<16x1xbf16>
    %427 = vector.broadcast %426 : vector<16x1xbf16> to vector<16x2xbf16>
    %428 = vector.extract_strided_slice %415 {offsets = [0, 4], sizes = [16, 1], strides = [1, 1]} : vector<16x8xbf16> to vector<16x1xbf16>
    %429 = vector.shape_cast %428 : vector<16x1xbf16> to vector<16x1xbf16>
    %430 = vector.broadcast %429 : vector<16x1xbf16> to vector<16x2xbf16>
    %431 = vector.extract_strided_slice %415 {offsets = [0, 5], sizes = [16, 1], strides = [1, 1]} : vector<16x8xbf16> to vector<16x1xbf16>
    %432 = vector.shape_cast %431 : vector<16x1xbf16> to vector<16x1xbf16>
    %433 = vector.broadcast %432 : vector<16x1xbf16> to vector<16x2xbf16>
    %434 = vector.extract_strided_slice %415 {offsets = [0, 6], sizes = [16, 1], strides = [1, 1]} : vector<16x8xbf16> to vector<16x1xbf16>
    %435 = vector.shape_cast %434 : vector<16x1xbf16> to vector<16x1xbf16>
    %436 = vector.broadcast %435 : vector<16x1xbf16> to vector<16x2xbf16>
    %437 = vector.extract_strided_slice %415 {offsets = [0, 7], sizes = [16, 1], strides = [1, 1]} : vector<16x8xbf16> to vector<16x1xbf16>
    %438 = vector.shape_cast %437 : vector<16x1xbf16> to vector<16x1xbf16>
    %439 = vector.broadcast %438 : vector<16x1xbf16> to vector<16x2xbf16>
    %440 = tpu.concatenate %418, %421, %424, %427, %430, %433, %436, %439 in 1 : vector<16x2xbf16>, vector<16x2xbf16>, vector<16x2xbf16>, vector<16x2xbf16>, vector<16x2xbf16>, vector<16x2xbf16>, vector<16x2xbf16>, vector<16x2xbf16> -> vector<16x16xbf16>
    %441 = vector.extract_strided_slice %361 {offsets = [0, 16], sizes = [16, 8], strides = [1, 1]} : vector<16x64xbf16> to vector<16x8xbf16>
    %442 = vector.extract_strided_slice %441 {offsets = [0, 0], sizes = [16, 1], strides = [1, 1]} : vector<16x8xbf16> to vector<16x1xbf16>
    %443 = vector.shape_cast %442 : vector<16x1xbf16> to vector<16x1xbf16>
    %444 = vector.broadcast %443 : vector<16x1xbf16> to vector<16x2xbf16>
    %445 = vector.extract_strided_slice %441 {offsets = [0, 1], sizes = [16, 1], strides = [1, 1]} : vector<16x8xbf16> to vector<16x1xbf16>
    %446 = vector.shape_cast %445 : vector<16x1xbf16> to vector<16x1xbf16>
    %447 = vector.broadcast %446 : vector<16x1xbf16> to vector<16x2xbf16>
    %448 = vector.extract_strided_slice %441 {offsets = [0, 2], sizes = [16, 1], strides = [1, 1]} : vector<16x8xbf16> to vector<16x1xbf16>
    %449 = vector.shape_cast %448 : vector<16x1xbf16> to vector<16x1xbf16>
    %450 = vector.broadcast %449 : vector<16x1xbf16> to vector<16x2xbf16>
    %451 = vector.extract_strided_slice %441 {offsets = [0, 3], sizes = [16, 1], strides = [1, 1]} : vector<16x8xbf16> to vector<16x1xbf16>
    %452 = vector.shape_cast %451 : vector<16x1xbf16> to vector<16x1xbf16>
    %453 = vector.broadcast %452 : vector<16x1xbf16> to vector<16x2xbf16>
    %454 = vector.extract_strided_slice %441 {offsets = [0, 4], sizes = [16, 1], strides = [1, 1]} : vector<16x8xbf16> to vector<16x1xbf16>
    %455 = vector.shape_cast %454 : vector<16x1xbf16> to vector<16x1xbf16>
    %456 = vector.broadcast %455 : vector<16x1xbf16> to vector<16x2xbf16>
    %457 = vector.extract_strided_slice %441 {offsets = [0, 5], sizes = [16, 1], strides = [1, 1]} : vector<16x8xbf16> to vector<16x1xbf16>
    %458 = vector.shape_cast %457 : vector<16x1xbf16> to vector<16x1xbf16>
    %459 = vector.broadcast %458 : vector<16x1xbf16> to vector<16x2xbf16>
    %460 = vector.extract_strided_slice %441 {offsets = [0, 6], sizes = [16, 1], strides = [1, 1]} : vector<16x8xbf16> to vector<16x1xbf16>
    %461 = vector.shape_cast %460 : vector<16x1xbf16> to vector<16x1xbf16>
    %462 = vector.broadcast %461 : vector<16x1xbf16> to vector<16x2xbf16>
    %463 = vector.extract_strided_slice %441 {offsets = [0, 7], sizes = [16, 1], strides = [1, 1]} : vector<16x8xbf16> to vector<16x1xbf16>
    %464 = vector.shape_cast %463 : vector<16x1xbf16> to vector<16x1xbf16>
    %465 = vector.broadcast %464 : vector<16x1xbf16> to vector<16x2xbf16>
    %466 = tpu.concatenate %444, %447, %450, %453, %456, %459, %462, %465 in 1 : vector<16x2xbf16>, vector<16x2xbf16>, vector<16x2xbf16>, vector<16x2xbf16>, vector<16x2xbf16>, vector<16x2xbf16>, vector<16x2xbf16>, vector<16x2xbf16> -> vector<16x16xbf16>
    %467 = vector.extract_strided_slice %361 {offsets = [0, 24], sizes = [16, 8], strides = [1, 1]} : vector<16x64xbf16> to vector<16x8xbf16>
    %468 = vector.extract_strided_slice %467 {offsets = [0, 0], sizes = [16, 1], strides = [1, 1]} : vector<16x8xbf16> to vector<16x1xbf16>
    %469 = vector.shape_cast %468 : vector<16x1xbf16> to vector<16x1xbf16>
    %470 = vector.broadcast %469 : vector<16x1xbf16> to vector<16x2xbf16>
    %471 = vector.extract_strided_slice %467 {offsets = [0, 1], sizes = [16, 1], strides = [1, 1]} : vector<16x8xbf16> to vector<16x1xbf16>
    %472 = vector.shape_cast %471 : vector<16x1xbf16> to vector<16x1xbf16>
    %473 = vector.broadcast %472 : vector<16x1xbf16> to vector<16x2xbf16>
    %474 = vector.extract_strided_slice %467 {offsets = [0, 2], sizes = [16, 1], strides = [1, 1]} : vector<16x8xbf16> to vector<16x1xbf16>
    %475 = vector.shape_cast %474 : vector<16x1xbf16> to vector<16x1xbf16>
    %476 = vector.broadcast %475 : vector<16x1xbf16> to vector<16x2xbf16>
    %477 = vector.extract_strided_slice %467 {offsets = [0, 3], sizes = [16, 1], strides = [1, 1]} : vector<16x8xbf16> to vector<16x1xbf16>
    %478 = vector.shape_cast %477 : vector<16x1xbf16> to vector<16x1xbf16>
    %479 = vector.broadcast %478 : vector<16x1xbf16> to vector<16x2xbf16>
    %480 = vector.extract_strided_slice %467 {offsets = [0, 4], sizes = [16, 1], strides = [1, 1]} : vector<16x8xbf16> to vector<16x1xbf16>
    %481 = vector.shape_cast %480 : vector<16x1xbf16> to vector<16x1xbf16>
    %482 = vector.broadcast %481 : vector<16x1xbf16> to vector<16x2xbf16>
    %483 = vector.extract_strided_slice %467 {offsets = [0, 5], sizes = [16, 1], strides = [1, 1]} : vector<16x8xbf16> to vector<16x1xbf16>
    %484 = vector.shape_cast %483 : vector<16x1xbf16> to vector<16x1xbf16>
    %485 = vector.broadcast %484 : vector<16x1xbf16> to vector<16x2xbf16>
    %486 = vector.extract_strided_slice %467 {offsets = [0, 6], sizes = [16, 1], strides = [1, 1]} : vector<16x8xbf16> to vector<16x1xbf16>
    %487 = vector.shape_cast %486 : vector<16x1xbf16> to vector<16x1xbf16>
    %488 = vector.broadcast %487 : vector<16x1xbf16> to vector<16x2xbf16>
    %489 = vector.extract_strided_slice %467 {offsets = [0, 7], sizes = [16, 1], strides = [1, 1]} : vector<16x8xbf16> to vector<16x1xbf16>
    %490 = vector.shape_cast %489 : vector<16x1xbf16> to vector<16x1xbf16>
    %491 = vector.broadcast %490 : vector<16x1xbf16> to vector<16x2xbf16>
    %492 = tpu.concatenate %470, %473, %476, %479, %482, %485, %488, %491 in 1 : vector<16x2xbf16>, vector<16x2xbf16>, vector<16x2xbf16>, vector<16x2xbf16>, vector<16x2xbf16>, vector<16x2xbf16>, vector<16x2xbf16>, vector<16x2xbf16> -> vector<16x16xbf16>
    %493 = vector.extract_strided_slice %361 {offsets = [0, 32], sizes = [16, 8], strides = [1, 1]} : vector<16x64xbf16> to vector<16x8xbf16>
    %494 = vector.extract_strided_slice %493 {offsets = [0, 0], sizes = [16, 1], strides = [1, 1]} : vector<16x8xbf16> to vector<16x1xbf16>
    %495 = vector.shape_cast %494 : vector<16x1xbf16> to vector<16x1xbf16>
    %496 = vector.broadcast %495 : vector<16x1xbf16> to vector<16x2xbf16>
    %497 = vector.extract_strided_slice %493 {offsets = [0, 1], sizes = [16, 1], strides = [1, 1]} : vector<16x8xbf16> to vector<16x1xbf16>
    %498 = vector.shape_cast %497 : vector<16x1xbf16> to vector<16x1xbf16>
    %499 = vector.broadcast %498 : vector<16x1xbf16> to vector<16x2xbf16>
    %500 = vector.extract_strided_slice %493 {offsets = [0, 2], sizes = [16, 1], strides = [1, 1]} : vector<16x8xbf16> to vector<16x1xbf16>
    %501 = vector.shape_cast %500 : vector<16x1xbf16> to vector<16x1xbf16>
    %502 = vector.broadcast %501 : vector<16x1xbf16> to vector<16x2xbf16>
    %503 = vector.extract_strided_slice %493 {offsets = [0, 3], sizes = [16, 1], strides = [1, 1]} : vector<16x8xbf16> to vector<16x1xbf16>
    %504 = vector.shape_cast %503 : vector<16x1xbf16> to vector<16x1xbf16>
    %505 = vector.broadcast %504 : vector<16x1xbf16> to vector<16x2xbf16>
    %506 = vector.extract_strided_slice %493 {offsets = [0, 4], sizes = [16, 1], strides = [1, 1]} : vector<16x8xbf16> to vector<16x1xbf16>
    %507 = vector.shape_cast %506 : vector<16x1xbf16> to vector<16x1xbf16>
    %508 = vector.broadcast %507 : vector<16x1xbf16> to vector<16x2xbf16>
    %509 = vector.extract_strided_slice %493 {offsets = [0, 5], sizes = [16, 1], strides = [1, 1]} : vector<16x8xbf16> to vector<16x1xbf16>
    %510 = vector.shape_cast %509 : vector<16x1xbf16> to vector<16x1xbf16>
    %511 = vector.broadcast %510 : vector<16x1xbf16> to vector<16x2xbf16>
    %512 = vector.extract_strided_slice %493 {offsets = [0, 6], sizes = [16, 1], strides = [1, 1]} : vector<16x8xbf16> to vector<16x1xbf16>
    %513 = vector.shape_cast %512 : vector<16x1xbf16> to vector<16x1xbf16>
    %514 = vector.broadcast %513 : vector<16x1xbf16> to vector<16x2xbf16>
    %515 = vector.extract_strided_slice %493 {offsets = [0, 7], sizes = [16, 1], strides = [1, 1]} : vector<16x8xbf16> to vector<16x1xbf16>
    %516 = vector.shape_cast %515 : vector<16x1xbf16> to vector<16x1xbf16>
    %517 = vector.broadcast %516 : vector<16x1xbf16> to vector<16x2xbf16>
    %518 = tpu.concatenate %496, %499, %502, %505, %508, %511, %514, %517 in 1 : vector<16x2xbf16>, vector<16x2xbf16>, vector<16x2xbf16>, vector<16x2xbf16>, vector<16x2xbf16>, vector<16x2xbf16>, vector<16x2xbf16>, vector<16x2xbf16> -> vector<16x16xbf16>
    %519 = vector.extract_strided_slice %361 {offsets = [0, 40], sizes = [16, 8], strides = [1, 1]} : vector<16x64xbf16> to vector<16x8xbf16>
    %520 = vector.extract_strided_slice %519 {offsets = [0, 0], sizes = [16, 1], strides = [1, 1]} : vector<16x8xbf16> to vector<16x1xbf16>
    %521 = vector.shape_cast %520 : vector<16x1xbf16> to vector<16x1xbf16>
    %522 = vector.broadcast %521 : vector<16x1xbf16> to vector<16x2xbf16>
    %523 = vector.extract_strided_slice %519 {offsets = [0, 1], sizes = [16, 1], strides = [1, 1]} : vector<16x8xbf16> to vector<16x1xbf16>
    %524 = vector.shape_cast %523 : vector<16x1xbf16> to vector<16x1xbf16>
    %525 = vector.broadcast %524 : vector<16x1xbf16> to vector<16x2xbf16>
    %526 = vector.extract_strided_slice %519 {offsets = [0, 2], sizes = [16, 1], strides = [1, 1]} : vector<16x8xbf16> to vector<16x1xbf16>
    %527 = vector.shape_cast %526 : vector<16x1xbf16> to vector<16x1xbf16>
    %528 = vector.broadcast %527 : vector<16x1xbf16> to vector<16x2xbf16>
    %529 = vector.extract_strided_slice %519 {offsets = [0, 3], sizes = [16, 1], strides = [1, 1]} : vector<16x8xbf16> to vector<16x1xbf16>
    %530 = vector.shape_cast %529 : vector<16x1xbf16> to vector<16x1xbf16>
    %531 = vector.broadcast %530 : vector<16x1xbf16> to vector<16x2xbf16>
    %532 = vector.extract_strided_slice %519 {offsets = [0, 4], sizes = [16, 1], strides = [1, 1]} : vector<16x8xbf16> to vector<16x1xbf16>
    %533 = vector.shape_cast %532 : vector<16x1xbf16> to vector<16x1xbf16>
    %534 = vector.broadcast %533 : vector<16x1xbf16> to vector<16x2xbf16>
    %535 = vector.extract_strided_slice %519 {offsets = [0, 5], sizes = [16, 1], strides = [1, 1]} : vector<16x8xbf16> to vector<16x1xbf16>
    %536 = vector.shape_cast %535 : vector<16x1xbf16> to vector<16x1xbf16>
    %537 = vector.broadcast %536 : vector<16x1xbf16> to vector<16x2xbf16>
    %538 = vector.extract_strided_slice %519 {offsets = [0, 6], sizes = [16, 1], strides = [1, 1]} : vector<16x8xbf16> to vector<16x1xbf16>
    %539 = vector.shape_cast %538 : vector<16x1xbf16> to vector<16x1xbf16>
    %540 = vector.broadcast %539 : vector<16x1xbf16> to vector<16x2xbf16>
    %541 = vector.extract_strided_slice %519 {offsets = [0, 7], sizes = [16, 1], strides = [1, 1]} : vector<16x8xbf16> to vector<16x1xbf16>
    %542 = vector.shape_cast %541 : vector<16x1xbf16> to vector<16x1xbf16>
    %543 = vector.broadcast %542 : vector<16x1xbf16> to vector<16x2xbf16>
    %544 = tpu.concatenate %522, %525, %528, %531, %534, %537, %540, %543 in 1 : vector<16x2xbf16>, vector<16x2xbf16>, vector<16x2xbf16>, vector<16x2xbf16>, vector<16x2xbf16>, vector<16x2xbf16>, vector<16x2xbf16>, vector<16x2xbf16> -> vector<16x16xbf16>
    %545 = vector.extract_strided_slice %361 {offsets = [0, 48], sizes = [16, 8], strides = [1, 1]} : vector<16x64xbf16> to vector<16x8xbf16>
    %546 = vector.extract_strided_slice %545 {offsets = [0, 0], sizes = [16, 1], strides = [1, 1]} : vector<16x8xbf16> to vector<16x1xbf16>
    %547 = vector.shape_cast %546 : vector<16x1xbf16> to vector<16x1xbf16>
    %548 = vector.broadcast %547 : vector<16x1xbf16> to vector<16x2xbf16>
    %549 = vector.extract_strided_slice %545 {offsets = [0, 1], sizes = [16, 1], strides = [1, 1]} : vector<16x8xbf16> to vector<16x1xbf16>
    %550 = vector.shape_cast %549 : vector<16x1xbf16> to vector<16x1xbf16>
    %551 = vector.broadcast %550 : vector<16x1xbf16> to vector<16x2xbf16>
    %552 = vector.extract_strided_slice %545 {offsets = [0, 2], sizes = [16, 1], strides = [1, 1]} : vector<16x8xbf16> to vector<16x1xbf16>
    %553 = vector.shape_cast %552 : vector<16x1xbf16> to vector<16x1xbf16>
    %554 = vector.broadcast %553 : vector<16x1xbf16> to vector<16x2xbf16>
    %555 = vector.extract_strided_slice %545 {offsets = [0, 3], sizes = [16, 1], strides = [1, 1]} : vector<16x8xbf16> to vector<16x1xbf16>
    %556 = vector.shape_cast %555 : vector<16x1xbf16> to vector<16x1xbf16>
    %557 = vector.broadcast %556 : vector<16x1xbf16> to vector<16x2xbf16>
    %558 = vector.extract_strided_slice %545 {offsets = [0, 4], sizes = [16, 1], strides = [1, 1]} : vector<16x8xbf16> to vector<16x1xbf16>
    %559 = vector.shape_cast %558 : vector<16x1xbf16> to vector<16x1xbf16>
    %560 = vector.broadcast %559 : vector<16x1xbf16> to vector<16x2xbf16>
    %561 = vector.extract_strided_slice %545 {offsets = [0, 5], sizes = [16, 1], strides = [1, 1]} : vector<16x8xbf16> to vector<16x1xbf16>
    %562 = vector.shape_cast %561 : vector<16x1xbf16> to vector<16x1xbf16>
    %563 = vector.broadcast %562 : vector<16x1xbf16> to vector<16x2xbf16>
    %564 = vector.extract_strided_slice %545 {offsets = [0, 6], sizes = [16, 1], strides = [1, 1]} : vector<16x8xbf16> to vector<16x1xbf16>
    %565 = vector.shape_cast %564 : vector<16x1xbf16> to vector<16x1xbf16>
    %566 = vector.broadcast %565 : vector<16x1xbf16> to vector<16x2xbf16>
    %567 = vector.extract_strided_slice %545 {offsets = [0, 7], sizes = [16, 1], strides = [1, 1]} : vector<16x8xbf16> to vector<16x1xbf16>
    %568 = vector.shape_cast %567 : vector<16x1xbf16> to vector<16x1xbf16>
    %569 = vector.broadcast %568 : vector<16x1xbf16> to vector<16x2xbf16>
    %570 = tpu.concatenate %548, %551, %554, %557, %560, %563, %566, %569 in 1 : vector<16x2xbf16>, vector<16x2xbf16>, vector<16x2xbf16>, vector<16x2xbf16>, vector<16x2xbf16>, vector<16x2xbf16>, vector<16x2xbf16>, vector<16x2xbf16> -> vector<16x16xbf16>
    %571 = vector.extract_strided_slice %361 {offsets = [0, 56], sizes = [16, 8], strides = [1, 1]} : vector<16x64xbf16> to vector<16x8xbf16>
    %572 = vector.extract_strided_slice %571 {offsets = [0, 0], sizes = [16, 1], strides = [1, 1]} : vector<16x8xbf16> to vector<16x1xbf16>
    %573 = vector.shape_cast %572 : vector<16x1xbf16> to vector<16x1xbf16>
    %574 = vector.broadcast %573 : vector<16x1xbf16> to vector<16x2xbf16>
    %575 = vector.extract_strided_slice %571 {offsets = [0, 1], sizes = [16, 1], strides = [1, 1]} : vector<16x8xbf16> to vector<16x1xbf16>
    %576 = vector.shape_cast %575 : vector<16x1xbf16> to vector<16x1xbf16>
    %577 = vector.broadcast %576 : vector<16x1xbf16> to vector<16x2xbf16>
    %578 = vector.extract_strided_slice %571 {offsets = [0, 2], sizes = [16, 1], strides = [1, 1]} : vector<16x8xbf16> to vector<16x1xbf16>
    %579 = vector.shape_cast %578 : vector<16x1xbf16> to vector<16x1xbf16>
    %580 = vector.broadcast %579 : vector<16x1xbf16> to vector<16x2xbf16>
    %581 = vector.extract_strided_slice %571 {offsets = [0, 3], sizes = [16, 1], strides = [1, 1]} : vector<16x8xbf16> to vector<16x1xbf16>
    %582 = vector.shape_cast %581 : vector<16x1xbf16> to vector<16x1xbf16>
    %583 = vector.broadcast %582 : vector<16x1xbf16> to vector<16x2xbf16>
    %584 = vector.extract_strided_slice %571 {offsets = [0, 4], sizes = [16, 1], strides = [1, 1]} : vector<16x8xbf16> to vector<16x1xbf16>
    %585 = vector.shape_cast %584 : vector<16x1xbf16> to vector<16x1xbf16>
    %586 = vector.broadcast %585 : vector<16x1xbf16> to vector<16x2xbf16>
    %587 = vector.extract_strided_slice %571 {offsets = [0, 5], sizes = [16, 1], strides = [1, 1]} : vector<16x8xbf16> to vector<16x1xbf16>
    %588 = vector.shape_cast %587 : vector<16x1xbf16> to vector<16x1xbf16>
    %589 = vector.broadcast %588 : vector<16x1xbf16> to vector<16x2xbf16>
    %590 = vector.extract_strided_slice %571 {offsets = [0, 6], sizes = [16, 1], strides = [1, 1]} : vector<16x8xbf16> to vector<16x1xbf16>
    %591 = vector.shape_cast %590 : vector<16x1xbf16> to vector<16x1xbf16>
    %592 = vector.broadcast %591 : vector<16x1xbf16> to vector<16x2xbf16>
    %593 = vector.extract_strided_slice %571 {offsets = [0, 7], sizes = [16, 1], strides = [1, 1]} : vector<16x8xbf16> to vector<16x1xbf16>
    %594 = vector.shape_cast %593 : vector<16x1xbf16> to vector<16x1xbf16>
    %595 = vector.broadcast %594 : vector<16x1xbf16> to vector<16x2xbf16>
    %596 = tpu.concatenate %574, %577, %580, %583, %586, %589, %592, %595 in 1 : vector<16x2xbf16>, vector<16x2xbf16>, vector<16x2xbf16>, vector<16x2xbf16>, vector<16x2xbf16>, vector<16x2xbf16>, vector<16x2xbf16>, vector<16x2xbf16> -> vector<16x16xbf16>
    %cst_182 = arith.constant 0.000000e+00 : bf16
    %597 = vector.broadcast %cst_182 : bf16 to vector<16x17xbf16>
    %cst_183 = arith.constant 0.000000e+00 : bf16
    %598 = vector.broadcast %cst_183 : bf16 to vector<16x32xbf16>
    %599 = tpu.concatenate %597, %414, %414, %440, %440, %466, %466, %492, %492, %518, %518, %544, %544, %570, %570, %596 in 1 : vector<16x17xbf16>, vector<16x16xbf16>, vector<16x16xbf16>, vector<16x16xbf16>, vector<16x16xbf16>, vector<16x16xbf16>, vector<16x16xbf16>, vector<16x16xbf16>, vector<16x16xbf16>, vector<16x16xbf16>, vector<16x16xbf16>, vector<16x16xbf16>, vector<16x16xbf16>, vector<16x16xbf16>, vector<16x16xbf16>, vector<16x16xbf16> -> vector<16x257xbf16>
    %600 = tpu.concatenate %596, %598, %597 in 1 : vector<16x16xbf16>, vector<16x32xbf16>, vector<16x17xbf16> -> vector<16x65xbf16>
    %601 = tpu.concatenate %599, %600 in 1 : vector<16x257xbf16>, vector<16x65xbf16> -> vector<16x322xbf16>
    %602 = vector.broadcast %383 : vector<1x322xbf16> to vector<16x322xbf16>
    %603 = arith.mulf %601, %602 : vector<16x322xbf16>
    %604 = vector.broadcast %388 : vector<1x322xbf16> to vector<16x322xbf16>
    %605 = arith.mulf %601, %604 : vector<16x322xbf16>
    %606 = vector.extract_strided_slice %603 {offsets = [0, 0], sizes = [16, 288], strides = [1, 1]} : vector<16x322xbf16> to vector<16x288xbf16>
    %c0_184 = arith.constant 0 : index
    %c0_185 = arith.constant 0 : index
    %c0_186 = arith.constant 0 : index
    %607 = vector.load %arg5[%c0_184, %c0_185, %c0_186] : memref<9x8x16xbf16, #tpu.memory_space<vmem>>, vector<1x8x16xbf16>
    %608 = vector.shape_cast %607 : vector<1x8x16xbf16> to vector<8x16xbf16>
    %cst_187 = arith.constant dense<0.000000e+00> : vector<8x288xf32>
    %609 = tpu.matmul %608, %606, %cst_187 {dimension_numbers = #tpu.dot_dimension_numbers<[1], [0], [0], [1], [0, 0, 1, 1], [], []>} : vector<8x16xbf16>, vector<16x288xbf16>, vector<8x288xf32> -> vector<8x288xf32>
    %610 = vector.extract_strided_slice %601 {offsets = [0, 1], sizes = [16, 288], strides = [1, 1]} : vector<16x322xbf16> to vector<16x288xbf16>
    %c1_188 = arith.constant 1 : index
    %c0_189 = arith.constant 0 : index
    %c0_190 = arith.constant 0 : index
    %611 = vector.load %arg5[%c1_188, %c0_189, %c0_190] : memref<9x8x16xbf16, #tpu.memory_space<vmem>>, vector<1x8x16xbf16>
    %612 = vector.shape_cast %611 : vector<1x8x16xbf16> to vector<8x16xbf16>
    %cst_191 = arith.constant dense<0.000000e+00> : vector<8x288xf32>
    %613 = tpu.matmul %612, %610, %cst_191 {dimension_numbers = #tpu.dot_dimension_numbers<[1], [0], [0], [1], [0, 0, 1, 1], [], []>} : vector<8x16xbf16>, vector<16x288xbf16>, vector<8x288xf32> -> vector<8x288xf32>
    %614 = arith.addf %609, %613 : vector<8x288xf32>
    %615 = vector.extract_strided_slice %605 {offsets = [0, 2], sizes = [16, 288], strides = [1, 1]} : vector<16x322xbf16> to vector<16x288xbf16>
    %c2_192 = arith.constant 2 : index
    %c0_193 = arith.constant 0 : index
    %c0_194 = arith.constant 0 : index
    %616 = vector.load %arg5[%c2_192, %c0_193, %c0_194] : memref<9x8x16xbf16, #tpu.memory_space<vmem>>, vector<1x8x16xbf16>
    %617 = vector.shape_cast %616 : vector<1x8x16xbf16> to vector<8x16xbf16>
    %cst_195 = arith.constant dense<0.000000e+00> : vector<8x288xf32>
    %618 = tpu.matmul %617, %615, %cst_195 {dimension_numbers = #tpu.dot_dimension_numbers<[1], [0], [0], [1], [0, 0, 1, 1], [], []>} : vector<8x16xbf16>, vector<16x288xbf16>, vector<8x288xf32> -> vector<8x288xf32>
    %619 = arith.addf %614, %618 : vector<8x288xf32>
    %620 = vector.extract_strided_slice %603 {offsets = [0, 16], sizes = [16, 288], strides = [1, 1]} : vector<16x322xbf16> to vector<16x288xbf16>
    %c3_196 = arith.constant 3 : index
    %c0_197 = arith.constant 0 : index
    %c0_198 = arith.constant 0 : index
    %621 = vector.load %arg5[%c3_196, %c0_197, %c0_198] : memref<9x8x16xbf16, #tpu.memory_space<vmem>>, vector<1x8x16xbf16>
    %622 = vector.shape_cast %621 : vector<1x8x16xbf16> to vector<8x16xbf16>
    %cst_199 = arith.constant dense<0.000000e+00> : vector<8x288xf32>
    %623 = tpu.matmul %622, %620, %cst_199 {dimension_numbers = #tpu.dot_dimension_numbers<[1], [0], [0], [1], [0, 0, 1, 1], [], []>} : vector<8x16xbf16>, vector<16x288xbf16>, vector<8x288xf32> -> vector<8x288xf32>
    %624 = arith.addf %619, %623 : vector<8x288xf32>
    %625 = vector.extract_strided_slice %601 {offsets = [0, 17], sizes = [16, 288], strides = [1, 1]} : vector<16x322xbf16> to vector<16x288xbf16>
    %c4_200 = arith.constant 4 : index
    %c0_201 = arith.constant 0 : index
    %c0_202 = arith.constant 0 : index
    %626 = vector.load %arg5[%c4_200, %c0_201, %c0_202] : memref<9x8x16xbf16, #tpu.memory_space<vmem>>, vector<1x8x16xbf16>
    %627 = vector.shape_cast %626 : vector<1x8x16xbf16> to vector<8x16xbf16>
    %cst_203 = arith.constant dense<0.000000e+00> : vector<8x288xf32>
    %628 = tpu.matmul %627, %625, %cst_203 {dimension_numbers = #tpu.dot_dimension_numbers<[1], [0], [0], [1], [0, 0, 1, 1], [], []>} : vector<8x16xbf16>, vector<16x288xbf16>, vector<8x288xf32> -> vector<8x288xf32>
    %629 = arith.addf %624, %628 : vector<8x288xf32>
    %630 = vector.extract_strided_slice %605 {offsets = [0, 18], sizes = [16, 288], strides = [1, 1]} : vector<16x322xbf16> to vector<16x288xbf16>
    %c5_204 = arith.constant 5 : index
    %c0_205 = arith.constant 0 : index
    %c0_206 = arith.constant 0 : index
    %631 = vector.load %arg5[%c5_204, %c0_205, %c0_206] : memref<9x8x16xbf16, #tpu.memory_space<vmem>>, vector<1x8x16xbf16>
    %632 = vector.shape_cast %631 : vector<1x8x16xbf16> to vector<8x16xbf16>
    %cst_207 = arith.constant dense<0.000000e+00> : vector<8x288xf32>
    %633 = tpu.matmul %632, %630, %cst_207 {dimension_numbers = #tpu.dot_dimension_numbers<[1], [0], [0], [1], [0, 0, 1, 1], [], []>} : vector<8x16xbf16>, vector<16x288xbf16>, vector<8x288xf32> -> vector<8x288xf32>
    %634 = arith.addf %629, %633 : vector<8x288xf32>
    %635 = vector.extract_strided_slice %603 {offsets = [0, 32], sizes = [16, 288], strides = [1, 1]} : vector<16x322xbf16> to vector<16x288xbf16>
    %c6_208 = arith.constant 6 : index
    %c0_209 = arith.constant 0 : index
    %c0_210 = arith.constant 0 : index
    %636 = vector.load %arg5[%c6_208, %c0_209, %c0_210] : memref<9x8x16xbf16, #tpu.memory_space<vmem>>, vector<1x8x16xbf16>
    %637 = vector.shape_cast %636 : vector<1x8x16xbf16> to vector<8x16xbf16>
    %cst_211 = arith.constant dense<0.000000e+00> : vector<8x288xf32>
    %638 = tpu.matmul %637, %635, %cst_211 {dimension_numbers = #tpu.dot_dimension_numbers<[1], [0], [0], [1], [0, 0, 1, 1], [], []>} : vector<8x16xbf16>, vector<16x288xbf16>, vector<8x288xf32> -> vector<8x288xf32>
    %639 = arith.addf %634, %638 : vector<8x288xf32>
    %640 = vector.extract_strided_slice %601 {offsets = [0, 33], sizes = [16, 288], strides = [1, 1]} : vector<16x322xbf16> to vector<16x288xbf16>
    %c7_212 = arith.constant 7 : index
    %c0_213 = arith.constant 0 : index
    %c0_214 = arith.constant 0 : index
    %641 = vector.load %arg5[%c7_212, %c0_213, %c0_214] : memref<9x8x16xbf16, #tpu.memory_space<vmem>>, vector<1x8x16xbf16>
    %642 = vector.shape_cast %641 : vector<1x8x16xbf16> to vector<8x16xbf16>
    %cst_215 = arith.constant dense<0.000000e+00> : vector<8x288xf32>
    %643 = tpu.matmul %642, %640, %cst_215 {dimension_numbers = #tpu.dot_dimension_numbers<[1], [0], [0], [1], [0, 0, 1, 1], [], []>} : vector<8x16xbf16>, vector<16x288xbf16>, vector<8x288xf32> -> vector<8x288xf32>
    %644 = arith.addf %639, %643 : vector<8x288xf32>
    %645 = vector.extract_strided_slice %605 {offsets = [0, 34], sizes = [16, 288], strides = [1, 1]} : vector<16x322xbf16> to vector<16x288xbf16>
    %c8_216 = arith.constant 8 : index
    %c0_217 = arith.constant 0 : index
    %c0_218 = arith.constant 0 : index
    %646 = vector.load %arg5[%c8_216, %c0_217, %c0_218] : memref<9x8x16xbf16, #tpu.memory_space<vmem>>, vector<1x8x16xbf16>
    %647 = vector.shape_cast %646 : vector<1x8x16xbf16> to vector<8x16xbf16>
    %cst_219 = arith.constant dense<0.000000e+00> : vector<8x288xf32>
    %648 = tpu.matmul %647, %645, %cst_219 {dimension_numbers = #tpu.dot_dimension_numbers<[1], [0], [0], [1], [0, 0, 1, 1], [], []>} : vector<8x16xbf16>, vector<16x288xbf16>, vector<8x288xf32> -> vector<8x288xf32>
    %649 = arith.addf %644, %648 : vector<8x288xf32>
    %c0_220 = arith.constant 0 : index
    %c0_221 = arith.constant 0 : index
    %650 = vector.load %arg6[%c0_220, %c0_221] : memref<8x1xf32, #tpu.memory_space<vmem>>, vector<8x1xf32>
    %651 = vector.broadcast %650 : vector<8x1xf32> to vector<8x288xf32>
    %652 = arith.addf %649, %651 : vector<8x288xf32>
    %cst_222 = arith.constant 0.000000e+00 : f32
    %653 = vector.broadcast %cst_222 : f32 to vector<8x288xf32>
    %654 = arith.maximumf %652, %653 : vector<8x288xf32>
    %c0_223 = arith.constant 0 : index
    %c0_224 = arith.constant 0 : index
    %c0_225 = arith.constant 0 : index
    %655 = vector.load %arg1[%c0_223, %c0_224, %c0_225] : memref<1x8x256xbf16, #tpu.memory_space<vmem>>, vector<1x8x256xbf16>
    %656 = vector.shape_cast %655 : vector<1x8x256xbf16> to vector<8x256xbf16>
    %cst_226 = arith.constant 0.000000e+00 : bf16
    %657 = vector.broadcast %cst_226 : bf16 to vector<8x17xbf16>
    %cst_227 = arith.constant 0.000000e+00 : bf16
    %658 = vector.broadcast %cst_227 : bf16 to vector<8x32xbf16>
    %659 = tpu.concatenate %657, %656, %658, %657 in 1 : vector<8x17xbf16>, vector<8x256xbf16>, vector<8x32xbf16>, vector<8x17xbf16> -> vector<8x322xbf16>
    %660 = vector.broadcast %383 : vector<1x322xbf16> to vector<8x322xbf16>
    %661 = arith.mulf %659, %660 : vector<8x322xbf16>
    %662 = vector.broadcast %388 : vector<1x322xbf16> to vector<8x322xbf16>
    %663 = arith.mulf %659, %662 : vector<8x322xbf16>
    %664 = vector.extract_strided_slice %661 {offsets = [0, 0], sizes = [8, 288], strides = [1, 1]} : vector<8x322xbf16> to vector<8x288xbf16>
    %c0_228 = arith.constant 0 : index
    %c0_229 = arith.constant 0 : index
    %c0_230 = arith.constant 0 : index
    %665 = vector.load %arg7[%c0_228, %c0_229, %c0_230] : memref<9x8x8xbf16, #tpu.memory_space<vmem>>, vector<1x8x8xbf16>
    %666 = vector.shape_cast %665 : vector<1x8x8xbf16> to vector<8x8xbf16>
    %cst_231 = arith.constant dense<0.000000e+00> : vector<8x288xf32>
    %667 = tpu.matmul %666, %664, %cst_231 {dimension_numbers = #tpu.dot_dimension_numbers<[1], [0], [0], [1], [0, 0, 1, 1], [], []>} : vector<8x8xbf16>, vector<8x288xbf16>, vector<8x288xf32> -> vector<8x288xf32>
    %668 = vector.extract_strided_slice %659 {offsets = [0, 1], sizes = [8, 288], strides = [1, 1]} : vector<8x322xbf16> to vector<8x288xbf16>
    %c1_232 = arith.constant 1 : index
    %c0_233 = arith.constant 0 : index
    %c0_234 = arith.constant 0 : index
    %669 = vector.load %arg7[%c1_232, %c0_233, %c0_234] : memref<9x8x8xbf16, #tpu.memory_space<vmem>>, vector<1x8x8xbf16>
    %670 = vector.shape_cast %669 : vector<1x8x8xbf16> to vector<8x8xbf16>
    %cst_235 = arith.constant dense<0.000000e+00> : vector<8x288xf32>
    %671 = tpu.matmul %670, %668, %cst_235 {dimension_numbers = #tpu.dot_dimension_numbers<[1], [0], [0], [1], [0, 0, 1, 1], [], []>} : vector<8x8xbf16>, vector<8x288xbf16>, vector<8x288xf32> -> vector<8x288xf32>
    %672 = arith.addf %667, %671 : vector<8x288xf32>
    %673 = vector.extract_strided_slice %663 {offsets = [0, 2], sizes = [8, 288], strides = [1, 1]} : vector<8x322xbf16> to vector<8x288xbf16>
    %c2_236 = arith.constant 2 : index
    %c0_237 = arith.constant 0 : index
    %c0_238 = arith.constant 0 : index
    %674 = vector.load %arg7[%c2_236, %c0_237, %c0_238] : memref<9x8x8xbf16, #tpu.memory_space<vmem>>, vector<1x8x8xbf16>
    %675 = vector.shape_cast %674 : vector<1x8x8xbf16> to vector<8x8xbf16>
    %cst_239 = arith.constant dense<0.000000e+00> : vector<8x288xf32>
    %676 = tpu.matmul %675, %673, %cst_239 {dimension_numbers = #tpu.dot_dimension_numbers<[1], [0], [0], [1], [0, 0, 1, 1], [], []>} : vector<8x8xbf16>, vector<8x288xbf16>, vector<8x288xf32> -> vector<8x288xf32>
    %677 = arith.addf %672, %676 : vector<8x288xf32>
    %678 = vector.extract_strided_slice %661 {offsets = [0, 16], sizes = [8, 288], strides = [1, 1]} : vector<8x322xbf16> to vector<8x288xbf16>
    %c3_240 = arith.constant 3 : index
    %c0_241 = arith.constant 0 : index
    %c0_242 = arith.constant 0 : index
    %679 = vector.load %arg7[%c3_240, %c0_241, %c0_242] : memref<9x8x8xbf16, #tpu.memory_space<vmem>>, vector<1x8x8xbf16>
    %680 = vector.shape_cast %679 : vector<1x8x8xbf16> to vector<8x8xbf16>
    %cst_243 = arith.constant dense<0.000000e+00> : vector<8x288xf32>
    %681 = tpu.matmul %680, %678, %cst_243 {dimension_numbers = #tpu.dot_dimension_numbers<[1], [0], [0], [1], [0, 0, 1, 1], [], []>} : vector<8x8xbf16>, vector<8x288xbf16>, vector<8x288xf32> -> vector<8x288xf32>
    %682 = arith.addf %677, %681 : vector<8x288xf32>
    %683 = vector.extract_strided_slice %659 {offsets = [0, 17], sizes = [8, 288], strides = [1, 1]} : vector<8x322xbf16> to vector<8x288xbf16>
    %c4_244 = arith.constant 4 : index
    %c0_245 = arith.constant 0 : index
    %c0_246 = arith.constant 0 : index
    %684 = vector.load %arg7[%c4_244, %c0_245, %c0_246] : memref<9x8x8xbf16, #tpu.memory_space<vmem>>, vector<1x8x8xbf16>
    %685 = vector.shape_cast %684 : vector<1x8x8xbf16> to vector<8x8xbf16>
    %cst_247 = arith.constant dense<0.000000e+00> : vector<8x288xf32>
    %686 = tpu.matmul %685, %683, %cst_247 {dimension_numbers = #tpu.dot_dimension_numbers<[1], [0], [0], [1], [0, 0, 1, 1], [], []>} : vector<8x8xbf16>, vector<8x288xbf16>, vector<8x288xf32> -> vector<8x288xf32>
    %687 = arith.addf %682, %686 : vector<8x288xf32>
    %688 = vector.extract_strided_slice %663 {offsets = [0, 18], sizes = [8, 288], strides = [1, 1]} : vector<8x322xbf16> to vector<8x288xbf16>
    %c5_248 = arith.constant 5 : index
    %c0_249 = arith.constant 0 : index
    %c0_250 = arith.constant 0 : index
    %689 = vector.load %arg7[%c5_248, %c0_249, %c0_250] : memref<9x8x8xbf16, #tpu.memory_space<vmem>>, vector<1x8x8xbf16>
    %690 = vector.shape_cast %689 : vector<1x8x8xbf16> to vector<8x8xbf16>
    %cst_251 = arith.constant dense<0.000000e+00> : vector<8x288xf32>
    %691 = tpu.matmul %690, %688, %cst_251 {dimension_numbers = #tpu.dot_dimension_numbers<[1], [0], [0], [1], [0, 0, 1, 1], [], []>} : vector<8x8xbf16>, vector<8x288xbf16>, vector<8x288xf32> -> vector<8x288xf32>
    %692 = arith.addf %687, %691 : vector<8x288xf32>
    %693 = vector.extract_strided_slice %661 {offsets = [0, 32], sizes = [8, 288], strides = [1, 1]} : vector<8x322xbf16> to vector<8x288xbf16>
    %c6_252 = arith.constant 6 : index
    %c0_253 = arith.constant 0 : index
    %c0_254 = arith.constant 0 : index
    %694 = vector.load %arg7[%c6_252, %c0_253, %c0_254] : memref<9x8x8xbf16, #tpu.memory_space<vmem>>, vector<1x8x8xbf16>
    %695 = vector.shape_cast %694 : vector<1x8x8xbf16> to vector<8x8xbf16>
    %cst_255 = arith.constant dense<0.000000e+00> : vector<8x288xf32>
    %696 = tpu.matmul %695, %693, %cst_255 {dimension_numbers = #tpu.dot_dimension_numbers<[1], [0], [0], [1], [0, 0, 1, 1], [], []>} : vector<8x8xbf16>, vector<8x288xbf16>, vector<8x288xf32> -> vector<8x288xf32>
    %697 = arith.addf %692, %696 : vector<8x288xf32>
    %698 = vector.extract_strided_slice %659 {offsets = [0, 33], sizes = [8, 288], strides = [1, 1]} : vector<8x322xbf16> to vector<8x288xbf16>
    %c7_256 = arith.constant 7 : index
    %c0_257 = arith.constant 0 : index
    %c0_258 = arith.constant 0 : index
    %699 = vector.load %arg7[%c7_256, %c0_257, %c0_258] : memref<9x8x8xbf16, #tpu.memory_space<vmem>>, vector<1x8x8xbf16>
    %700 = vector.shape_cast %699 : vector<1x8x8xbf16> to vector<8x8xbf16>
    %cst_259 = arith.constant dense<0.000000e+00> : vector<8x288xf32>
    %701 = tpu.matmul %700, %698, %cst_259 {dimension_numbers = #tpu.dot_dimension_numbers<[1], [0], [0], [1], [0, 0, 1, 1], [], []>} : vector<8x8xbf16>, vector<8x288xbf16>, vector<8x288xf32> -> vector<8x288xf32>
    %702 = arith.addf %697, %701 : vector<8x288xf32>
    %703 = vector.extract_strided_slice %663 {offsets = [0, 34], sizes = [8, 288], strides = [1, 1]} : vector<8x322xbf16> to vector<8x288xbf16>
    %c8_260 = arith.constant 8 : index
    %c0_261 = arith.constant 0 : index
    %c0_262 = arith.constant 0 : index
    %704 = vector.load %arg7[%c8_260, %c0_261, %c0_262] : memref<9x8x8xbf16, #tpu.memory_space<vmem>>, vector<1x8x8xbf16>
    %705 = vector.shape_cast %704 : vector<1x8x8xbf16> to vector<8x8xbf16>
    %cst_263 = arith.constant dense<0.000000e+00> : vector<8x288xf32>
    %706 = tpu.matmul %705, %703, %cst_263 {dimension_numbers = #tpu.dot_dimension_numbers<[1], [0], [0], [1], [0, 0, 1, 1], [], []>} : vector<8x8xbf16>, vector<8x288xbf16>, vector<8x288xf32> -> vector<8x288xf32>
    %707 = arith.addf %702, %706 : vector<8x288xf32>
    %c0_264 = arith.constant 0 : index
    %c0_265 = arith.constant 0 : index
    %708 = vector.load %arg8[%c0_264, %c0_265] : memref<8x1xf32, #tpu.memory_space<vmem>>, vector<8x1xf32>
    %709 = vector.broadcast %708 : vector<8x1xf32> to vector<8x288xf32>
    %710 = arith.addf %707, %709 : vector<8x288xf32>
    %cst_266 = arith.constant 0.000000e+00 : f32
    %711 = vector.broadcast %cst_266 : f32 to vector<8x288xf32>
    %712 = arith.maximumf %710, %711 : vector<8x288xf32>
    %713 = arith.addf %654, %712 : vector<8x288xf32>
    %714 = arith.truncf %713 : vector<8x288xf32> to vector<8x288xbf16>
    %715 = vector.extract_strided_slice %714 {offsets = [0, 0], sizes = [8, 256], strides = [1, 1]} : vector<8x288xbf16> to vector<8x256xbf16>
    %716 = tpu.iota {dimensions = array<i32: 1>} : vector<1x322xi32>
    %c16_i32_267 = arith.constant 16 : i32
    %c0_i32_268 = arith.constant 0 : i32
    %717 = arith.cmpi eq, %c16_i32_267, %c0_i32_268 : i32
    %c1_i32_269 = arith.constant 1 : i32
    %718 = arith.select %717, %c1_i32_269, %c16_i32_267 : i32
    %719 = vector.broadcast %718 : i32 to vector<1x322xi32>
    %720 = arith.remsi %716, %719 : vector<1x322xi32>
    %c0_i32_270 = arith.constant 0 : i32
    %721 = vector.broadcast %c0_i32_270 : i32 to vector<1x322xi32>
    %722 = arith.cmpi ne, %720, %721 : vector<1x322xi32>
    %c0_i32_271 = arith.constant 0 : i32
    %723 = vector.broadcast %c0_i32_271 : i32 to vector<1x322xi32>
    %724 = arith.cmpi slt, %720, %723 : vector<1x322xi32>
    %c0_i32_272 = arith.constant 0 : i32
    %725 = arith.cmpi slt, %718, %c0_i32_272 : i32
    %726 = vector.broadcast %725 : i1 to vector<1x322xi1>
    %727 = vector.broadcast %726 : vector<1x322xi1> to vector<1x322xi1>
    %728 = arith.xori %724, %727 : vector<1x322xi1>
    %729 = arith.andi %728, %722 : vector<1x322xi1>
    %730 = vector.broadcast %718 : i32 to vector<1x322xi32>
    %731 = arith.addi %720, %730 : vector<1x322xi32>
    %732 = arith.select %729, %731, %720 : vector<1x322xi1>, vector<1x322xi32>
    %c0_i32_273 = arith.constant 0 : i32
    %733 = vector.broadcast %c0_i32_273 : i32 to vector<1x322xi32>
    %734 = arith.cmpi ne, %732, %733 : vector<1x322xi32>
    %735 = arith.extui %734 : vector<1x322xi1> to vector<1x322xi32>
    %736 = arith.sitofp %735 : vector<1x322xi32> to vector<1x322xf32>
    %737 = arith.truncf %736 : vector<1x322xf32> to vector<1x322xbf16>
    %c1_i32_274 = arith.constant 1 : i32
    %738 = vector.broadcast %c1_i32_274 : i32 to vector<1x322xi32>
    %739 = arith.cmpi ne, %732, %738 : vector<1x322xi32>
    %740 = arith.extui %739 : vector<1x322xi1> to vector<1x322xi32>
    %741 = arith.sitofp %740 : vector<1x322xi32> to vector<1x322xf32>
    %742 = arith.truncf %741 : vector<1x322xf32> to vector<1x322xbf16>
    %cst_275 = arith.constant 0.000000e+00 : bf16
    %743 = vector.broadcast %cst_275 : bf16 to vector<8x17xbf16>
    %cst_276 = arith.constant 0.000000e+00 : bf16
    %744 = vector.broadcast %cst_276 : bf16 to vector<8x32xbf16>
    %745 = tpu.concatenate %743, %715, %744, %743 in 1 : vector<8x17xbf16>, vector<8x256xbf16>, vector<8x32xbf16>, vector<8x17xbf16> -> vector<8x322xbf16>
    %746 = vector.broadcast %737 : vector<1x322xbf16> to vector<8x322xbf16>
    %747 = arith.mulf %745, %746 : vector<8x322xbf16>
    %748 = vector.broadcast %742 : vector<1x322xbf16> to vector<8x322xbf16>
    %749 = arith.mulf %745, %748 : vector<8x322xbf16>
    %750 = vector.extract_strided_slice %747 {offsets = [0, 0], sizes = [8, 288], strides = [1, 1]} : vector<8x322xbf16> to vector<8x288xbf16>
    %c0_277 = arith.constant 0 : index
    %c0_278 = arith.constant 0 : index
    %c0_279 = arith.constant 0 : index
    %751 = vector.load %arg17[%c0_277, %c0_278, %c0_279] : memref<9x8x8xbf16, #tpu.memory_space<vmem>>, vector<1x8x8xbf16>
    %752 = vector.shape_cast %751 : vector<1x8x8xbf16> to vector<8x8xbf16>
    %cst_280 = arith.constant dense<0.000000e+00> : vector<8x288xf32>
    %753 = tpu.matmul %752, %750, %cst_280 {dimension_numbers = #tpu.dot_dimension_numbers<[1], [0], [0], [1], [0, 0, 1, 1], [], []>} : vector<8x8xbf16>, vector<8x288xbf16>, vector<8x288xf32> -> vector<8x288xf32>
    %754 = vector.extract_strided_slice %745 {offsets = [0, 1], sizes = [8, 288], strides = [1, 1]} : vector<8x322xbf16> to vector<8x288xbf16>
    %c1_281 = arith.constant 1 : index
    %c0_282 = arith.constant 0 : index
    %c0_283 = arith.constant 0 : index
    %755 = vector.load %arg17[%c1_281, %c0_282, %c0_283] : memref<9x8x8xbf16, #tpu.memory_space<vmem>>, vector<1x8x8xbf16>
    %756 = vector.shape_cast %755 : vector<1x8x8xbf16> to vector<8x8xbf16>
    %cst_284 = arith.constant dense<0.000000e+00> : vector<8x288xf32>
    %757 = tpu.matmul %756, %754, %cst_284 {dimension_numbers = #tpu.dot_dimension_numbers<[1], [0], [0], [1], [0, 0, 1, 1], [], []>} : vector<8x8xbf16>, vector<8x288xbf16>, vector<8x288xf32> -> vector<8x288xf32>
    %758 = arith.addf %753, %757 : vector<8x288xf32>
    %759 = vector.extract_strided_slice %749 {offsets = [0, 2], sizes = [8, 288], strides = [1, 1]} : vector<8x322xbf16> to vector<8x288xbf16>
    %c2_285 = arith.constant 2 : index
    %c0_286 = arith.constant 0 : index
    %c0_287 = arith.constant 0 : index
    %760 = vector.load %arg17[%c2_285, %c0_286, %c0_287] : memref<9x8x8xbf16, #tpu.memory_space<vmem>>, vector<1x8x8xbf16>
    %761 = vector.shape_cast %760 : vector<1x8x8xbf16> to vector<8x8xbf16>
    %cst_288 = arith.constant dense<0.000000e+00> : vector<8x288xf32>
    %762 = tpu.matmul %761, %759, %cst_288 {dimension_numbers = #tpu.dot_dimension_numbers<[1], [0], [0], [1], [0, 0, 1, 1], [], []>} : vector<8x8xbf16>, vector<8x288xbf16>, vector<8x288xf32> -> vector<8x288xf32>
    %763 = arith.addf %758, %762 : vector<8x288xf32>
    %764 = vector.extract_strided_slice %747 {offsets = [0, 16], sizes = [8, 288], strides = [1, 1]} : vector<8x322xbf16> to vector<8x288xbf16>
    %c3_289 = arith.constant 3 : index
    %c0_290 = arith.constant 0 : index
    %c0_291 = arith.constant 0 : index
    %765 = vector.load %arg17[%c3_289, %c0_290, %c0_291] : memref<9x8x8xbf16, #tpu.memory_space<vmem>>, vector<1x8x8xbf16>
    %766 = vector.shape_cast %765 : vector<1x8x8xbf16> to vector<8x8xbf16>
    %cst_292 = arith.constant dense<0.000000e+00> : vector<8x288xf32>
    %767 = tpu.matmul %766, %764, %cst_292 {dimension_numbers = #tpu.dot_dimension_numbers<[1], [0], [0], [1], [0, 0, 1, 1], [], []>} : vector<8x8xbf16>, vector<8x288xbf16>, vector<8x288xf32> -> vector<8x288xf32>
    %768 = arith.addf %763, %767 : vector<8x288xf32>
    %769 = vector.extract_strided_slice %745 {offsets = [0, 17], sizes = [8, 288], strides = [1, 1]} : vector<8x322xbf16> to vector<8x288xbf16>
    %c4_293 = arith.constant 4 : index
    %c0_294 = arith.constant 0 : index
    %c0_295 = arith.constant 0 : index
    %770 = vector.load %arg17[%c4_293, %c0_294, %c0_295] : memref<9x8x8xbf16, #tpu.memory_space<vmem>>, vector<1x8x8xbf16>
    %771 = vector.shape_cast %770 : vector<1x8x8xbf16> to vector<8x8xbf16>
    %cst_296 = arith.constant dense<0.000000e+00> : vector<8x288xf32>
    %772 = tpu.matmul %771, %769, %cst_296 {dimension_numbers = #tpu.dot_dimension_numbers<[1], [0], [0], [1], [0, 0, 1, 1], [], []>} : vector<8x8xbf16>, vector<8x288xbf16>, vector<8x288xf32> -> vector<8x288xf32>
    %773 = arith.addf %768, %772 : vector<8x288xf32>
    %774 = vector.extract_strided_slice %749 {offsets = [0, 18], sizes = [8, 288], strides = [1, 1]} : vector<8x322xbf16> to vector<8x288xbf16>
    %c5_297 = arith.constant 5 : index
    %c0_298 = arith.constant 0 : index
    %c0_299 = arith.constant 0 : index
    %775 = vector.load %arg17[%c5_297, %c0_298, %c0_299] : memref<9x8x8xbf16, #tpu.memory_space<vmem>>, vector<1x8x8xbf16>
    %776 = vector.shape_cast %775 : vector<1x8x8xbf16> to vector<8x8xbf16>
    %cst_300 = arith.constant dense<0.000000e+00> : vector<8x288xf32>
    %777 = tpu.matmul %776, %774, %cst_300 {dimension_numbers = #tpu.dot_dimension_numbers<[1], [0], [0], [1], [0, 0, 1, 1], [], []>} : vector<8x8xbf16>, vector<8x288xbf16>, vector<8x288xf32> -> vector<8x288xf32>
    %778 = arith.addf %773, %777 : vector<8x288xf32>
    %779 = vector.extract_strided_slice %747 {offsets = [0, 32], sizes = [8, 288], strides = [1, 1]} : vector<8x322xbf16> to vector<8x288xbf16>
    %c6_301 = arith.constant 6 : index
    %c0_302 = arith.constant 0 : index
    %c0_303 = arith.constant 0 : index
    %780 = vector.load %arg17[%c6_301, %c0_302, %c0_303] : memref<9x8x8xbf16, #tpu.memory_space<vmem>>, vector<1x8x8xbf16>
    %781 = vector.shape_cast %780 : vector<1x8x8xbf16> to vector<8x8xbf16>
    %cst_304 = arith.constant dense<0.000000e+00> : vector<8x288xf32>
    %782 = tpu.matmul %781, %779, %cst_304 {dimension_numbers = #tpu.dot_dimension_numbers<[1], [0], [0], [1], [0, 0, 1, 1], [], []>} : vector<8x8xbf16>, vector<8x288xbf16>, vector<8x288xf32> -> vector<8x288xf32>
    %783 = arith.addf %778, %782 : vector<8x288xf32>
    %784 = vector.extract_strided_slice %745 {offsets = [0, 33], sizes = [8, 288], strides = [1, 1]} : vector<8x322xbf16> to vector<8x288xbf16>
    %c7_305 = arith.constant 7 : index
    %c0_306 = arith.constant 0 : index
    %c0_307 = arith.constant 0 : index
    %785 = vector.load %arg17[%c7_305, %c0_306, %c0_307] : memref<9x8x8xbf16, #tpu.memory_space<vmem>>, vector<1x8x8xbf16>
    %786 = vector.shape_cast %785 : vector<1x8x8xbf16> to vector<8x8xbf16>
    %cst_308 = arith.constant dense<0.000000e+00> : vector<8x288xf32>
    %787 = tpu.matmul %786, %784, %cst_308 {dimension_numbers = #tpu.dot_dimension_numbers<[1], [0], [0], [1], [0, 0, 1, 1], [], []>} : vector<8x8xbf16>, vector<8x288xbf16>, vector<8x288xf32> -> vector<8x288xf32>
    %788 = arith.addf %783, %787 : vector<8x288xf32>
    %789 = vector.extract_strided_slice %749 {offsets = [0, 34], sizes = [8, 288], strides = [1, 1]} : vector<8x322xbf16> to vector<8x288xbf16>
    %c8_309 = arith.constant 8 : index
    %c0_310 = arith.constant 0 : index
    %c0_311 = arith.constant 0 : index
    %790 = vector.load %arg17[%c8_309, %c0_310, %c0_311] : memref<9x8x8xbf16, #tpu.memory_space<vmem>>, vector<1x8x8xbf16>
    %791 = vector.shape_cast %790 : vector<1x8x8xbf16> to vector<8x8xbf16>
    %cst_312 = arith.constant dense<0.000000e+00> : vector<8x288xf32>
    %792 = tpu.matmul %791, %789, %cst_312 {dimension_numbers = #tpu.dot_dimension_numbers<[1], [0], [0], [1], [0, 0, 1, 1], [], []>} : vector<8x8xbf16>, vector<8x288xbf16>, vector<8x288xf32> -> vector<8x288xf32>
    %793 = arith.addf %788, %792 : vector<8x288xf32>
    %c0_313 = arith.constant 0 : index
    %c0_314 = arith.constant 0 : index
    %794 = vector.load %arg18[%c0_313, %c0_314] : memref<8x1xf32, #tpu.memory_space<vmem>>, vector<8x1xf32>
    %795 = vector.broadcast %794 : vector<8x1xf32> to vector<8x288xf32>
    %796 = arith.addf %793, %795 : vector<8x288xf32>
    %cst_315 = arith.constant 0.000000e+00 : f32
    %797 = vector.broadcast %cst_315 : f32 to vector<8x288xf32>
    %798 = arith.maximumf %796, %797 : vector<8x288xf32>
    %799 = vector.extract_strided_slice %798 {offsets = [0, 0], sizes = [8, 256], strides = [1, 1]} : vector<8x288xf32> to vector<8x256xf32>
    %c0_316 = arith.constant 0 : index
    %c0_317 = arith.constant 0 : index
    %c0_318 = arith.constant 0 : index
    %800 = vector.load %arg19[%c0_316, %c0_317, %c0_318] : memref<1x8x256xf32, #tpu.memory_space<vmem>>, vector<1x8x256xf32>
    %801 = vector.shape_cast %800 : vector<1x8x256xf32> to vector<8x256xf32>
    %802 = vector.shape_cast %799 : vector<8x256xf32> to vector<1x8x256xf32>
    tpu.vector_store %arg19[%c0_316, %c0_317, %c0_318], %802 {strides = array<i32>} : memref<1x8x256xf32, #tpu.memory_space<vmem>>, vector<1x8x256xf32>,
    return
  }
  func.func @transform_0(%arg0: i32) -> (i32, i32, i32) {
    %c0_i32 = arith.constant 0 : i32
    %c0_i32_0 = arith.constant 0 : i32
    %c0_i32_1 = arith.constant 0 : i32
    return %arg0, %c0_i32, %c0_i32_0 : i32, i32, i32
  }
  func.func @transform_1(%arg0: i32) -> (i32, i32, i32) {
    %c0_i32 = arith.constant 0 : i32
    %c0_i32_0 = arith.constant 0 : i32
    %c0_i32_1 = arith.constant 0 : i32
    return %arg0, %c0_i32, %c0_i32_0 : i32, i32, i32
  }
  func.func @transform_2(%arg0: i32) -> (i32, i32, i32) {
    %c0_i32 = arith.constant 0 : i32
    %c0_i32_0 = arith.constant 0 : i32
    %c0_i32_1 = arith.constant 0 : i32
    return %arg0, %c0_i32, %c0_i32_0 : i32, i32, i32
  }
  func.func @transform_3(%arg0: i32) -> (i32, i32, i32) {
    %c0_i32 = arith.constant 0 : i32
    %c0_i32_0 = arith.constant 0 : i32
    %c0_i32_1 = arith.constant 0 : i32
    return %arg0, %c0_i32, %c0_i32_0 : i32, i32, i32
  }
  func.func @transform_4(%arg0: i32) -> (i32, i32, i32) {
    %c0_i32 = arith.constant 0 : i32
    %c0_i32_0 = arith.constant 0 : i32
    %c0_i32_1 = arith.constant 0 : i32
    %c0_i32_2 = arith.constant 0 : i32
    return %c0_i32, %c0_i32_0, %c0_i32_1 : i32, i32, i32
  }
  func.func @transform_5(%arg0: i32) -> (i32, i32) {
    %c0_i32 = arith.constant 0 : i32
    %c0_i32_0 = arith.constant 0 : i32
    %c0_i32_1 = arith.constant 0 : i32
    return %c0_i32, %c0_i32_0 : i32, i32
  }
  func.func @transform_6(%arg0: i32) -> (i32, i32, i32) {
    %c0_i32 = arith.constant 0 : i32
    %c0_i32_0 = arith.constant 0 : i32
    %c0_i32_1 = arith.constant 0 : i32
    %c0_i32_2 = arith.constant 0 : i32
    return %c0_i32, %c0_i32_0, %c0_i32_1 : i32, i32, i32
  }
  func.func @transform_7(%arg0: i32) -> (i32, i32) {
    %c0_i32 = arith.constant 0 : i32
    %c0_i32_0 = arith.constant 0 : i32
    %c0_i32_1 = arith.constant 0 : i32
    return %c0_i32, %c0_i32_0 : i32, i32
  }
  func.func @transform_8(%arg0: i32) -> (i32, i32, i32) {
    %c0_i32 = arith.constant 0 : i32
    %c0_i32_0 = arith.constant 0 : i32
    %c0_i32_1 = arith.constant 0 : i32
    %c0_i32_2 = arith.constant 0 : i32
    return %c0_i32, %c0_i32_0, %c0_i32_1 : i32, i32, i32
  }
  func.func @transform_9(%arg0: i32) -> (i32, i32) {
    %c0_i32 = arith.constant 0 : i32
    %c0_i32_0 = arith.constant 0 : i32
    %c0_i32_1 = arith.constant 0 : i32
    return %c0_i32, %c0_i32_0 : i32, i32
  }
  func.func @transform_10(%arg0: i32) -> (i32, i32, i32) {
    %c0_i32 = arith.constant 0 : i32
    %c0_i32_0 = arith.constant 0 : i32
    %c0_i32_1 = arith.constant 0 : i32
    %c0_i32_2 = arith.constant 0 : i32
    return %c0_i32, %c0_i32_0, %c0_i32_1 : i32, i32, i32
  }
  func.func @transform_11(%arg0: i32) -> (i32, i32) {
    %c0_i32 = arith.constant 0 : i32
    %c0_i32_0 = arith.constant 0 : i32
    %c0_i32_1 = arith.constant 0 : i32
    return %c0_i32, %c0_i32_0 : i32, i32
  }
  func.func @transform_12(%arg0: i32) -> (i32, i32, i32) {
    %c0_i32 = arith.constant 0 : i32
    %c0_i32_0 = arith.constant 0 : i32
    %c0_i32_1 = arith.constant 0 : i32
    %c0_i32_2 = arith.constant 0 : i32
    return %c0_i32, %c0_i32_0, %c0_i32_1 : i32, i32, i32
  }
  func.func @transform_13(%arg0: i32) -> (i32, i32) {
    %c0_i32 = arith.constant 0 : i32
    %c0_i32_0 = arith.constant 0 : i32
    %c0_i32_1 = arith.constant 0 : i32
    return %c0_i32, %c0_i32_0 : i32, i32
  }
  func.func @transform_14(%arg0: i32) -> (i32, i32, i32) {
    %c0_i32 = arith.constant 0 : i32
    %c0_i32_0 = arith.constant 0 : i32
    %c0_i32_1 = arith.constant 0 : i32
    %c0_i32_2 = arith.constant 0 : i32
    return %c0_i32, %c0_i32_0, %c0_i32_1 : i32, i32, i32
  }
  func.func @transform_15(%arg0: i32) -> (i32, i32) {
    %c0_i32 = arith.constant 0 : i32
    %c0_i32_0 = arith.constant 0 : i32
    %c0_i32_1 = arith.constant 0 : i32
    return %c0_i32, %c0_i32_0 : i32, i32
  }
  func.func @transform_16(%arg0: i32) -> (i32, i32, i32) {
    %c0_i32 = arith.constant 0 : i32
    %c0_i32_0 = arith.constant 0 : i32
    %c0_i32_1 = arith.constant 0 : i32
    %c0_i32_2 = arith.constant 0 : i32
    return %c0_i32, %c0_i32_0, %c0_i32_1 : i32, i32, i32
  }
  func.func @transform_17(%arg0: i32) -> (i32, i32) {
    %c0_i32 = arith.constant 0 : i32
    %c0_i32_0 = arith.constant 0 : i32
    %c0_i32_1 = arith.constant 0 : i32
    return %c0_i32, %c0_i32_0 : i32, i32
  }
  func.func @transform_18(%arg0: i32) -> (i32, i32, i32) {
    %c0_i32 = arith.constant 0 : i32
    %c0_i32_0 = arith.constant 0 : i32
    %c0_i32_1 = arith.constant 0 : i32
    return %arg0, %c0_i32, %c0_i32_0 : i32, i32, i32
  }
}

</mosaic_0001>

<bundles_post_ra>
// kernel: tpu_custom_call.1
= control target key start
LH: loop header
LB: loop body
LE: loop exit
PB: predicated region body
PF: predicated region fallthrough
CT: control target
= control target key end

     0   :  { %s8863_s0 = inlined_call_operand.hbm [shape: bf16[2,8,256], index: 0, kind: input, shape index: {}]   ;;  %s8864_s1 = inlined_call_operand.hbm [shape: bf16[2,16,64], index: 1, kind: input, shape index: {}]   ;;  %s8865_s2 = inlined_call_operand.vmem [shape: bf16[2,24,16], index: 2, kind: input, shape index: {}]   ;;  %s8866_s3 = inlined_call_operand.vmem [shape: bf16[2,32,4], index: 3, kind: input, shape index: {}]   ;;  %s8867_s4 = inlined_call_operand.vmem [shape: bf16[9,8,16], index: 4, kind: input, shape index: {}]   ;;  %s8868_s5 = inlined_call_operand.vmem [shape: f32[8,1], index: 5, kind: input, shape index: {}]   ;;  %s8869_s6 = inlined_call_operand.vmem [shape: bf16[9,8,8], index: 6, kind: input, shape index: {}]   ;;  %s8870_s7 = inlined_call_operand.vmem [shape: f32[8,1], index: 7, kind: input, shape index: {}]   ;;  %s8871_s8 = inlined_call_operand.vmem [shape: bf16[9,16,24], index: 8, kind: input, shape index: {}]   ;;  %s8872_s9 = inlined_call_operand.vmem [shape: f32[16,1], index: 9, kind: input, shape index: {}]   ;;  %s8873_s10 = inlined_call_operand.hbm [shape: bf16[9,16,16], index: 10, kind: input, shape index: {}]   ;;  %s8874_s11 = inlined_call_operand.vmem [shape: f32[16,1], index: 11, kind: input, shape index: {}]   ;;  %s8875_s12 = inlined_call_operand.vmem [shape: bf16[9,24,32], index: 12, kind: input, shape index: {}]   ;;  %s8876_s13 = inlined_call_operand.vmem [shape: f32[24,1], index: 13, kind: input, shape index: {}]   ;;  %s8877_s14 = inlined_call_operand.vmem [shape: bf16[9,24,24], index: 14, kind: input, shape index: {}]   ;;  %s8878_s15 = inlined_call_operand.vmem [shape: f32[24,1], index: 15, kind: input, shape index: {}]   ;;  %s8879_s16 = inlined_call_operand.vmem [shape: bf16[9,8,8], index: 16, kind: input, shape index: {}]   ;;  %s8880_s17 = inlined_call_operand.vmem [shape: f32[8,1], index: 17, kind: input, shape index: {}]   ;;  %s8881_s18 = inlined_call_operand.hbm [shape: f32[2,8,256], index: 18, kind: output, shape index: {}]  }
   0x1   :  { %8907 = sst [smem:[#allocation19_spill]] %s8863_s0 }
   0x2   :  { %8908 = sst [smem:[#allocation20_spill]] %s8864_s1 }
   0x3   :  { %8909 = sst [smem:[#allocation21_spill]] %s8865_s2 }
   0x4   :  { %8910 = sst [smem:[#allocation22_spill]] %s8867_s4 }
   0x5   :  { %8911 = sst [smem:[#allocation23_spill]] %s8868_s5 }
   0x6   :  { %8912 = sst [smem:[#allocation24_spill]] %s8869_s6 }
   0x7   :  { %8913 = sst [smem:[#allocation25_spill]] %s8870_s7 }
   0x8   :  { %8914 = sst [smem:[#allocation26_spill]] %s8873_s10 }
   0x9   :  { %8915 = sst [smem:[#allocation27_spill]] %s8879_s16 }
   0xa   :  { %8916 = sst [smem:[#allocation28_spill]] %s8880_s17 }
   0xb   :  { %8917 = sst [smem:[#allocation29_spill]] %s8881_s18 }
   0xc   :  { %23 = vsyncpa [#allocation3], 0 }
   0xd   :  { %25 = vsyncpa [#allocation3 + $0x1], 0 }
   0xe   :  { %26 = vsyncpa [#allocation6], 0 }
   0xf   :  { %28 = vsyncpa [#allocation6 + $0x1], 0 }
  0x10   :  { %29 = vsyncpa [#allocation4], 0 }
  0x11   :  { %31 = vsyncpa [#allocation4 + $0x1], 0  ;;  %s7415_s27 = smov 0   ;;  %s7417_s28 = smov 0  }
  0x12   :  { %s7419_s29 = smov 0   ;;  %s7421_s30 = smov 0  }
  0x13 LB: > { %8918 = sst [smem:[#allocation13_spill]] %s7205_s27  ;;  %s7436_s0 = sadd.s32 4294967295, %s7217_s30   ;;  %s7217_s30 = sphi %s7421_s30, %s8973_s30   ;;  %s7213_s29 = sphi %s7419_s29, %s8975_s29   ;;  %s7209_s28 = sphi %s7417_s28, %s8977_s28   ;;  %s7205_s27 = sphi %s7415_s27, %s8976_s27  }
  0x14   : > { %8919 = sst [smem:[#allocation14_spill]] %s7213_s29  ;;  %s6045_s19 = sadd.s32 4294967294, %s7217_s30  }
  0x15   : > { %p57_p0 = scmp.ne.s32.totalorder %s7209_s28, %s7205_s27  ;;  %p8897_p1 = scmp.eq.s32.totalorder %s7436_s0, 0 }
  0x16   : > { %p459_p3 = scmp.eq.s32.totalorder %s6045_s19, 1  ;;  %p6046_p5 = scmp.ge.s32.totalorder %s7217_s30, 1 }
  0x17   : > { %p7445_p4 = por %p8897_p1, %p57_p0  ;;  %p466_p7 = scmp.lt.s32.totalorder %s7217_s30, 3 }
  0x18   : > { %p7450_p6 = por %p459_p3, %p57_p0  ;;  %s7219_s22 = smov [#allocation7]  }
  0x19   : > { %s8920_s1 = scalar_select %p7445_p4, 1, 0 }
  0x1a   : > { %s8921_s20 = scalar_select %p7450_p6, 1, 0 }
  0x1b   : > { %p7455_p8 = pnand %p6046_p5, %p466_p7  ;;  %s496_s2 = sshll.u32 %s7219_s22, 4  ;;  %s497_s2 = int_to_ptr.vmem [resolvable:$true] %s496_s2 }
  0x1c   : > { %8922 = sst [smem:[#allocation15_spill]] %s8921_s20  ;;  %s7469_s24 = sadd.s32 1, %s7217_s30  }
  0x1d   : > { %s8923_s21 = scalar_select %p7455_p8, 1, 0 }
  0x1e   : > { %p6743_p9 = pneg %p7455_p8  ;;  %8925 = sst [smem:[#allocation16_spill]] %s7469_s24 }
  0x1f   : > { %s44_s25 = sadd.s32 1, %s7213_s29  ;;  %s41_s26 = ssub.s32 %s7217_s30, %s7469_s24 }
  0x20   : > { %p7464_p11 = pnand %p6743_p9, %p8897_p1  ;;  %s7074_s19 = scalar_lea.vmem %s497_s2, 1152 }
  0x21   : > { %p7075_p13 = scmp.ne.s32.totalorder %s497_s2, %s7074_s19  ;;  %p7082_p5 = scmp.lt.s32.totalorder %s497_s2, %s497_s2 }
  0x22   : > { %p7065_p12 = pneg %p7464_p11  ;;  %p7083_p7 = scmp.lt.s32.totalorder %s7074_s19, %s7074_s19 }
  0x24   : > { %p7077_p0 = pnand %p7075_p13, %p7065_p12  ;;  %p7084_p10 = por %p7083_p7, %p7082_p5 }
  0x26   : > { %p7078_p3 = pneg %p7077_p0 }
  0x28   : > { %p7085_p2 = pnand %p7084_p10, %p7078_p3 }
  0x2a   : > { %7088 = shalt.err (!%p7085_p2)
}
  0x2b   : > { %s8891_s22 = smov 64   ;;  %s8892_s24 = smov 4  }
  0x2c   : > { %s8926_s10 = sld [smem:[#allocation26_spill]]  ;;  %p42_p2 = scmp.eq.s32.totalorder %s41_s26, 0 }
  0x2d   : > { %p51_p9 = scmp.ne.s32.totalorder %s7213_s29, %s7209_s28  ;;  %p52_p10 = scmp.eq.s32.totalorder %s7217_s30, 0 }
  0x2e   : > { %p6759_p12 = scmp.lt.s32.totalorder %s7217_s30, 2  ;;  %p8928_p0 = scmp.eq.s32.totalorder %s7436_s0, 1 }
  0x2f   : > { %s7489_s27 = scalar_select %p42_p2, %s7213_s29, %s44_s25  }
  0x30   : > { %p53_p13 = por %p52_p10, %p51_p9  ;;  %p7493_p3 = por %p8928_p0, %p51_p9 }
  0x31   : > { %8927 = sst [smem:[#allocation17_spill]] %s7489_s27  ;;  %s531_s23 = sand.u32 1, %s7213_s29  }
  0x32   : > { %6746 = dma.hbm_to_vmem [thread:$0]  (!%p7464_p11), %s8926_s10, 1152, %s497_s2, [#allocation6], %s8891_s22, %s8891_s22, %s8892_s24  }
  0x33   : > { %s8929_s18 = scalar_select %p7493_p3, 1, 0 }
  0x34   : > { %s6332_s17 = sshll.u32 %s7217_s30, 7  ;;  %s7499_s16 = sshll.u32 %s531_s23, 3 }
  0x35   : > { %8930 = sst [smem:[#allocation18_spill]] %s8929_s18  ;;  %s535_s25 = scalar_lea.vmem [#allocation2], %s7499_s16 }
  0x36   : > { %s8931_s20 = sld [smem:[#allocation19_spill]]  ;;  %s543_s26 = sshll.u32 %s535_s25, 4  ;;  %s544_s26 = int_to_ptr.vmem [resolvable:$true] %s543_s26 }
  0x37   : > { %p7507_p11 = pnand %p6759_p12, %p53_p13  ;;  %s8933_s10 = sld [smem:[#allocation20_spill]] }
  0x38   : > { %s532_s6 = scalar_lea.sflag [#allocation3], %s531_s23 }
  0x39   : > { %p7091_p7 = pneg %p7507_p11 }
  0x3c   : > { %s7504_s2 = scalar_lea.hbm %s8931_s20, %s6332_s17  ;;  %s7094_s18 = scalar_lea.hbm %s8931_s20, 256 }
  0x3d   : > { %s7514_s27 = scalar_lea.hbm %s8933_s10, %s6332_s17  ;;  %s7089_s7 = scalar_lea.hbm %s7504_s2, 128 }
  0x3e   : > { %p7090_p5 = scmp.ne.s32.totalorder %s7504_s2, %s7089_s7  ;;  %p7095_p10 = scmp.lt.s32.totalorder %s7504_s2, %s8931_s20 }
  0x3f   : > { %p7096_p12 = scmp.lt.s32.totalorder %s7094_s18, %s7089_s7 }
  0x40   : > { %p7092_p2 = pnand %p7091_p7, %p7090_p5 }
  0x41   : > { %p7097_p13 = por %p7096_p12, %p7095_p10 }
  0x42   : > { %p7093_p9 = pneg %p7092_p2 }
  0x44   : > { %p7098_p0 = pnand %p7097_p13, %p7093_p9 }
  0x46   : > { %7101 = shalt.err (!%p7098_p0)
}
  0x47   : > { %s7102_s17 = scalar_lea.vmem %s544_s26, 128  ;;  %s7222_s24 = smov [#allocation2]  }
  0x48   : > { %p7103_p1 = scmp.ne.s32.totalorder %s544_s26, %s7102_s17  ;;  %s7107_s22 = sshll.u32 %s7222_s24, 4  ;;  %s7108_s22 = int_to_ptr.vmem [resolvable:$false] %s7107_s22 }
  0x49   : > { %s7109_s29 = scalar_lea.vmem %s7108_s22, 256  ;;  %p7110_p2 = scmp.lt.s32.totalorder %s544_s26, %s7108_s22 }
  0x4a   : > { %p7105_p6 = pnand %p7103_p1, %p7091_p7  ;;  %p7111_p3 = scmp.lt.s32.totalorder %s7109_s29, %s7102_s17 }
  0x4c   : > { %p7106_p5 = pneg %p7105_p6  ;;  %p7112_p4 = por %p7111_p3, %p7110_p2 }
  0x4e   : > { %p7113_p8 = pnand %p7112_p4, %p7106_p5 }
  0x50   : > { %7116 = shalt.err (!%p7113_p8)
}
  0x51   : > { %6750 = dma.hbm_to_vmem [thread:$0]  (!%p7507_p11), %s7504_s2, 128, %s544_s26, %s532_s6  }
  0x52   : > { %s554_s4 = scalar_lea.vmem [#allocation5], %s7499_s16  ;;  %s550_s18 = sand.u32 1, %s7217_s30  }
  0x53   : > { %s561_s5 = sshll.u32 %s554_s4, 4  ;;  %s551_s23 = scalar_lea.sflag [#allocation6], %s550_s18  ;;  %s7538_s5 = int_to_ptr.vmem [resolvable:$true] %s561_s5 }
  0x54   : > { %s7117_s7 = scalar_lea.hbm %s7514_s27, 128  ;;  %s7122_s24 = scalar_lea.hbm %s8933_s10, 256 }
  0x55   : > { %p7118_p1 = scmp.ne.s32.totalorder %s7514_s27, %s7117_s7  ;;  %p7123_p8 = scmp.lt.s32.totalorder %s7514_s27, %s8933_s10 }
  0x56   : > { %p7124_p3 = scmp.lt.s32.totalorder %s7122_s24, %s7117_s7 }
  0x57   : > { %p7120_p4 = pnand %p7118_p1, %p7091_p7 }
  0x58   : > { %p7125_p9 = por %p7124_p3, %p7123_p8 }
  0x59   : > { %p7121_p6 = pneg %p7120_p4 }
  0x5b   : > { %p7126_p10 = pnand %p7125_p9, %p7121_p6 }
  0x5d   : > { %7129 = shalt.err (!%p7126_p10)
}
  0x5e   : > { %s7130_s16 = scalar_lea.vmem %s7538_s5, 128  ;;  %s7223_s2 = smov [#allocation5]  }
  0x5f   : > { %p7131_p12 = scmp.ne.s32.totalorder %s7538_s5, %s7130_s16  ;;  %s7135_s26 = sshll.u32 %s7223_s2, 4  ;;  %s7136_s26 = int_to_ptr.vmem [resolvable:$false] %s7135_s26 }
  0x60   : > { %s7137_s6 = scalar_lea.vmem %s7136_s26, 256  ;;  %p7138_p5 = scmp.lt.s32.totalorder %s7538_s5, %s7136_s26 }
  0x61   : > { %p7133_p13 = pnand %p7131_p12, %p7091_p7  ;;  %p7139_p2 = scmp.lt.s32.totalorder %s7137_s6, %s7130_s16 }
  0x63   : > { %p7134_p0 = pneg %p7133_p13  ;;  %p7140_p1 = por %p7139_p2, %p7138_p5 }
  0x65   : > { %p7141_p4 = pnand %p7140_p1, %p7134_p0 }
  0x67   : > { %7144 = shalt.err (!%p7141_p4)
}
  0x68   : > { %s8934_s4 = smov 4   ;;  %s8935_s18 = smov 64  }
  0x69   : > { %6753 = dma.hbm_to_vmem [thread:$0]  (!%p7507_p11), %s7514_s27, 128, %s7538_s5, %s551_s23, %s8935_s18, %s8935_s18, %s8934_s4  }
  0x6a   : > { %p8936_p7 = scmp.ne.s32.totalorder %s8923_s21, 0 }
  0x6b   : > { %s7568_s7 = sand.u32 (!%p8936_p7), 1, %s7209_s28   ;;  %p8937_p6 = scmp.ne.s32.totalorder (!%p8936_p7), %s8920_s1, 0 }
  0x6c   : > { %589 = sbr.rel (%p8936_p7) target bundleno = 2899 (0xb53), region = 92  ;;  %s6056_s25 = sshll.u32 (!%p8936_p7), %s7568_s7, 3 }
  0x6d   : > { %s592_s17 = scalar_lea.sflag (!%p8936_p7), [#allocation3], %s7568_s7  ;;  %s7572_s24 = scalar_lea.vmem (!%p8936_p7), [#allocation2], %s6056_s25 }
  0x71   : > { %7188 = dma.done.wait (%p8937_p6), %s592_s17, 128  }
  0x72   : > { %7190 = vsyncadd (%p8937_p6), %s592_s17, 4294967168  ;;  %s600_s27 = sand.u32 1, %s7436_s0   ;;  %s7579_s19 = scalar_lea.vmem [#allocation5], %s6056_s25 }
  0x73   : > { %s601_s21 = scalar_lea.sflag [#allocation6], %s600_s27 }
  0x74   : > { %7192 = dma.done.wait (%p8937_p6), %s601_s21, 128  }
  0x75   : > { %7194 = vsyncadd (%p8937_p6), %s601_s21, 4294967168  ;;  %p8938_p11 = scmp.eq.s32.totalorder %s7436_s0, 0 }
  0x77   : > { %7196 = dma.done.wait (%p8938_p11), [#allocation6], 1152   ;;  %p8939_p8 = pmov %p8938_p11 }
  0x78   : > { %p676_p3 = scmp.lt.s32.totalorder %s7436_s0, 1  ;;  %v7224_v0 = vmov 1   ;;  %v7225_v1 = vmov 0   ;;  %v7226_v4 = vmov 2   ;;  %v7227_v5 = vmov 3   ;;  %s8940_s6 = sld [smem:[#allocation21_spill]] }
  0x79   : > { %7198 = vsyncadd (%p8939_p8), [#allocation6], 4294966144  ;;  %6893 = vset.pattern.permute.xlu1 %v7224_v0  ;;  %6892 = vset.pattern.permute.xlu0 %v7225_v1  ;;  %v691_v8 = vlaneseq  ;;  %v7228_v9 = vmov 839922192   ;;  %vm825_vm0 = vcmask 15360   ;;  %s7229_s18 = smov 5  }
  0x7a   : > { %s7593_s5 = scalar_select %p676_p3, %s7436_s0, 1  ;;  %v719_v10 = vunpack.c.l.s4 %v7228_v9  ;;  %vm966_vm1 = vcmask 39936   ;;  %vm1022_vm3 = vcmask 261120   ;;  %v7006_v63 = vld [vmem:[%s8875_s12] sm:$0xff]   ;;  %vm972_vm4 = vcmask 72704  }
  0x7b   : > { %v722_v12 = vshrl.u32 %v691_v8, 7  ;;  %s7230_s25 = smov 9   ;;  %s7231_s17 = smov 13   ;;  %v7632_v60 = vand.u32 127, %v691_v8  ;;  %6465 = vmatprep.mubr.msk.bf16.mxu1 %vm1022_vm3, %v7006_v63  ;;  %vm977_vm6 = vcmask 105472   ;;  %vm982_vm7 = vcmask 138240  }
  0x7c   : > { %s6334_s1 = sshll.u32 %s7593_s5, 4  ;;  %s6732_s16 = smul.u32 12, %s7593_s5  ;;  %v720_v11 = vunpack.c.0.s8 %v719_v10  ;;  %vm987_vm8 = vcmask 171008   ;;  %vm990_vm9 = vcmask 236544   ;;  %v7012_v63 = vld [vmem:[%s8875_s12 + $0x20] ss:$0 sps:$4 sm:$0xff]  }
  0x7d   : > { %s685_s29 = scalar_lea.vmem %s8866_s3, %s6334_s1  ;;  %s7232_s27 = smov 17   ;;  %v697_v61 = vand.u32 3, %v7632_v60  ;;  %vm1750_vm10 = vcmask 1043456   ;;  %vm1743_vm11 = vcmask 195584   ;;  %vm8904_vm12 = vcmask 31744  }
  0x7e   : > { %v689_v2 = vld [vmem:[%s685_s29 + $0x8] sm:$0xf]  ;;  %v690_v3 = vld [vmem:[%s685_s29 + $0xc] sm:$0xf]  ;;  %v687_v6 = vld [vmem:[%s685_s29] sm:$0xf]  ;;  %s7613_s4 = scalar_lea.vmem %s8940_s6, %s6732_s16  ;;  %v723_v15 = vsub.s32 %v720_v11, %v722_v12 }
  0x7f   : > { %784 = vperm.xlu1 %6893, %v689_v2   ;;  %739 = vperm.xlu0 %6892, %v689_v2   ;;  %v688_v7 = vld [vmem:[%s685_s29 + $0x4] sm:$0xf]  ;;  %v7004_v58 = vld [vmem:[%s7613_s4 + $0x8] ss:$0 sps:$4 sm:$0xff]   ;;  %vm705_vm2 = vcmp.ne.s32.totalorder %v697_v61, 0  ;;  %vm709_vm5 = vcmp.ne.s32.totalorder %v697_v61, 1 }
  0x80   : > { %v7005_v59 = vld [vmem:[%s7613_s4] sm:$0xff]   ;;  %s7234_s1 = smov 127   ;;  %s8905_s23 = smov 126   ;;  %vm8903_vm13 = vcmask 48128   ;;  %vm2631_vm14 = vcmask 203776   ;;  %vm2636_vm15 = vcmask 269312  }
  0x81   : > { %s7236_s4 = smov 124   ;;  %s7239_s21 = smov 120  }
  0x82   : > { %s8901_s5 = smov 119   ;;  %s7241_s22 = smov 118  }
  0x83   : > { %795 = vperm.xlu1 %6893, %v690_v3   ;;  %751 = vperm.xlu0 %6892, %v690_v3   ;;  %s7254_s6 = smov 33   ;;  %s7259_s29 = smov 65  }
  0x84   : > { %s8941_s16 = smov 119   ;;  %s7261_s2 = smov 112  }
  0x85   : > { %s7262_s26 = smov 111  }
  0x87   : > { %6894 = vset.pattern.permute.xlu1 %v7226_v4  ;;  %6896 = vset.pattern.permute.xlu0 %v7227_v5 }
  0x88   : > { %866 = vperm.xlu1 %6894, %v690_v3   ;;  %910 = vperm.xlu0 %6896, %v690_v3  }
  0x8c   : > { %6895 = vset.pattern.permute.xlu1 %v7227_v5  ;;  %6898 = vset.pattern.permute.xlu0 %v7224_v0 }
  0x8d   : > { %899 = vperm.xlu1 %6895, %v689_v2   ;;  %762 = vperm.xlu0 %6898, %v687_v6  }
  0x91   : > { %6897 = vset.pattern.permute.xlu1 %v7225_v1  ;;  %6899 = vset.pattern.permute.xlu0 %v7226_v4 }
  0x92   : > { %855 = vperm.xlu0 %6899, %v689_v2   ;;  %715 = vperm.xlu1 %6897, %v687_v6  }
  0x96   : > { %727 = vperm.xlu1 %6897, %v688_v7   ;;  %844 = vperm.xlu0 %6899, %v688_v7  }
  0x9a   : > { %6900 = vset.pattern.permute.xlu1 %v7224_v0  ;;  %6903 = vset.pattern.permute.xlu0 %v7225_v1 }
  0x9b   : > { %773 = vperm.xlu1 %6900, %v688_v7  }
  0x9f   : > { %6901 = vset.pattern.permute.xlu1 %v7226_v4 }
  0xa0   : > { %833 = vperm.xlu1 %6901, %v687_v6  }
  0xa4   : > { %6902 = vset.pattern.permute.xlu1 %v7227_v5 }
  0xa5   : > { %877 = vperm.xlu1 %6902, %v687_v6   ;;  %v7233_v6 = vmov 0.0  }
  0xa6   : > { %v6064_v11 = vsel %vm709_vm5, 1.0, %v7233_v6 }
  0xa9   : > { %888 = vperm.xlu1 %6902, %v688_v7   ;;  %v6063_v7 = vsel %vm705_vm2, 1.0, %v7233_v6  ;;  %vm2641_vm2 = vcmask 334848  }
  0xad   : > { %6904 = vset.pattern.permute.xlu1 %v7225_v1 }
  0xfa   : > { %v785_v13 = vpop.permute.xlu1 %784  ;;  %v740_v14 = vpop.permute.xlu0 %739 }
  0xfb   : > { %v748_v16 = vrot.slane %v740_v14, %v723_v15  ;;  %v793_v19 = vrot.slane %v785_v13, %v723_v15  ;;  %v7644_v13 = vpack.c.bf16 %v6063_v7, %v6063_v7 }
  0xfe   : > { %v796_v17 = vpop.permute.xlu1 %795  ;;  %v752_v18 = vpop.permute.xlu0 %751 }
  0xff   : > { %v804_v20 = vrot.slane %v796_v17, %v723_v15  ;;  %v760_v21 = vrot.slane %v752_v18, %v723_v15 }
 0x101   : > { %v6068_v22 = vcombine.low %v793_v19, %v804_v20  ;;  %v6066_v23 = vcombine.low %v748_v16, %v760_v21  ;;  %v7648_v16 = vpack.c.bf16 %v6064_v11, %v6064_v11  ;;  %v7008_v20 = vld [vmem:[%s8875_s12 + $0xc] sm:$0xff]  }
 0x102   : > { %6457 = vmatprep.mubr.msk.bf16.mxu0 %vm1022_vm3, %v7008_v20  ;;  %v7020_v20 = vld [vmem:[%s8875_s12 + $0x50] ss:$0 sps:$4 sm:$0xff]  }
 0x103   : > { %v867_v24 = vpop.permute.xlu1 %866  ;;  %v831_v25 = vsel %vm825_vm0, %v6066_v23, %v6068_v22  ;;  %v911_v26 = vpop.permute.xlu0 %910 }
 0x104   : > { %950 = vrot.lane.b32.xlu0 %v831_v25, %s7229_s18  ;;  %954 = vrot.lane.b32.xlu1 %v831_v25, %s7230_s25  ;;  %v919_v29 = vrot.slane %v911_v26, %v723_v15  ;;  %v875_v33 = vrot.slane %v867_v24, %v723_v15 }
 0x108   : > { %v900_v27 = vpop.permute.xlu1 %899  ;;  %v763_v28 = vpop.permute.xlu0 %762 }
 0x109   : > { %v908_v30 = vrot.slane %v900_v27, %v723_v15  ;;  %v771_v39 = vrot.slane %v763_v28, %v723_v15 }
 0x10b   : > { %v6072_v35 = vcombine.low %v908_v30, %v919_v29 }
 0x10d   : > { %v856_v31 = vpop.permute.xlu0 %855  ;;  %v716_v32 = vpop.permute.xlu1 %715 }
 0x10e   : > { %v864_v34 = vrot.slane %v856_v31, %v723_v15  ;;  %v724_v42 = vrot.slane %v716_v32, %v723_v15 }
 0x110   : > { %v6070_v36 = vcombine.low %v864_v34, %v875_v33  ;;  %v7007_v33 = vld [vmem:[%s8875_s12 + $0x8] ss:$0 sps:$4 sm:$0xff]  }
 0x111   : > { %v728_v37 = vpop.permute.xlu1 %727  ;;  %v845_v48 = vpop.permute.xlu0 %844  ;;  %v7011_v34 = vld [vmem:[%s8875_s12 + $0x24] sm:$0xff]  }
 0x112   : > { %v945_v38 = vsel %vm825_vm0, %v6070_v36, %v6072_v35  ;;  %v736_v40 = vrot.slane %v728_v37, %v723_v15  ;;  %v853_v50 = vrot.slane %v845_v48, %v723_v15  ;;  %v1669_v48 = vld [vmem:[%s8876_s13 + $0x8] sm:$0xff] }
 0x113   : > { %960 = vrot.lane.b32.xlu0 %v945_v38, %s7231_s17  ;;  %964 = vrot.lane.b32.xlu1 %v945_v38, %s7232_s27 }
 0x114   : > { %v6065_v44 = vcombine.low %v724_v42, %v736_v40 }
 0x116   : > { %v774_v41 = vpop.permute.xlu1 %773 }
 0x117   : > { %v782_v43 = vrot.slane %v774_v41, %v723_v15 }
 0x119   : > { %v6067_v45 = vcombine.low %v771_v39, %v782_v43 }
 0x11b   : > { %v834_v46 = vpop.permute.xlu1 %833  ;;  %v828_v47 = vsel %vm825_vm0, %v6065_v44, %v6067_v45 }
 0x11c   : > { %952 = vrot.lane.b32.xlu1 %v828_v47, %s7230_s25  ;;  %948 = vrot.lane.b32.xlu0 %v828_v47, %s7229_s18  ;;  %v842_v51 = vrot.slane %v834_v46, %v723_v15  ;;  %v1670_v47 = vld [vmem:[%s8876_s13 + $0x10] sm:$0xff] }
 0x11e   : > { %v6069_v55 = vcombine.low %v842_v51, %v853_v50  ;;  %v2411_v50 = vld [vmem:[%s8878_s15 + $0x8] sm:$0xff]  ;;  %v1668_v51 = vld [vmem:[%s8876_s13] sm:$0xff] }
 0x120   : > { %v878_v49 = vpop.permute.xlu1 %877 }
 0x121   : > { %v886_v53 = vrot.slane %v878_v49, %v723_v15  ;;  %v2412_v49 = vld [vmem:[%s8878_s15 + $0x10] sm:$0xff] }
 0x124   : > { %v889_v52 = vpop.permute.xlu1 %888 }
 0x125   : > { %v897_v54 = vrot.slane %v889_v52, %v723_v15  ;;  %v2410_v52 = vld [vmem:[%s8878_s15] sm:$0xff] }
 0x127   : > { %v6071_v56 = vcombine.low %v886_v53, %v897_v54 }
 0x129   : > { %v942_v57 = vsel %vm825_vm0, %v6069_v55, %v6071_v56  ;;  %v7009_v56 = vld [vmem:[%s8875_s12 + $0x14] ss:$0 sps:$4 sm:$0xff]  }
 0x12a   : > { %962 = vrot.lane.b32.xlu1 %v942_v57, %s7232_s27  ;;  %958 = vrot.lane.b32.xlu0 %v942_v57, %s7231_s17  ;;  %s7238_s17 = smov 122  }
 0x12e   : > { %1705 = vrot.lane.b32.xlu0 %v7004_v58, %s7229_s18  ;;  %1703 = vrot.lane.b32.xlu1 %v7005_v59, %s7229_s18  ;;  %s7237_s18 = smov 123   ;;  %v7010_v58 = vld [vmem:[%s8875_s12 + $0x18] sm:$0xff]  }
 0x176   : > { %v951_v62 = vpop.permute.xlu0 %950  ;;  %v955_v2 = vpop.permute.xlu1 %954 }
 0x177   : > { %v971_v3 = vsel %vm966_vm1, 0, %v951_v62 }
 0x178   : > { %v976_v8 = vsel %vm972_vm4, %v971_v3, %v955_v2  ;;  %v7013_v2 = vld [vmem:[%s8875_s12 + $0x2c] ss:$0 sps:$4 sm:$0xff]  }
 0x185   : > { %v961_v9 = vpop.permute.xlu0 %960  ;;  %v965_v10 = vpop.permute.xlu1 %964 }
 0x186   : > { %v981_v12 = vsel %vm977_vm6, %v976_v8, %v961_v9  ;;  %v7014_v8 = vld [vmem:[%s8875_s12 + $0x30] sm:$0xff]   ;;  %v7015_v9 = vld [vmem:[%s8875_s12 + $0x3c] sm:$0xff]  }
 0x187   : > { %v986_v14 = vsel %vm982_vm7, %v981_v12, %v965_v10  ;;  %v7016_v12 = vld [vmem:[%s8875_s12 + $0x38] ss:$0 sps:$4 sm:$0xff]  }
 0x188   : > { %v989_v15 = vsel %vm987_vm8, %v986_v14, 0  ;;  %v7017_v14 = vld [vmem:[%s8875_s12 + $0x44] ss:$0 sps:$4 sm:$0xff]  }
 0x189   : > { %v993_v17 = vsel %vm990_vm9, %v989_v15, 0 }
 0x18a   : > { %1018 = vrot.lane.b32.xlu0 %v993_v17, %s7234_s1  ;;  %v996_v18 = vmul.bf16 %v993_v17, %v7644_v13  ;;  %v998_v19 = vmul.bf16 %v993_v17, %v7648_v16 }
 0x18c   : > { %6461 = vmatprep.subr.bf16.mxu1 %v996_v18 }
 0x18d   : > { %6462 = vmatpush3.bf16.msra.mxu1 %v996_v18 }
 0x18e   : > { %1155 = vrot.lane.b32.xlu0 %v998_v19, %s8905_s23  ;;  %v949_v21 = vpop.permute.xlu0 %948  ;;  %v953_v22 = vpop.permute.xlu1 %952 }
 0x18f   : > { %v969_v23 = vsel %vm966_vm1, 0, %v949_v21 }
 0x190   : > { %v974_v24 = vsel %vm972_vm4, %v969_v23, %v953_v22  ;;  %v7021_v22 = vld [vmem:[%s8875_s12 + $0x5c] ss:$0 sps:$4 sm:$0xff]  }
 0x19c   : > { %v959_v25 = vpop.permute.xlu0 %958  ;;  %v963_v26 = vpop.permute.xlu1 %962 }
 0x19d   : > { %v979_v27 = vsel %vm977_vm6, %v974_v24, %v959_v25  ;;  %v7022_v24 = vld [vmem:[%s8875_s12 + $0x60] sm:$0xff]   ;;  %v7023_v25 = vld [vmem:[%s8877_s14 + $0xc] sm:$0xff]   ;;  %vm7260_vm6 = vmmov 0  }
 0x19e   : > { %v984_v28 = vsel %vm982_vm7, %v979_v27, %v963_v26 }
 0x19f   : > { %v988_v29 = vsel %vm987_vm8, %v984_v28, 0 }
 0x1a0   : > { %v991_v30 = vsel %vm990_vm9, %v988_v29, 0  ;;  %v1706_v35 = vpop.permute.xlu0 %1705  ;;  %v1704_v38 = vpop.permute.xlu1 %1703  ;;  %v7024_v29 = vld [vmem:[%s8875_s12 + $0x68] ss:$0 sps:$4 sm:$0xff]  }
 0x1a1   : > { %1016 = vrot.lane.b32.xlu1 %v991_v30, %s7234_s1  ;;  %v997_v31 = vmul.bf16 %v991_v30, %v7648_v16  ;;  %v995_v32 = vmul.bf16 %v991_v30, %v7644_v13  ;;  %v1710_v36 = vsel %vm966_vm1, 0, %v1706_v35  ;;  %v1708_v40 = vsel %vm966_vm1, 0, %v1704_v38  ;;  %v7027_v35 = vld [vmem:[%s8877_s14 + $0x18] sm:$0xff]  }
 0x1a2   : > { %v1712_v37 = vsel %vm987_vm8, %v1710_v36, 0  ;;  %v1711_v41 = vsel %vm987_vm8, %v1708_v40, 0  ;;  %v7029_v40 = vld [vmem:[%s8877_s14 + $0x20] ss:$0 sps:$4 sm:$0xff]   ;;  %vm2651_vm8 = vcmask 465920  }
 0x1a3   : > { %1153 = vrot.lane.b32.xlu0 %v997_v31, %s8905_s23  ;;  %6463 = vmatprep.subr.bf16.mxu1 %v995_v32  ;;  %v1715_v39 = vsel %vm990_vm9, %v1712_v37, 0  ;;  %v1713_v43 = vsel %vm990_vm9, %v1711_v41, 0  ;;  %vm2656_vm9 = vcmask 531456  }
 0x1a4   : > { %6464 = vmatpush3.bf16.msra.mxu1 %v995_v32  ;;  %v1720_v42 = vmul.bf16 %v1715_v39, %v7648_v16  ;;  %v7700_v44 = vmul.bf16 %v1715_v39, %v7644_v13  ;;  %v1719_v45 = vmul.bf16 %v1713_v43, %v7648_v16  ;;  %v7707_v46 = vmul.bf16 %v1713_v43, %v7644_v13  ;;  %v7018_v16 = vld [vmem:[%s8875_s12 + $0x48] sm:$0xff]  }
 0x1a5   : > { %1232 = vrot.lane.b32.xlu1 %v996_v18, %s7236_s4 }
 0x1a7   : > { %1307 = vrot.lane.b32.xlu0 %v993_v17, %s7237_s18  ;;  %6466 = vmatmul.mubr.msk.bf16.vlgmr.msra.gmra.mxu1 %vm1022_vm3, %v7007_v33  ;;  %v7026_v33 = vld [vmem:[%s8877_s14] sm:$0xff]  }
 0x1a8   : > { %6481 = vmatprep.mubr.msk.bf16.mxu1 %vm1022_vm3, %v7011_v34  ;;  %v1817_v34 = vsel %vm1750_vm10, %v7700_v44, 0 }
 0x1a9   : > { %1230 = vrot.lane.b32.xlu1 %v995_v32, %s7236_s4 }
 0x1ab   : > { %1305 = vrot.lane.b32.xlu0 %v991_v30, %s7237_s18 }
 0x1ad   : > { %1382 = vrot.lane.b32.xlu1 %v998_v19, %s7238_s17 }
 0x1af   : > { %1457 = vrot.lane.b32.xlu0 %v996_v18, %s7239_s21 }
 0x1b1   : > { %1380 = vrot.lane.b32.xlu1 %v997_v31, %s7238_s17 }
 0x1b3   : > { %1455 = vrot.lane.b32.xlu0 %v995_v32, %s7239_s21 }
 0x1b5   : > { %1532 = vrot.lane.b32.xlu1 %v993_v17, %s8901_s5  ;;  %v7019_v17 = vld [vmem:[%s8875_s12 + $0x54] sm:$0xff]  }
 0x1b7   : > { %1607 = vrot.lane.b32.xlu0 %v998_v19, %s7241_s22 }
 0x1b9   : > { %1530 = vrot.lane.b32.xlu1 %v991_v30, %s8901_s5 }
 0x1bb   : > { %1605 = vrot.lane.b32.xlu0 %v997_v31, %s7241_s22  ;;  %v7025_v31 = vld [vmem:[%s8877_s14 + $0x14] ss:$0 sps:$4 sm:$0xff]  }
 0x1bd   : > { %1740 = vrot.lane.b32.xlu1 %v1715_v39, %s7234_s1 }
 0x1bf   : > { %1883 = vrot.lane.b32.xlu0 %v1720_v42, %s8905_s23 }
 0x1c1   : > { %1738 = vrot.lane.b32.xlu1 %v1713_v43, %s7234_s1 }
 0x1c3   : > { %1962 = vrot.lane.b32.xlu0 %v7700_v44, %s7236_s4 }
 0x1c5   : > { %1881 = vrot.lane.b32.xlu1 %v1719_v45, %s8905_s23 }
 0x1c7   : > { %1960 = vrot.lane.b32.xlu0 %v7707_v46, %s7236_s4  ;;  %s7256_s4 = smov 41  }
 0x1c9   : > { %2039 = vrot.lane.b32.xlu1 %v1715_v39, %s7237_s18 }
 0x1cb   : > { %2116 = vrot.lane.b32.xlu0 %v1720_v42, %s7238_s17 }
 0x1cd   : > { %2037 = vrot.lane.b32.xlu1 %v1713_v43, %s7237_s18  ;;  %s7257_s18 = smov 49  }
 0x1cf   : > { %2114 = vrot.lane.b32.xlu0 %v1719_v45, %s7238_s17  ;;  %s7258_s17 = smov 57  }
 0x1d1   : > { %2193 = vrot.lane.b32.xlu1 %v7700_v44, %s7239_s21 }
 0x1d3   : > { %2270 = vrot.lane.b32.xlu0 %v1715_v39, %s8901_s5  ;;  %v7028_v39 = vld [vmem:[%s8877_s14 + $0x8] ss:$0 sps:$4 sm:$0xff]  }
 0x1d5   : > { %2191 = vrot.lane.b32.xlu1 %v7707_v46, %s7239_s21 }
 0x1d7   : > { %2268 = vrot.lane.b32.xlu0 %v1713_v43, %s8901_s5  ;;  %v7030_v43 = vld [vmem:[%s8877_s14 + $0x24] sm:$0xff]   ;;  %s7255_s5 = smov 25  }
 0x1d9   : > { %2347 = vrot.lane.b32.xlu1 %v1720_v42, %s7241_s22 }
 0x1db   : > { %1683 = vperm.xlu0 %6903, %v1670_v47  }
 0x1dd   : > { %2345 = vrot.lane.b32.xlu1 %v1719_v45, %s7241_s22  ;;  %v7031_v45 = vld [vmem:[%s8877_s14 + $0x30] sm:$0xff]  }
 0x1df   : > { %1678 = vperm.xlu0 %6903, %v1669_v48   ;;  %v7032_v48 = vld [vmem:[%s8877_s14 + $0x2c] ss:$0 sps:$4 sm:$0xff]  }
 0x1e1   : > { %2425 = vperm.xlu1 %6904, %v2412_v49  }
 0x1e3   : > { %2420 = vperm.xlu0 %6903, %v2411_v50   ;;  %v7033_v50 = vld [vmem:[%s8877_s14 + $0x38] ss:$0 sps:$4 sm:$0xff]  }
 0x1e5   : > { %1673 = vperm.xlu1 %6904, %v1668_v51  }
 0x1e7   : > { %6905 = vset.pattern.permute.xlu0 %v7224_v0 }
 0x1e9   : > { %2415 = vperm.xlu1 %6904, %v2410_v52   ;;  %v7034_v52 = vld [vmem:[%s8877_s14 + $0x3c] sm:$0xff]  }
 0x1fc   : > { %v1019_v53 = vpop.permute.xlu0 %1018 }
 0x1fd   : > { %6453 = vmatprep.subr.bf16.mxu0 %v1019_v53 }
 0x1fe   : > { %6454 = vmatpush3.bf16.msra.mxu0 %v1019_v53 }
 0x200   : > { %v1156_v54 = vpop.permute.xlu0 %1155 }
 0x213   : > { %v1017_v55 = vpop.permute.xlu1 %1016 }
 0x214   : > { %6455 = vmatprep.subr.bf16.mxu0 %v1017_v55 }
 0x215   : > { %v1154_v57 = vpop.permute.xlu0 %1153  ;;  %6456 = vmatpush3.bf16.msra.mxu0 %v1017_v55 }
 0x216   : > { %6469 = vmatprep.subr.bf16.mxu0 %v1156_v54 }
 0x217   : > { %v1233_v59 = vpop.permute.xlu1 %1232 }
 0x218   : > { %6458 = vmatmul.mubr.msk.bf16.vlgmr.msra.gmra.mxu0 %vm1022_vm3, %v7009_v56  ;;  %6477 = vmatprep.subr.bf16.mxu1 %v1233_v59 }
 0x219   : > { %v1308_v61 = vpop.permute.xlu0 %1307  ;;  %6470 = vmatpush3.bf16.msra.mxu0 %v1156_v54  ;;  %6478 = vmatpush3.bf16.msra.mxu1 %v1233_v59  ;;  %v7035_v54 = vld [vmem:[%s8877_s14 + $0x48] sm:$0xff]   ;;  %v7037_v59 = vld [vmem:[%s8877_s14 + $0x50] ss:$0 sps:$4 sm:$0xff]  }
 0x21a   : > { %6471 = vmatprep.subr.bf16.mxu0 %v1154_v57  ;;  %6473 = vmatprep.mubr.msk.bf16.mxu0 %vm1022_vm3, %v7010_v58  ;;  %v7036_v58 = vld [vmem:[%s8877_s14 + $0x44] ss:$0 sps:$4 sm:$0xff]  }
 0x21b   : > { %v1231_v62 = vpop.permute.xlu1 %1230 }
 0x21c   : > { %6479 = vmatprep.subr.bf16.mxu1 %v1231_v62 }
 0x21d   : > { %v1306_v3 = vpop.permute.xlu0 %1305  ;;  %6472 = vmatpush3.bf16.msra.mxu0 %v1154_v57  ;;  %6480 = vmatpush3.bf16.msra.mxu1 %v1231_v62 }
 0x21e   : > { %6485 = vmatprep.subr.bf16.mxu0 %v1308_v61 }
 0x21f   : > { %v1383_v7 = vpop.permute.xlu1 %1382 }
 0x220   : > { %6474 = vmatmul.mubr.msk.bf16.vlgmr.msra.gmra.mxu0 %vm1022_vm3, %v7012_v63  ;;  %6482 = vmatmul.mubr.msk.bf16.vlgmr.msra.gmra.mxu1 %vm1022_vm3, %v7013_v2  ;;  %v7039_v63 = vld [vmem:[%s8877_s14 + $0x60] sm:$0xff]  }
 0x221   : > { %6493 = vmatprep.subr.bf16.mxu1 %v1383_v7  ;;  %v1458_v10 = vpop.permute.xlu0 %1457  ;;  %6486 = vmatpush3.bf16.msra.mxu0 %v1308_v61  ;;  %v7038_v61 = vld [vmem:[%s8877_s14 + $0x54] sm:$0xff]  }
 0x222   : > { %6494 = vmatpush3.bf16.msra.mxu1 %v1383_v7  ;;  %6487 = vmatprep.subr.bf16.mxu0 %v1306_v3 }
 0x223   : > { %v1381_v11 = vpop.permute.xlu1 %1380  ;;  %6489 = vmatprep.mubr.msk.bf16.mxu0 %vm1022_vm3, %v7014_v8  ;;  %6497 = vmatprep.mubr.msk.bf16.mxu1 %vm1022_vm3, %v7015_v9  ;;  %v7040_v8 = vld [vmem:[%s8877_s14 + $0x5c] ss:$0 sps:$4 sm:$0xff]   ;;  %v7041_v9 = vld [vmem:[%s8877_s14 + $0x68] ss:$0 sps:$4 sm:$0xff]  }
 0x224   : > { %6495 = vmatprep.subr.bf16.mxu1 %v1381_v11 }
 0x225   : > { %v1456_v13 = vpop.permute.xlu0 %1455  ;;  %6488 = vmatpush3.bf16.msra.mxu0 %v1306_v3 }
 0x226   : > { %6496 = vmatpush3.bf16.msra.mxu1 %v1381_v11  ;;  %6501 = vmatprep.subr.bf16.mxu0 %v1458_v10 }
 0x227   : > { %v1533_v15 = vpop.permute.xlu1 %1532 }
 0x228   : > { %6490 = vmatmul.mubr.msk.bf16.vlgmr.msra.gmra.mxu0 %vm1022_vm3, %v7016_v12  ;;  %6509 = vmatprep.subr.bf16.mxu1 %v1533_v15 }
 0x229   : > { %6498 = vmatmul.mubr.msk.bf16.vlgmr.msra.gmra.mxu1 %vm1022_vm3, %v7017_v14  ;;  %v1608_v18 = vpop.permute.xlu0 %1607  ;;  %6502 = vmatpush3.bf16.msra.mxu0 %v1458_v10 }
 0x22a   : > { %6510 = vmatpush3.bf16.msra.mxu1 %v1533_v15  ;;  %6503 = vmatprep.subr.bf16.mxu0 %v1456_v13 }
 0x22b   : > { %v1531_v19 = vpop.permute.xlu1 %1530  ;;  %6505 = vmatprep.mubr.msk.bf16.mxu0 %vm1022_vm3, %v7018_v16  ;;  %6513 = vmatprep.mubr.msk.bf16.mxu1 %vm1022_vm3, %v7019_v17 }
 0x22c   : > { %6511 = vmatprep.subr.bf16.mxu1 %v1531_v19 }
 0x22d   : > { %v1606_v21 = vpop.permute.xlu0 %1605  ;;  %6504 = vmatpush3.bf16.msra.mxu0 %v1456_v13 }
 0x22e   : > { %6512 = vmatpush3.bf16.msra.mxu1 %v1531_v19  ;;  %6517 = vmatprep.subr.bf16.mxu0 %v1608_v18 }
 0x22f   : > { %v1741_v23 = vpop.permute.xlu1 %1740 }
 0x230   : > { %6506 = vmatmul.mubr.msk.bf16.vlgmr.msra.gmra.mxu0 %vm1022_vm3, %v7020_v20  ;;  %6723 = vmatprep.subr.msk.bf16.mxu1 %vm1750_vm10, %v1741_v23  ;;  %v1752_v26 = vsel %vm1750_vm10, %v1741_v23, 0 }
 0x231   : > { %6514 = vmatmul.mubr.msk.bf16.vlgmr.msra.gmra.mxu1 %vm1022_vm3, %v7021_v22  ;;  %v1884_v27 = vpop.permute.xlu0 %1883  ;;  %6518 = vmatpush3.bf16.msra.mxu0 %v1608_v18 }
 0x232   : > { %6526 = vmatpush3.bf16.msra.mxu1 %v1752_v26  ;;  %6519 = vmatprep.subr.bf16.mxu0 %v1606_v21  ;;  %v1893_v37 = vsel %vm1750_vm10, %v1884_v27, 0 }
 0x233   : > { %v1739_v28 = vpop.permute.xlu1 %1738  ;;  %6521 = vmatprep.mubr.msk.bf16.mxu0 %vm1022_vm3, %v7022_v24  ;;  %6529 = vmatprep.mubr.msk.bf16.mxu1 %vm1743_vm11, %v7023_v25 }
 0x234   : > { %6527 = vmatprep.subr.bf16.mxu1 %v1739_v28 }
 0x235   : > { %v1963_v30 = vpop.permute.xlu0 %1962  ;;  %6520 = vmatpush3.bf16.msra.mxu0 %v1606_v21 }
 0x236   : > { %6528 = vmatpush3.bf16.msra.mxu1 %v1739_v28  ;;  %6724 = vmatprep.subr.msk.bf16.mxu0 %vm1750_vm10, %v7700_v44  ;;  %v1972_v44 = vsel %vm1750_vm10, %v1963_v30, 0 }
 0x237   : > { %6725 = vmatprep.subr.msk.bf16.mxu1 %vm1750_vm10, %v1884_v27  ;;  %v1882_v32 = vpop.permute.xlu1 %1881 }
 0x238   : > { %6522 = vmatmul.mubr.msk.bf16.vlgmr.msra.gmra.mxu0 %vm1022_vm3, %v7024_v29  ;;  %vm2646_vm3 = vcmask 400384  }
 0x239   : > { %6530 = vmatmul.mubr.msk.bf16.vlgmr.msra.gmra.mxu1 %vm1743_vm11, %v7025_v31  ;;  %v1961_v36 = vpop.permute.xlu0 %1960  ;;  %6534 = vmatpush3.bf16.msra.mxu0 %v1817_v34 }
 0x23a   : > { %6542 = vmatpush3.bf16.msra.mxu1 %v1893_v37  ;;  %6535 = vmatprep.subr.bf16.mxu0 %v7707_v46 }
 0x23b   : > { %6543 = vmatprep.subr.bf16.mxu1 %v1882_v32  ;;  %v2040_v38 = vpop.permute.xlu1 %2039  ;;  %6537 = vmatprep.mubr.msk.bf16.mxu0 %vm1743_vm11, %v7026_v33 }
 0x23c   : > { %6545 = vmatprep.mubr.msk.bf16.mxu1 %vm1743_vm11, %v7027_v35 }
 0x23d   : > { %6536 = vmatpush3.bf16.msra.mxu0 %v7707_v46  ;;  %v2117_v41 = vpop.permute.xlu0 %2116  ;;  %v2049_v46 = vsel %vm1750_vm10, %v2040_v38, 0 }
 0x23e   : > { %6544 = vmatpush3.bf16.msra.mxu1 %v1882_v32  ;;  %6726 = vmatprep.subr.msk.bf16.mxu0 %vm1750_vm10, %v1963_v30  ;;  %v2126_v53 = vsel %vm1750_vm10, %v2117_v41, 0 }
 0x23f   : > { %6727 = vmatprep.subr.msk.bf16.mxu1 %vm1750_vm10, %v2040_v38  ;;  %v2038_v42 = vpop.permute.xlu1 %2037 }
 0x240   : > { %6538 = vmatmul.mubr.msk.bf16.vlgmr.msra.gmra.mxu0 %vm1743_vm11, %v7028_v39 }
 0x241   : > { %6546 = vmatmul.mubr.msk.bf16.vlgmr.msra.gmra.mxu1 %vm1743_vm11, %v7029_v40  ;;  %6550 = vmatpush3.bf16.msra.mxu0 %v1972_v44  ;;  %v2115_v49 = vpop.permute.xlu0 %2114 }
 0x242   : > { %6558 = vmatpush3.bf16.msra.mxu1 %v2049_v46  ;;  %6551 = vmatprep.subr.bf16.mxu0 %v1961_v36 }
 0x243   : > { %6559 = vmatprep.subr.bf16.mxu1 %v2038_v42  ;;  %v2194_v47 = vpop.permute.xlu1 %2193  ;;  %6553 = vmatprep.mubr.msk.bf16.mxu0 %vm1743_vm11, %v7030_v43 }
 0x244   : > { %6561 = vmatprep.mubr.msk.bf16.mxu1 %vm1743_vm11, %v7031_v45  ;;  %v2203_v55 = vsel %vm1750_vm10, %v2194_v47, 0 }
 0x245   : > { %6552 = vmatpush3.bf16.msra.mxu0 %v1961_v36  ;;  %v2271_v56 = vpop.permute.xlu0 %2270 }
 0x246   : > { %6560 = vmatpush3.bf16.msra.mxu1 %v2038_v42  ;;  %6728 = vmatprep.subr.msk.bf16.mxu0 %vm1750_vm10, %v2117_v41  ;;  %v2280_v62 = vsel %vm1750_vm10, %v2271_v56, 0 }
 0x247   : > { %6729 = vmatprep.subr.msk.bf16.mxu1 %vm1750_vm10, %v2194_v47  ;;  %v2192_v51 = vpop.permute.xlu1 %2191 }
 0x248   : > { %6554 = vmatmul.mubr.msk.bf16.vlgmr.msra.gmra.mxu0 %vm1743_vm11, %v7032_v48 }
 0x249   : > { %6562 = vmatmul.mubr.msk.bf16.vlgmr.msra.gmra.mxu1 %vm1743_vm11, %v7033_v50  ;;  %6566 = vmatpush3.bf16.msra.mxu0 %v2126_v53  ;;  %v2269_v2 = vpop.permute.xlu0 %2268 }
 0x24a   : > { %6574 = vmatpush3.bf16.msra.mxu1 %v2203_v55  ;;  %6567 = vmatprep.subr.bf16.mxu0 %v2115_v49 }
 0x24b   : > { %6575 = vmatprep.subr.bf16.mxu1 %v2192_v51  ;;  %6569 = vmatprep.mubr.msk.bf16.mxu0 %vm1743_vm11, %v7034_v52  ;;  %v2348_v57 = vpop.permute.xlu1 %2347 }
 0x24c   : > { %6577 = vmatprep.mubr.msk.bf16.mxu1 %vm1743_vm11, %v7035_v54  ;;  %v2357_v3 = vsel %vm1750_vm10, %v2348_v57, 0 }
 0x24d   : > { %6568 = vmatpush3.bf16.msra.mxu0 %v2115_v49 }
 0x24e   : > { %6576 = vmatpush3.bf16.msra.mxu1 %v2192_v51  ;;  %6730 = vmatprep.subr.msk.bf16.mxu0 %vm1750_vm10, %v2271_v56 }
 0x24f   : > { %6731 = vmatprep.subr.msk.bf16.mxu1 %vm1750_vm10, %v2348_v57  ;;  %v2346_v7 = vpop.permute.xlu1 %2345 }
 0x250   : > { %6570 = vmatmul.mubr.msk.bf16.vlgmr.msra.gmra.mxu0 %vm1743_vm11, %v7036_v58 }
 0x251   : > { %6578 = vmatmul.mubr.msk.bf16.vlgmr.msra.gmra.mxu1 %vm1743_vm11, %v7037_v59  ;;  %6582 = vmatpush3.bf16.msra.mxu0 %v2280_v62 }
 0x252   : > { %6590 = vmatpush3.bf16.msra.mxu1 %v2357_v3  ;;  %6583 = vmatprep.subr.bf16.mxu0 %v2269_v2 }
 0x253   : > { %6591 = vmatprep.subr.bf16.mxu1 %v2346_v7  ;;  %6585 = vmatprep.mubr.msk.bf16.mxu0 %vm1743_vm11, %v7038_v61 }
 0x254   : > { %6593 = vmatprep.mubr.msk.bf16.mxu1 %vm1743_vm11, %v7039_v63 }
 0x255   : > { %6584 = vmatpush3.bf16.msra.mxu0 %v2269_v2 }
 0x256   : > { %6592 = vmatpush3.bf16.msra.mxu1 %v2346_v7  ;;  %6597 = vmatprep.subr.bf16.mxu0 %v7233_v6 }
 0x257   : > { %6605 = vmatprep.subr.bf16.mxu1 %v7233_v6 }
 0x258   : > { %6586 = vmatmul.mubr.msk.bf16.vlgmr.msra.gmra.mxu0 %vm1743_vm11, %v7040_v8 }
 0x259   : > { %6594 = vmatmul.mubr.msk.bf16.vlgmr.msra.gmra.mxu1 %vm1743_vm11, %v7041_v9  ;;  %6601 = vmatprep.mubr.msk.bf16.mxu0 %vm7260_vm6, %v7233_v6 }
 0x25a   : > { %6609 = vmatprep.mubr.msk.bf16.mxu1 %vm7260_vm6, %v7233_v6 }
 0x267   : > { %v6467_v10 = vpop.f32.mrf.mxu1 }
 0x269   : > { %v1125_v11 = vpop.f32.mrf.mxu1 }
 0x26b   : > { %v6468_v12 = vpop.f32.mrf.mxu1 }
 0x26d   : > { %v7894_v16 = vpop.f32.mrf.mxu1 }
 0x2d8   : > { %v6459_v13 = vpop.f32.mrf.mxu0 }
 0x2d9   : > { %v1134_v58 = vadd.f32 %v6467_v10, %v6459_v13 }
 0x2da   : > { %v1063_v14 = vpop.f32.mrf.mxu0 }
 0x2db   : > { %v1126_v20 = vadd.f32 %v1125_v11, %v1063_v14 }
 0x2dc   : > { %v6460_v15 = vpop.f32.mrf.mxu0 }
 0x2de   : > { %v7896_v17 = vpop.f32.mrf.mxu0 }
 0x2e0   : > { %v6475_v18 = vpop.f32.mrf.mxu0  ;;  %v6483_v19 = vpop.f32.mrf.mxu1 }
 0x2e1   : > { %v1215_v62 = vadd.f32 %v6475_v18, %v1134_v58 }
 0x2e2   : > { %v1199_v21 = vpop.f32.mrf.mxu0  ;;  %v1276_v22 = vpop.f32.mrf.mxu1 }
 0x2e3   : > { %v1213_v23 = vadd.f32 %v1199_v21, %v1126_v20  ;;  %v1292_v9 = vadd.f32 %v6483_v19, %v1215_v62 }
 0x2e4   : > { %v6476_v24 = vpop.f32.mrf.mxu0  ;;  %v6484_v25 = vpop.f32.mrf.mxu1 }
 0x2e5   : > { %v1290_v26 = vadd.f32 %v1276_v22, %v1213_v23 }
 0x2e6   : > { %v7898_v27 = vpop.f32.mrf.mxu0  ;;  %v7900_v28 = vpop.f32.mrf.mxu1 }
 0x2e8   : > { %v6491_v29 = vpop.f32.mrf.mxu0 }
 0x2e9   : > { %v6499_v30 = vpop.f32.mrf.mxu1  ;;  %v1367_v14 = vadd.f32 %v6491_v29, %v1292_v9 }
 0x2ea   : > { %v1351_v31 = vpop.f32.mrf.mxu0 }
 0x2eb   : > { %v1365_v32 = vadd.f32 %v1351_v31, %v1290_v26  ;;  %v1426_v33 = vpop.f32.mrf.mxu1  ;;  %v1442_v25 = vadd.f32 %v6499_v30, %v1367_v14 }
 0x2ec   : > { %v6492_v34 = vpop.f32.mrf.mxu0 }
 0x2ed   : > { %v7902_v35 = vadd.f32 %v1426_v33, %v1365_v32  ;;  %v6500_v36 = vpop.f32.mrf.mxu1 }
 0x2ee   : > { %v7904_v37 = vpop.f32.mrf.mxu0 }
 0x2ef   : > { %v7906_v38 = vpop.f32.mrf.mxu1 }
 0x2f0   : > { %v6507_v39 = vpop.f32.mrf.mxu0 }
 0x2f1   : > { %v6515_v40 = vpop.f32.mrf.mxu1  ;;  %v1517_v26 = vadd.f32 %v6507_v39, %v1442_v25  ;;  %v1129_v39 = vadd.f32 %v7894_v16, %v7896_v17 }
 0x2f2   : > { %v7908_v41 = vpop.f32.mrf.mxu0 }
 0x2f3   : > { %v7910_v42 = vpop.f32.mrf.mxu1  ;;  %v1592_v19 = vadd.f32 %v6515_v40, %v1517_v26  ;;  %v1214_v40 = vadd.f32 %v7898_v27, %v1129_v39 }
 0x2f4   : > { %v6508_v43 = vpop.f32.mrf.mxu0 }
 0x2f5   : > { %v6516_v44 = vpop.f32.mrf.mxu1 }
 0x2f6   : > { %v7912_v45 = vpop.f32.mrf.mxu0 }
 0x2f7   : > { %v7914_v46 = vpop.f32.mrf.mxu1 }
 0x2f8   : > { %v6523_v47 = vpop.f32.mrf.mxu0 }
 0x2f9   : > { %v6531_v48 = vpop.f32.mrf.mxu1 }
 0x2fa   : > { %v7916_v49 = vpop.f32.mrf.mxu0 }
 0x2fb   : > { %v1788_v50 = vpop.f32.mrf.mxu1 }
 0x2fc   : > { %v6524_v51 = vpop.f32.mrf.mxu0 }
 0x2fd   : > { %v6532_v52 = vpop.f32.mrf.mxu1 }
 0x2fe   : > { %v7918_v53 = vpop.f32.mrf.mxu0 }
 0x2ff   : > { %v1791_v54 = vpop.f32.mrf.mxu1 }
 0x300   : > { %v6539_v55 = vpop.f32.mrf.mxu0 }
 0x301   : > { %v6547_v56 = vpop.f32.mrf.mxu1  ;;  %v1862_v3 = vadd.f32 %v6539_v55, %v6531_v48  ;;  %v1667_v48 = vadd.f32 %v6523_v47, %v1592_v19  ;;  %v1684_v55 = vpop.permute.xlu0 %1683 }
 0x302   : > { %v1853_v57 = vpop.f32.mrf.mxu0 }
 0x303   : > { %v1929_v59 = vpop.f32.mrf.mxu1  ;;  %v1945_v15 = vadd.f32 %v6547_v56, %v1862_v3  ;;  %v1854_v56 = vadd.f32 %v1853_v57, %v1788_v50  ;;  %v1688_v3 = vadd.f32 %v1684_v55, %v1667_v48 }
 0x304   : > { %v6540_v61 = vpop.f32.mrf.mxu0 }
 0x305   : > { %v6548_v63 = vpop.f32.mrf.mxu1  ;;  %v1691_v57 = vmax.f32 %v1688_v3, 0.0  ;;  %v7249_v3 = vmov 9  }
 0x306   : > { %v1856_v2 = vpop.f32.mrf.mxu0 }
 0x307   : > { %v1932_v7 = vpop.f32.mrf.mxu1  ;;  %v1857_v44 = vadd.f32 %v1856_v2, %v1791_v54  ;;  %v2426_v54 = vpop.permute.xlu1 %2425  ;;  %v1943_v2 = vadd.f32 %v1929_v59, %v1854_v56 }
 0x308   : > { %v6555_v8 = vpop.f32.mrf.mxu0 }
 0x309   : > { %v6563_v11 = vpop.f32.mrf.mxu1  ;;  %v2024_v22 = vadd.f32 %v6555_v8, %v1945_v15  ;;  %v1944_v62 = vadd.f32 %v1932_v7, %v1857_v44 }
 0x30a   : > { %v2008_v12 = vpop.f32.mrf.mxu0 }
 0x30b   : > { %v2085_v20 = vpop.f32.mrf.mxu1  ;;  %v2101_v18 = vadd.f32 %v6563_v11, %v2024_v22  ;;  %v2022_v50 = vadd.f32 %v2008_v12, %v1943_v2  ;;  %v1291_v22 = vadd.f32 %v7900_v28, %v1214_v40  ;;  %v7252_v40 = vmov 12  }
 0x30c   : > { %v6556_v21 = vpop.f32.mrf.mxu0 }
 0x30d   : > { %v6564_v23 = vpop.f32.mrf.mxu1  ;;  %v1366_v17 = vadd.f32 %v7904_v37, %v1291_v22  ;;  %v2099_v7 = vadd.f32 %v2085_v20, %v2022_v50  ;;  %v1515_v37 = vadd.f32 %v7908_v41, %v7902_v35 }
 0x30e   : > { %v2011_v24 = vpop.f32.mrf.mxu0 }
 0x30f   : > { %v2088_v10 = vpop.f32.mrf.mxu1  ;;  %v2023_v47 = vadd.f32 %v2011_v24, %v1944_v62  ;;  %v1441_v59 = vadd.f32 %v7906_v38, %v1366_v17 }
 0x310   : > { %v6571_v13 = vpop.f32.mrf.mxu0 }
 0x311   : > { %v6579_v31 = vpop.f32.mrf.mxu1  ;;  %v2178_v33 = vadd.f32 %v6571_v13, %v2101_v18  ;;  %v2100_v23 = vadd.f32 %v2088_v10, %v2023_v47  ;;  %v1516_v24 = vadd.f32 %v7912_v45, %v1441_v59  ;;  %v7242_v18 = vmov 4  }
 0x312   : > { %v2162_v32 = vpop.f32.mrf.mxu0 }
 0x313   : > { %v2239_v34 = vpop.f32.mrf.mxu1  ;;  %v2255_v51 = vadd.f32 %v6579_v31, %v2178_v33  ;;  %v2176_v27 = vadd.f32 %v2162_v32, %v2099_v7  ;;  %v1679_v31 = vpop.permute.xlu0 %1678  ;;  %v1591_v32 = vadd.f32 %v7914_v46, %v1516_v24 }
 0x314   : > { %v6572_v36 = vpop.f32.mrf.mxu0  ;;  %v1674_v33 = vpop.permute.xlu1 %1673 }
 0x315   : > { %v6580_v43 = vpop.f32.mrf.mxu1  ;;  %v2253_v28 = vadd.f32 %v2239_v34, %v2176_v27  ;;  %v1590_v34 = vadd.f32 %v7910_v42, %v1515_v37  ;;  %v1666_v36 = vadd.f32 %v7918_v53, %v1591_v32  ;;  %v7244_v42 = vmov 13  }
 0x316   : > { %v2165_v29 = vpop.f32.mrf.mxu0  ;;  %v7243_v43 = vmov 7   ;;  %v7245_v53 = vmov 5  }
 0x317   : > { %v2242_v52 = vpop.f32.mrf.mxu1  ;;  %v2177_v25 = vadd.f32 %v2165_v29, %v2100_v23  ;;  %v2421_v35 = vpop.permute.xlu0 %2420  ;;  %v1665_v41 = vadd.f32 %v7916_v49, %v1590_v34  ;;  %v1687_v29 = vadd.f32 %v1679_v31, %v1666_v36 }
 0x318   : > { %v6587_v58 = vpop.f32.mrf.mxu0  ;;  %v2416_v44 = vpop.permute.xlu1 %2415 }
 0x319   : > { %v2332_v30 = vadd.f32 %v6587_v58, %v2255_v51  ;;  %v6595_v61 = vpop.f32.mrf.mxu1  ;;  %v2254_v12 = vadd.f32 %v2242_v52, %v2177_v25  ;;  %v1686_v51 = vadd.f32 %v1674_v33, %v1665_v41  ;;  %v1690_v55 = vmax.f32 %v1687_v29, 0.0 }
 0x31a   : > { %v2316_v63 = vpop.f32.mrf.mxu0 }
 0x31b   : > { %v2409_v8 = vadd.f32 %v6595_v61, %v2332_v30  ;;  %v2393_v9 = vpop.f32.mrf.mxu1  ;;  %v2330_v20 = vadd.f32 %v2316_v63, %v2253_v28  ;;  %v1689_v58 = vmax.f32 %v1686_v51, 0.0  ;;  %v7246_v30 = vmov 15  }
 0x31c   : > { %v6588_v11 = vpop.f32.mrf.mxu0  ;;  %v7247_v61 = vmov 6   ;;  %v7248_v63 = vmov 8  }
 0x31d   : > { %v2430_v14 = vadd.f32 %v2426_v54, %v2409_v8  ;;  %v6596_v15 = vpop.f32.mrf.mxu1  ;;  %v2407_v19 = vadd.f32 %v2393_v9, %v2330_v20  ;;  %v7250_v8 = vmov 10   ;;  %v7251_v9 = vmov 11  }
 0x31e   : > { %v2319_v26 = vpop.f32.mrf.mxu0  ;;  %v7253_v54 = vmov 14  }
 0x31f   : > { %v2433_v21 = vmax.f32 %v2430_v14, 0.0  ;;  %v2331_v10 = vadd.f32 %v2319_v26, %v2254_v12  ;;  %v2396_v38 = vpop.f32.mrf.mxu1  ;;  %v2428_v48 = vadd.f32 %v2416_v44, %v2407_v19 }
 0x321   : > { %v2436_v16 = vadd.f32 %v2433_v21, %v1691_v57  ;;  %v2408_v45 = vadd.f32 %v2396_v38, %v2331_v10  ;;  %v2431_v56 = vmax.f32 %v2428_v48, 0.0 }
 0x323   : > { %v7925_v13 = vpack.c.bf16 %v2436_v16, %v2436_v16  ;;  %v2429_v46 = vadd.f32 %v2421_v35, %v2408_v45  ;;  %v2434_v39 = vadd.f32 %v2431_v56, %v1689_v58 }
 0x325   : > { %2471 = vperm.xlu0 %6905, %v7925_v13   ;;  %2465 = vperm.xlu1 %6904, %v7925_v13   ;;  %v2432_v52 = vmax.f32 %v2429_v46, 0.0 }
 0x327   : > { %v2435_v49 = vadd.f32 %v2432_v52, %v1690_v55 }
 0x329   : > { %6908 = vset.pattern.permute.xlu0 %v7242_v18  ;;  %6906 = vset.pattern.permute.xlu1 %v7226_v4  ;;  %v2437_v62 = vpack.c.bf16 %v2435_v49, %v2434_v39 }
 0x32a   : > { %2497 = vperm.xlu0 %6908, %v7925_v13   ;;  %2477 = vperm.xlu1 %6906, %v7925_v13  }
 0x32e   : > { %6911 = vset.pattern.permute.xlu0 %v7243_v43  ;;  %6907 = vset.pattern.permute.xlu1 %v7227_v5 }
 0x32f   : > { %2515 = vperm.xlu0 %6911, %v7925_v13   ;;  %2483 = vperm.xlu1 %6907, %v7925_v13  }
 0x333   : > { %6917 = vset.pattern.permute.xlu0 %v7244_v42  ;;  %6909 = vset.pattern.permute.xlu1 %v7245_v53 }
 0x334   : > { %2563 = vperm.xlu0 %6917, %v7925_v13   ;;  %2503 = vperm.xlu1 %6909, %v7925_v13  }
 0x338   : > { %6919 = vset.pattern.permute.xlu0 %v7246_v30  ;;  %6910 = vset.pattern.permute.xlu1 %v7247_v61 }
 0x339   : > { %2575 = vperm.xlu0 %6919, %v7925_v13   ;;  %2509 = vperm.xlu1 %6910, %v7925_v13  }
 0x33d   : > { %6920 = vset.pattern.permute.xlu0 %v7225_v1  ;;  %6912 = vset.pattern.permute.xlu1 %v7248_v63 }
 0x33e   : > { %2527 = vperm.xlu1 %6912, %v7925_v13   ;;  %2461 = vperm.xlu0 %6920, %v2437_v62  }
 0x342   : > { %6913 = vset.pattern.permute.xlu1 %v7249_v3  ;;  %6922 = vset.pattern.permute.xlu0 %v7226_v4 }
 0x343   : > { %2533 = vperm.xlu1 %6913, %v7925_v13   ;;  %2474 = vperm.xlu0 %6922, %v2437_v62  }
 0x347   : > { %6914 = vset.pattern.permute.xlu1 %v7250_v8  ;;  %6925 = vset.pattern.permute.xlu0 %v7245_v53 }
 0x348   : > { %2539 = vperm.xlu1 %6914, %v7925_v13   ;;  %2500 = vperm.xlu0 %6925, %v2437_v62  }
 0x34c   : > { %6915 = vset.pattern.permute.xlu1 %v7251_v9  ;;  %6929 = vset.pattern.permute.xlu0 %v7249_v3 }
 0x34d   : > { %2545 = vperm.xlu1 %6915, %v7925_v13   ;;  %2530 = vperm.xlu0 %6929, %v2437_v62  }
 0x351   : > { %6916 = vset.pattern.permute.xlu1 %v7252_v40  ;;  %6932 = vset.pattern.permute.xlu0 %v7252_v40 }
 0x352   : > { %2557 = vperm.xlu1 %6916, %v7925_v13   ;;  %2554 = vperm.xlu0 %6932, %v2437_v62  }
 0x356   : > { %6918 = vset.pattern.permute.xlu1 %v7253_v54  ;;  %6935 = vset.pattern.permute.xlu0 %v7246_v30 }
 0x357   : > { %2569 = vperm.xlu1 %6918, %v7925_v13   ;;  %2572 = vperm.xlu0 %6935, %v2437_v62  }
 0x35b   : > { %6921 = vset.pattern.permute.xlu1 %v7224_v0  ;;  %6937 = vset.pattern.permute.xlu0 %v7225_v1 }
 0x35c   : > { %2468 = vperm.xlu1 %6921, %v2437_v62  }
 0x360   : > { %6923 = vset.pattern.permute.xlu1 %v7227_v5 }
 0x361   : > { %2480 = vperm.xlu1 %6923, %v2437_v62  }
 0x365   : > { %6924 = vset.pattern.permute.xlu1 %v7242_v18 }
 0x366   : > { %2494 = vperm.xlu1 %6924, %v2437_v62  }
 0x36a   : > { %6926 = vset.pattern.permute.xlu1 %v7247_v61 }
 0x36b   : > { %2506 = vperm.xlu1 %6926, %v2437_v62  }
 0x36f   : > { %6927 = vset.pattern.permute.xlu1 %v7243_v43 }
 0x370   : > { %2512 = vperm.xlu1 %6927, %v2437_v62  }
 0x374   : > { %6928 = vset.pattern.permute.xlu1 %v7248_v63 }
 0x375   : > { %2524 = vperm.xlu1 %6928, %v2437_v62  }
 0x379   : > { %6930 = vset.pattern.permute.xlu1 %v7250_v8 }
 0x37a   : > { %2536 = vperm.xlu1 %6930, %v2437_v62  }
 0x37e   : > { %6931 = vset.pattern.permute.xlu1 %v7251_v9 }
 0x37f   : > { %2542 = vperm.xlu1 %6931, %v2437_v62  }
 0x383   : > { %6933 = vset.pattern.permute.xlu1 %v7244_v42 }
 0x384   : > { %2560 = vperm.xlu1 %6933, %v2437_v62  }
 0x388   : > { %6934 = vset.pattern.permute.xlu1 %v7253_v54 }
 0x389   : > { %2566 = vperm.xlu1 %6934, %v2437_v62  }
 0x38d   : > { %6936 = vset.pattern.permute.xlu1 %v7225_v1 }
 0x3a0   : > { %v2466_v2 = vpop.permute.xlu1 %2465  ;;  %v2472_v11 = vpop.permute.xlu0 %2471 }
 0x3a1   : > { %v2486_v14 = vsel %vm825_vm0, %v2466_v2, %v2472_v11 }
 0x3a5   : > { %v2478_v47 = vpop.permute.xlu1 %2477  ;;  %v2498_v21 = vpop.permute.xlu0 %2497 }
 0x3a6   : > { %v2489_v15 = vsel %vm8904_vm12, %v2486_v14, %v2478_v47 }
 0x3aa   : > { %v2484_v50 = vpop.permute.xlu1 %2483  ;;  %v2516_v17 = vpop.permute.xlu0 %2515 }
 0x3ab   : > { %v2492_v57 = vsel %vm8903_vm13, %v2489_v15, %v2484_v50 }
 0x3ac   : > { %2587 = vrot.lane.b32.xlu1 %v2492_v57, %s7230_s25 }
 0x3af   : > { %v2504_v22 = vpop.permute.xlu1 %2503  ;;  %v2564_v28 = vpop.permute.xlu0 %2563 }
 0x3b0   : > { %2591 = vrot.lane.b32.xlu1 %v2492_v57, %s7232_s27  ;;  %v2518_v23 = vsel %vm825_vm0, %v2498_v21, %v2504_v22 }
 0x3b4   : > { %v2510_v16 = vpop.permute.xlu1 %2509  ;;  %v2576_v20 = vpop.permute.xlu0 %2575 }
 0x3b5   : > { %v2520_v7 = vsel %vm8904_vm12, %v2518_v23, %v2510_v16  ;;  %v7042_v16 = vld [vmem:[%s7579_s19] sm:$0xff]   ;;  %s8961_s19 = sld [smem:[#allocation25_spill]] }
 0x3b6   : > { %v2522_v25 = vsel %vm8903_vm13, %v2520_v7, %v2516_v17 }
 0x3b7   : > { %2601 = vrot.lane.b32.xlu1 %v2522_v25, %s7254_s6  ;;  %2597 = vrot.lane.b32.xlu0 %v2522_v25, %s7255_s5 }
 0x3b9   : > { %v2528_v13 = vpop.permute.xlu1 %2527  ;;  %v2462_v33 = vpop.permute.xlu0 %2461 }
 0x3be   : > { %v2534_v27 = vpop.permute.xlu1 %2533  ;;  %v2475_v19 = vpop.permute.xlu0 %2474 }
 0x3bf   : > { %v2548_v59 = vsel %vm825_vm0, %v2528_v13, %v2534_v27  ;;  %v2443_v27 = vand.u32 7, %v7632_v60 }
 0x3c1   : > { %vm2451_vm1 = vcmp.ne.s32.totalorder %v2443_v27, 0  ;;  %vm2455_vm5 = vcmp.ne.s32.totalorder %v2443_v27, 1 }
 0x3c3   : > { %v2540_v26 = vpop.permute.xlu1 %2539  ;;  %v2501_v48 = vpop.permute.xlu0 %2500 }
 0x3c4   : > { %v2550_v12 = vsel %vm8904_vm12, %v2548_v59, %v2540_v26 }
 0x3c8   : > { %v2546_v24 = vpop.permute.xlu1 %2545  ;;  %v2531_v39 = vpop.permute.xlu0 %2530 }
 0x3c9   : > { %v2552_v10 = vsel %vm8903_vm13, %v2550_v12, %v2546_v24 }
 0x3ca   : > { %2607 = vrot.lane.b32.xlu0 %v2552_v10, %s7256_s4 }
 0x3cd   : > { %v2558_v37 = vpop.permute.xlu1 %2557  ;;  %v2555_v14 = vpop.permute.xlu0 %2554 }
 0x3ce   : > { %2611 = vrot.lane.b32.xlu0 %v2552_v10, %s7257_s18  ;;  %v2578_v31 = vsel %vm825_vm0, %v2558_v37, %v2564_v28 }
 0x3d2   : > { %v2570_v38 = vpop.permute.xlu1 %2569  ;;  %v2573_v21 = vpop.permute.xlu0 %2572 }
 0x3d3   : > { %v2580_v32 = vsel %vm8904_vm12, %v2578_v31, %v2570_v38 }
 0x3d4   : > { %v2582_v45 = vsel %vm8903_vm13, %v2580_v32, %v2576_v20  ;;  %v6195_v20 = vsel %vm2451_vm1, 1.0, %v7233_v6  ;;  %v6196_v32 = vsel %vm2455_vm5, 1.0, %v7233_v6  ;;  %vm3881_vm1 = vcmask 97280  }
 0x3d5   : > { %2617 = vrot.lane.b32.xlu0 %v2582_v45, %s7258_s17 }
 0x3d7   : > { %v2469_v34 = vpop.permute.xlu1 %2468 }
 0x3d8   : > { %v2485_v36 = vsel %vm825_vm0, %v2462_v33, %v2469_v34  ;;  %v2454_v34 = vpack.c.bf16 %v6195_v20, %v6195_v20 }
 0x3d9   : > { %2621 = vrot.lane.b32.xlu0 %v2582_v45, %s7259_s29  ;;  %v2488_v35 = vsel %vm8904_vm12, %v2485_v36, %v2475_v19 }
 0x3dc   : > { %v2481_v41 = vpop.permute.xlu1 %2480 }
 0x3dd   : > { %v2491_v46 = vsel %vm8903_vm13, %v2488_v35, %v2481_v41  ;;  %v2458_v35 = vpack.c.bf16 %v6196_v32, %v6196_v32  ;;  %v7044_v32 = vld [vmem:[%s8871_s8 + $0x8] sm:$0xff]  }
 0x3de   : > { %2585 = vrot.lane.b32.xlu1 %v2491_v46, %s7230_s25 }
 0x3e1   : > { %v2495_v44 = vpop.permute.xlu1 %2494 }
 0x3e2   : > { %2589 = vrot.lane.b32.xlu1 %v2491_v46, %s7232_s27  ;;  %v2517_v51 = vsel %vm825_vm0, %v2495_v44, %v2501_v48 }
 0x3e6   : > { %v2507_v29 = vpop.permute.xlu1 %2506 }
 0x3e7   : > { %v2519_v52 = vsel %vm8904_vm12, %v2517_v51, %v2507_v29 }
 0x3eb   : > { %v2513_v55 = vpop.permute.xlu1 %2512 }
 0x3ec   : > { %v2521_v56 = vsel %vm8903_vm13, %v2519_v52, %v2513_v55 }
 0x3ed   : > { %2595 = vrot.lane.b32.xlu1 %v2521_v56, %s7255_s5  ;;  %s7263_s5 = smov 110  }
 0x3f0   : > { %v2525_v58 = vpop.permute.xlu1 %2524 }
 0x3f1   : > { %2599 = vrot.lane.b32.xlu1 %v2521_v56, %s7254_s6  ;;  %v2547_v62 = vsel %vm825_vm0, %v2525_v58, %v2531_v39 }
 0x3f5   : > { %v2537_v49 = vpop.permute.xlu1 %2536 }
 0x3f6   : > { %v2549_v2 = vsel %vm8904_vm12, %v2547_v62, %v2537_v49 }
 0x3fa   : > { %v2543_v47 = vpop.permute.xlu1 %2542 }
 0x3fb   : > { %v2551_v11 = vsel %vm8903_vm13, %v2549_v2, %v2543_v47 }
 0x3fc   : > { %2609 = vrot.lane.b32.xlu1 %v2551_v11, %s7257_s18  ;;  %2605 = vrot.lane.b32.xlu0 %v2551_v11, %s7256_s4  ;;  %s7312_s4 = smov 113  }
 0x3ff   : > { %v2561_v15 = vpop.permute.xlu1 %2560 }
 0x400   : > { %v2577_v50 = vsel %vm825_vm0, %v2555_v14, %v2561_v15 }
 0x404   : > { %v2567_v57 = vpop.permute.xlu1 %2566 }
 0x405   : > { %v2579_v22 = vsel %vm8904_vm12, %v2577_v50, %v2567_v57  ;;  %vm2664_vm12 = vcmask 728064  }
 0x406   : > { %v2581_v23 = vsel %vm8903_vm13, %v2579_v22, %v2573_v21  ;;  %vm2661_vm13 = vcmask 596992  }
 0x407   : > { %2619 = vrot.lane.b32.xlu1 %v2581_v23, %s7259_s29  ;;  %2615 = vrot.lane.b32.xlu0 %v2581_v23, %s7258_s17  ;;  %s7313_s17 = smov 1  }
 0x40b   : > { %3250 = vrot.lane.b32.xlu0 %v7042_v16, %s7230_s25 }
 0x41e   : > { %v2588_v7 = vpop.permute.xlu1 %2587 }
 0x41f   : > { %v2626_v26 = vsel %vm972_vm4, 0, %v2588_v7 }
 0x422   : > { %v2592_v13 = vpop.permute.xlu1 %2591 }
 0x423   : > { %v2630_v12 = vsel %vm982_vm7, %v2626_v26, %v2592_v13  ;;  %v7043_v13 = vld [vmem:[%s8871_s8] sm:$0xff]  }
 0x429   : > { %v2598_v17 = vpop.permute.xlu0 %2597  ;;  %v2602_v28 = vpop.permute.xlu1 %2601 }
 0x42a   : > { %v2635_v24 = vsel %vm2631_vm14, %v2630_v12, %v2598_v17  ;;  %v3227_v12 = vld [vmem:[%s8872_s9] sm:$0xff] }
 0x42b   : > { %v2640_v37 = vsel %vm2636_vm15, %v2635_v24, %v2602_v28  ;;  %v3228_v24 = vld [vmem:[%s8872_s9 + $0x8] sm:$0xff]  ;;  %v3768_v28 = vld [vmem:[%s8874_s11] sm:$0xff] }
 0x43c   : > { %v2608_v25 = vpop.permute.xlu0 %2607 }
 0x43d   : > { %v2645_v31 = vsel %vm2641_vm2, %v2640_v37, %v2608_v25 }
 0x440   : > { %v2612_v59 = vpop.permute.xlu0 %2611 }
 0x441   : > { %v2650_v38 = vsel %vm2646_vm3, %v2645_v31, %v2612_v59 }
 0x447   : > { %v2618_v10 = vpop.permute.xlu0 %2617 }
 0x448   : > { %v2655_v45 = vsel %vm2651_vm8, %v2650_v38, %v2618_v10  ;;  %v3769_v10 = vld [vmem:[%s8874_s11 + $0x8] sm:$0xff] }
 0x44b   : > { %v2622_v33 = vpop.permute.xlu0 %2621 }
 0x44c   : > { %v2660_v36 = vsel %vm2656_vm9, %v2655_v45, %v2622_v33 }
 0x44d   : > { %v2663_v19 = vsel %vm2661_vm13, %v2660_v36, 0 }
 0x44e   : > { %v2667_v41 = vsel %vm2664_vm12, %v2663_v19, 0 }
 0x44f   : > { %2687 = vrot.lane.b32.xlu1 %v2667_v41, %s7234_s1  ;;  %v2670_v46 = vmul.bf16 %v2667_v41, %v2454_v34  ;;  %v2672_v29 = vmul.bf16 %v2667_v41, %v2458_v35 }
 0x450   : > { %v2586_v48 = vpop.permute.xlu1 %2585 }
 0x451   : > { %v2746_v44 = vsel %vm1750_vm10, %v2670_v46, 0  ;;  %v2624_v56 = vsel %vm972_vm4, 0, %v2586_v48 }
 0x452   : > { %6606 = vmatpush3.bf16.msra.mxu1 %v2746_v44 }
 0x453   : > { %2801 = vrot.lane.b32.xlu1 %v2672_v29, %s8905_s23  ;;  %6607 = vmatprep.subr.bf16.mxu1 %v7233_v6 }
 0x454   : > { %v2590_v51 = vpop.permute.xlu1 %2589 }
 0x455   : > { %v2628_v58 = vsel %vm982_vm7, %v2624_v56, %v2590_v51  ;;  %v7047_v56 = vld [vmem:[%s8871_s8 + $0x20] sm:$0xff]  }
 0x45f   : > { %v2596_v52 = vpop.permute.xlu1 %2595 }
 0x460   : > { %v2633_v39 = vsel %vm2631_vm14, %v2628_v58, %v2596_v52  ;;  %v7048_v58 = vld [vmem:[%s8871_s8 + $0x28] sm:$0xff]   ;;  %vm8943_vm14 = vcmask 48128  }
 0x463   : > { %v2600_v55 = vpop.permute.xlu1 %2599 }
 0x464   : > { %v2638_v62 = vsel %vm2636_vm15, %v2633_v39, %v2600_v55 }
 0x46e   : > { %v2606_v49 = vpop.permute.xlu0 %2605  ;;  %v2610_v2 = vpop.permute.xlu1 %2609 }
 0x46f   : > { %v2643_v47 = vsel %vm2641_vm2, %v2638_v62, %v2606_v49  ;;  %vm3883_vm2 = vcmask 113664  }
 0x470   : > { %v2648_v11 = vsel %vm2646_vm3, %v2643_v47, %v2610_v2 }
 0x479   : > { %v2616_v14 = vpop.permute.xlu0 %2615  ;;  %v2620_v15 = vpop.permute.xlu1 %2619 }
 0x47a   : > { %v2653_v50 = vsel %vm2651_vm8, %v2648_v11, %v2616_v14  ;;  %v7049_v14 = vld [vmem:[%s8871_s8 + $0x30] sm:$0xff]  }
 0x47b   : > { %v2658_v57 = vsel %vm2656_vm9, %v2653_v50, %v2620_v15  ;;  %v7050_v15 = vld [vmem:[%s8871_s8 + $0x38] sm:$0xff]  }
 0x47c   : > { %v2662_v21 = vsel %vm2661_vm13, %v2658_v57, 0 }
 0x47d   : > { %v2665_v22 = vsel %vm2664_vm12, %v2662_v21, 0  ;;  %v3251_v23 = vpop.permute.xlu0 %3250 }
 0x47e   : > { %2685 = vrot.lane.b32.xlu0 %v2665_v22, %s7234_s1  ;;  %v2671_v16 = vmul.bf16 %v2665_v22, %v2458_v35  ;;  %v2669_v17 = vmul.bf16 %v2665_v22, %v2454_v34  ;;  %v3253_v7 = vsel %vm972_vm4, 0, %v3251_v23  ;;  %v7052_v23 = vld [vmem:[#allocation7 + $0x8] sm:$0xff]   ;;  %vm3273_vm4 = vcmask 130048  }
 0x47f   : > { %v3254_v25 = vsel %vm2661_vm13, %v3253_v7, 0  ;;  %v7054_v7 = vld [vmem:[#allocation7 + $0x10] sm:$0xff]   ;;  %vm3879_vm13 = vcmask 80896  }
 0x480   : > { %2799 = vrot.lane.b32.xlu1 %v2671_v16, %s8905_s23  ;;  %6608 = vmatpush3.bf16.msra.mxu1 %v2669_v17  ;;  %v3255_v27 = vsel %vm2664_vm12, %v3254_v25, 0  ;;  %vm8942_vm12 = vcmask 31744  }
 0x481   : > { %v8064_v26 = vmul.bf16 %v3255_v27, %v2454_v34  ;;  %v3258_v59 = vmul.bf16 %v3255_v27, %v2458_v35  ;;  %6621 = vmatprep.subr.bf16.mxu1 %v7233_v6  ;;  %vm8944_vm5 = vmmov %vm8942_vm12 }
 0x482   : > { %2865 = vrot.lane.b32.xlu0 %v2670_v46, %s7239_s21  ;;  %vm8946_vm8 = vmmov %vm8944_vm5 }
 0x483   : > { %6610 = vmatmul.mubr.msk.bf16.vlgmr.msra.gmra.mxu1 %vm1743_vm11, %v7043_v13 }
 0x484   : > { %2927 = vrot.lane.b32.xlu1 %v2667_v41, %s8941_s16  ;;  %6625 = vmatprep.mubr.msk.bf16.mxu1 %vm7260_vm6, %v7233_v6 }
 0x486   : > { %2863 = vrot.lane.b32.xlu0 %v2669_v17, %s7239_s21 }
 0x488   : > { %2925 = vrot.lane.b32.xlu1 %v2665_v22, %s8941_s16 }
 0x48a   : > { %2989 = vrot.lane.b32.xlu0 %v2672_v29, %s7241_s22 }
 0x48c   : > { %3051 = vrot.lane.b32.xlu1 %v2670_v46, %s7261_s2  ;;  %v7046_v46 = vld [vmem:[%s8871_s8 + $0x18] sm:$0xff]  }
 0x48e   : > { %2987 = vrot.lane.b32.xlu0 %v2671_v16, %s7241_s22 }
 0x490   : > { %3049 = vrot.lane.b32.xlu1 %v2669_v17, %s7261_s2  ;;  %v7053_v17 = vld [vmem:[#allocation7] sm:$0xff]  }
 0x492   : > { %3113 = vrot.lane.b32.xlu0 %v2667_v41, %s7262_s26  ;;  %v7045_v41 = vld [vmem:[%s8871_s8 + $0x10] sm:$0xff]  }
 0x494   : > { %3175 = vrot.lane.b32.xlu1 %v2672_v29, %s7263_s5 }
 0x496   : > { %3111 = vrot.lane.b32.xlu0 %v2665_v22, %s7262_s26  ;;  %v7051_v22 = vld [vmem:[%s8871_s8 + $0x40] sm:$0xff]  }
 0x498   : > { %3270 = vrot.lane.b32.xlu1 %v3255_v27, %s7234_s1 }
 0x49a   : > { %3173 = vrot.lane.b32.xlu0 %v2671_v16, %s7263_s5 }
 0x49c   : > { %3434 = vrot.lane.b32.xlu1 %v8064_v26, %s7239_s21  ;;  %s8959_s21 = sld [smem:[#allocation22_spill]] }
 0x49e   : > { %3376 = vrot.lane.b32.xlu0 %v3258_v59, %s8905_s23  ;;  %s7317_s23 = smov 96  }
 0x4a0   : > { %3548 = vrot.lane.b32.xlu1 %v3258_v59, %s7241_s22  ;;  %s7318_s22 = smov 94  }
 0x4a2   : > { %3491 = vrot.lane.b32.xlu0 %v3255_v27, %s8941_s16 }
 0x4a4   : > { %3662 = vrot.lane.b32.xlu1 %v3255_v27, %s7262_s26  ;;  %v7055_v27 = vld [vmem:[#allocation7 + $0x18] sm:$0xff]  }
 0x4a6   : > { %3605 = vrot.lane.b32.xlu0 %v8064_v26, %s7261_s2 }
 0x4a8   : > { %3231 = vperm.xlu1 %6936, %v3227_v12  }
 0x4aa   : > { %3719 = vrot.lane.b32.xlu0 %v3258_v59, %s7263_s5 }
 0x4ac   : > { %3772 = vperm.xlu1 %6936, %v3768_v28   ;;  %v7058_v28 = vld [vmem:[#allocation7 + $0x30] sm:$0xff]  }
 0x4ae   : > { %3236 = vperm.xlu0 %6937, %v3228_v24   ;;  %v7057_v24 = vld [vmem:[#allocation7 + $0x28] sm:$0xff]  }
 0x4b0   : > { %3777 = vperm.xlu1 %6936, %v3769_v10  }
 0x4c1   : > { %v2688_v37 = vpop.permute.xlu1 %2687 }
 0x4c2   : > { %v2694_v20 = vsel %vm1750_vm10, %v2688_v37, 0 }
 0x4c3   : > { %6598 = vmatpush3.bf16.msra.mxu0 %v2694_v20  ;;  %v7059_v20 = vld [vmem:[#allocation7 + $0x38] sm:$0xff]  }
 0x4c4   : > { %6599 = vmatprep.subr.bf16.mxu0 %v7233_v6 }
 0x4c5   : > { %v2802_v31 = vpop.permute.xlu1 %2801 }
 0x4c6   : > { %v2808_v33 = vsel %vm1750_vm10, %v2802_v31, 0  ;;  %v7060_v31 = vld [vmem:[#allocation7 + $0x40] sm:$0xff]  }
 0x4f0   : > { %v2686_v38 = vpop.permute.xlu0 %2685 }
 0x4f1   : > { %6600 = vmatpush3.bf16.msra.mxu0 %v2686_v38 }
 0x4f2   : > { %v2800_v45 = vpop.permute.xlu1 %2799  ;;  %6613 = vmatprep.subr.bf16.mxu0 %v7233_v6 }
 0x4f4   : > { %v2866_v34 = vpop.permute.xlu0 %2865  ;;  %6602 = vmatmul.mubr.msk.bf16.vlgmr.msra.gmra.mxu0 %vm1743_vm11, %v7044_v32 }
 0x4f5   : > { %v2872_v36 = vsel %vm1750_vm10, %v2866_v34, 0  ;;  %6614 = vmatpush3.bf16.msra.mxu0 %v2808_v33  ;;  %6617 = vmatprep.mubr.msk.bf16.mxu0 %vm7260_vm6, %v7233_v6  ;;  %v7264_v34 = vmov 25  }
 0x4f6   : > { %6622 = vmatpush3.bf16.msra.mxu1 %v2872_v36  ;;  %v2928_v19 = vpop.permute.xlu1 %2927  ;;  %6615 = vmatprep.subr.bf16.mxu0 %v7233_v6  ;;  %v7265_v36 = vmov 24  }
 0x4f7   : > { %6623 = vmatprep.subr.bf16.mxu1 %v7233_v6  ;;  %v2934_v29 = vsel %vm1750_vm10, %v2928_v19, 0  ;;  %6939 = vset.pattern.permute.xlu1 %v7264_v34 }
 0x4f8   : > { %v2864_v35 = vpop.permute.xlu0 %2863  ;;  %6938 = vset.pattern.permute.xlu0 %v7265_v36 }
 0x4f9   : > { %6616 = vmatpush3.bf16.msra.mxu0 %v2800_v45 }
 0x4fa   : > { %6624 = vmatpush3.bf16.msra.mxu1 %v2864_v35  ;;  %v2926_v44 = vpop.permute.xlu1 %2925  ;;  %6629 = vmatprep.subr.bf16.mxu0 %v7233_v6 }
 0x4fb   : > { %6637 = vmatprep.subr.bf16.mxu1 %v7233_v6 }
 0x4fc   : > { %v2990_v48 = vpop.permute.xlu0 %2989  ;;  %6618 = vmatmul.mubr.msk.bf16.vlgmr.msra.gmra.mxu0 %vm1743_vm11, %v7045_v41 }
 0x4fd   : > { %v2996_v51 = vsel %vm1750_vm10, %v2990_v48, 0  ;;  %6626 = vmatmul.mubr.msk.bf16.vlgmr.msra.gmra.mxu1 %vm1743_vm11, %v7046_v46  ;;  %6630 = vmatpush3.bf16.msra.mxu0 %v2934_v29 }
 0x4fe   : > { %6638 = vmatpush3.bf16.msra.mxu1 %v2996_v51  ;;  %v3052_v52 = vpop.permute.xlu1 %3051  ;;  %6631 = vmatprep.subr.bf16.mxu0 %v7233_v6 }
 0x4ff   : > { %6639 = vmatprep.subr.bf16.mxu1 %v7233_v6  ;;  %6633 = vmatprep.mubr.msk.bf16.mxu0 %vm7260_vm6, %v7233_v6  ;;  %v3058_v39 = vsel %vm1750_vm10, %v3052_v52, 0 }
 0x500   : > { %v2988_v55 = vpop.permute.xlu0 %2987  ;;  %6641 = vmatprep.mubr.msk.bf16.mxu1 %vm7260_vm6, %v7233_v6 }
 0x501   : > { %6632 = vmatpush3.bf16.msra.mxu0 %v2926_v44 }
 0x502   : > { %6640 = vmatpush3.bf16.msra.mxu1 %v2988_v55  ;;  %v3050_v49 = vpop.permute.xlu1 %3049  ;;  %6645 = vmatprep.subr.bf16.mxu0 %v7233_v6 }
 0x503   : > { %6653 = vmatprep.subr.bf16.mxu1 %v7233_v6 }
 0x504   : > { %v3114_v62 = vpop.permute.xlu0 %3113  ;;  %6634 = vmatmul.mubr.msk.bf16.vlgmr.msra.gmra.mxu0 %vm1743_vm11, %v7047_v56 }
 0x505   : > { %v3120_v2 = vsel %vm1750_vm10, %v3114_v62, 0  ;;  %6642 = vmatmul.mubr.msk.bf16.vlgmr.msra.gmra.mxu1 %vm1743_vm11, %v7048_v58  ;;  %6646 = vmatpush3.bf16.msra.mxu0 %v3058_v39 }
 0x506   : > { %6654 = vmatpush3.bf16.msra.mxu1 %v3120_v2  ;;  %6647 = vmatprep.subr.bf16.mxu0 %v7233_v6  ;;  %v3176_v47 = vpop.permute.xlu1 %3175 }
 0x507   : > { %6655 = vmatprep.subr.bf16.mxu1 %v7233_v6  ;;  %6649 = vmatprep.mubr.msk.bf16.mxu0 %vm7260_vm6, %v7233_v6  ;;  %v3182_v50 = vsel %vm1750_vm10, %v3176_v47, 0 }
 0x508   : > { %v3112_v11 = vpop.permute.xlu0 %3111  ;;  %6657 = vmatprep.mubr.msk.bf16.mxu1 %vm7260_vm6, %v7233_v6 }
 0x509   : > { %6648 = vmatpush3.bf16.msra.mxu0 %v3050_v49 }
 0x50a   : > { %6656 = vmatpush3.bf16.msra.mxu1 %v3112_v11  ;;  %6661 = vmatprep.subr.bf16.mxu0 %v7233_v6  ;;  %v3271_v57 = vpop.permute.xlu1 %3270 }
 0x50b   : > { %6669 = vmatprep.subr.bf16.mxu1 %v7233_v6 }
 0x50c   : > { %6650 = vmatmul.mubr.msk.bf16.vlgmr.msra.gmra.mxu0 %vm1743_vm11, %v7049_v14  ;;  %v3174_v21 = vpop.permute.xlu0 %3173 }
 0x50d   : > { %6658 = vmatmul.mubr.msk.bf16.vlgmr.msra.gmra.mxu1 %vm1743_vm11, %v7050_v15  ;;  %6662 = vmatpush3.bf16.msra.mxu0 %v3182_v50 }
 0x50e   : > { %6663 = vmatprep.subr.bf16.mxu0 %v7233_v6  ;;  %6670 = vmatpush3.bf16.msra.mxu1 %v3271_v57  ;;  %v3435_v25 = vpop.permute.xlu1 %3434 }
 0x50f   : > { %6665 = vmatprep.mubr.msk.bf16.mxu0 %vm7260_vm6, %v7233_v6  ;;  %6671 = vmatprep.mubr.msk.bf16.mxu1 %vm7260_vm6, %v7233_v6 }
 0x510   : > { %6681 = vmatprep.subr.bf16.mxu1 %v7233_v6  ;;  %v3377_v16 = vpop.permute.xlu0 %3376 }
 0x511   : > { %6664 = vmatpush3.bf16.msra.mxu0 %v3174_v21 }
 0x512   : > { %6675 = vmatprep.subr.bf16.mxu0 %v7233_v6  ;;  %v3549_v59 = vpop.permute.xlu1 %3548 }
 0x514   : > { %6666 = vmatmul.mubr.msk.bf16.vlgmr.msra.gmra.mxu0 %vm1743_vm11, %v7051_v22  ;;  %v3492_v13 = vpop.permute.xlu0 %3491  ;;  %vm3877_vm11 = vcmask 64512  }
 0x515   : > { %6672 = vmatmul.mubr.msk.bf16.vlgmr.msra.gmra.mxu1 %vm3273_vm4, %v7052_v23  ;;  %6676 = vmatpush3.bf16.msra.mxu0 %v8064_v26  ;;  %v7056_v26 = vld [vmem:[#allocation7 + $0x20] sm:$0xff]  }
 0x516   : > { %6682 = vmatpush3.bf16.msra.mxu1 %v3377_v16  ;;  %6677 = vmatprep.mubr.msk.bf16.mxu0 %vm7260_vm6, %v7233_v6  ;;  %v3663_v10 = vpop.permute.xlu1 %3662 }
 0x517   : > { %6687 = vmatprep.subr.bf16.mxu0 %v7233_v6  ;;  %6683 = vmatprep.mubr.msk.bf16.mxu1 %vm7260_vm6, %v7233_v6 }
 0x518   : > { %6693 = vmatprep.subr.bf16.mxu1 %v7233_v6  ;;  %v3606_v12 = vpop.permute.xlu0 %3605 }
 0x51c   : > { %6678 = vmatmul.mubr.msk.bf16.vlgmr.msra.gmra.mxu0 %vm3273_vm4, %v7053_v17  ;;  %v3720_v37 = vpop.permute.xlu0 %3719 }
 0x51d   : > { %6688 = vmatpush3.bf16.msra.mxu0 %v3435_v25  ;;  %6684 = vmatmul.mubr.msk.bf16.vlgmr.msra.gmra.mxu1 %vm3273_vm4, %v7054_v7 }
 0x51e   : > { %6694 = vmatpush3.bf16.msra.mxu1 %v3492_v13  ;;  %6689 = vmatprep.mubr.msk.bf16.mxu0 %vm7260_vm6, %v7233_v6 }
 0x51f   : > { %6699 = vmatprep.subr.bf16.mxu0 %v7233_v6  ;;  %6695 = vmatprep.mubr.msk.bf16.mxu1 %vm7260_vm6, %v7233_v6 }
 0x520   : > { %6705 = vmatprep.subr.bf16.mxu1 %v7233_v6 }
 0x524   : > { %6690 = vmatmul.mubr.msk.bf16.vlgmr.msra.gmra.mxu0 %vm3273_vm4, %v7055_v27 }
 0x525   : > { %6700 = vmatpush3.bf16.msra.mxu0 %v3549_v59  ;;  %6696 = vmatmul.mubr.msk.bf16.vlgmr.msra.gmra.mxu1 %vm3273_vm4, %v7056_v26 }
 0x526   : > { %6706 = vmatpush3.bf16.msra.mxu1 %v3606_v12  ;;  %6701 = vmatprep.mubr.msk.bf16.mxu0 %vm7260_vm6, %v7233_v6 }
 0x527   : > { %6711 = vmatprep.subr.bf16.mxu0 %v7233_v6  ;;  %6707 = vmatprep.mubr.msk.bf16.mxu1 %vm7260_vm6, %v7233_v6 }
 0x528   : > { %6717 = vmatprep.subr.bf16.mxu1 %v7233_v6 }
 0x52c   : > { %6702 = vmatmul.mubr.msk.bf16.vlgmr.msra.gmra.mxu0 %vm3273_vm4, %v7057_v24 }
 0x52d   : > { %6712 = vmatpush3.bf16.msra.mxu0 %v3663_v10  ;;  %6708 = vmatmul.mubr.msk.bf16.vlgmr.msra.gmra.mxu1 %vm3273_vm4, %v7058_v28 }
 0x52e   : > { %6718 = vmatpush3.bf16.msra.mxu1 %v3720_v37  ;;  %6713 = vmatprep.mubr.msk.bf16.mxu0 %vm7260_vm6, %v7233_v6 }
 0x52f   : > { %6719 = vmatprep.mubr.msk.bf16.mxu1 %vm7260_vm6, %v7233_v6  ;;  %vm8945_vm6 = vmmov %vm8943_vm14 }
 0x534   : > { %6714 = vmatmul.mubr.msk.bf16.vlgmr.msra.gmra.mxu0 %vm3273_vm4, %v7059_v20 }
 0x535   : > { %6720 = vmatmul.mubr.msk.bf16.vlgmr.msra.gmra.mxu1 %vm3273_vm4, %v7060_v31  ;;  %4243 = vmatprep.mubr.bf16.mxu0 %v7225_v1 }
 0x536   : > { %4287 = vmatprep.mubr.bf16.mxu1 %v7225_v1 }
 0x543   : > { %v2782_v38 = vpop.f32.mrf.mxu1 }
 0x545   : > { %v6611_v32 = vpop.f32.mrf.mxu1 }
 0x547   : > { %v2785_v45 = vpop.f32.mrf.mxu1 }
 0x549   : > { %v6612_v33 = vpop.f32.mrf.mxu1 }
 0x5b4   : > { %v2730_v19 = vpop.f32.mrf.mxu0 }
 0x5b5   : > { %v2783_v36 = vadd.f32 %v2782_v38, %v2730_v19 }
 0x5b6   : > { %v6603_v35 = vpop.f32.mrf.mxu0 }
 0x5b8   : > { %v2733_v41 = vpop.f32.mrf.mxu0 }
 0x5b9   : > { %v2786_v35 = vadd.f32 %v2785_v45, %v2733_v41 }
 0x5ba   : > { %v6604_v46 = vpop.f32.mrf.mxu0 }
 0x5bc   : > { %v2844_v44 = vpop.f32.mrf.mxu0 }
 0x5bd   : > { %v2908_v29 = vpop.f32.mrf.mxu1 }
 0x5be   : > { %v6619_v48 = vpop.f32.mrf.mxu0 }
 0x5bf   : > { %v6627_v51 = vpop.f32.mrf.mxu1 }
 0x5c0   : > { %v2847_v52 = vpop.f32.mrf.mxu0 }
 0x5c1   : > { %v2911_v55 = vpop.f32.mrf.mxu1 }
 0x5c2   : > { %v6620_v56 = vpop.f32.mrf.mxu0 }
 0x5c3   : > { %v6628_v58 = vpop.f32.mrf.mxu1  ;;  %v2851_v56 = vadd.f32 %v2844_v44, %v2783_v36 }
 0x5c4   : > { %v2970_v49 = vpop.f32.mrf.mxu0  ;;  %v2852_v58 = vadd.f32 %v2847_v52, %v2786_v35  ;;  %v3232_v35 = vpop.permute.xlu1 %3231 }
 0x5c5   : > { %v3032_v39 = vpop.f32.mrf.mxu1 }
 0x5c6   : > { %v6635_v62 = vpop.f32.mrf.mxu0 }
 0x5c7   : > { %v6643_v2 = vpop.f32.mrf.mxu1 }
 0x5c8   : > { %v2973_v47 = vpop.f32.mrf.mxu0 }
 0x5c9   : > { %v3035_v11 = vpop.f32.mrf.mxu1 }
 0x5ca   : > { %v6636_v14 = vpop.f32.mrf.mxu0 }
 0x5cb   : > { %v6644_v15 = vpop.f32.mrf.mxu1 }
 0x5cc   : > { %v3094_v50 = vpop.f32.mrf.mxu0 }
 0x5cd   : > { %v8209_v57 = vpop.f32.mrf.mxu1 }
 0x5ce   : > { %v6651_v21 = vpop.f32.mrf.mxu0 }
 0x5cf   : > { %v6659_v22 = vpop.f32.mrf.mxu1 }
 0x5d0   : > { %v3097_v23 = vpop.f32.mrf.mxu0 }
 0x5d1   : > { %v3159_v16 = vpop.f32.mrf.mxu1 }
 0x5d2   : > { %v6652_v17 = vpop.f32.mrf.mxu0 }
 0x5d3   : > { %v6660_v7 = vpop.f32.mrf.mxu1  ;;  %v2915_v17 = vadd.f32 %v2908_v29, %v2851_v56 }
 0x5d4   : > { %v8211_v25 = vpop.f32.mrf.mxu0  ;;  %v2916_v7 = vadd.f32 %v2911_v55, %v2852_v58 }
 0x5d5   : > { %v3311_v13 = vpop.f32.mrf.mxu1 }
 0x5d6   : > { %v6667_v27 = vpop.f32.mrf.mxu0 }
 0x5d7   : > { %v6673_v26 = vpop.f32.mrf.mxu1 }
 0x5d8   : > { %v3221_v59 = vpop.f32.mrf.mxu0 }
 0x5d9   : > { %v3314_v12 = vpop.f32.mrf.mxu1 }
 0x5da   : > { %v6668_v24 = vpop.f32.mrf.mxu0 }
 0x5db   : > { %v6674_v28 = vpop.f32.mrf.mxu1 }
 0x5dc   : > { %v3360_v10 = vpop.f32.mrf.mxu0  ;;  %v2977_v28 = vadd.f32 %v2970_v49, %v2915_v17 }
 0x5dd   : > { %v3416_v37 = vpop.f32.mrf.mxu1  ;;  %v3361_v46 = vadd.f32 %v3360_v10, %v3311_v13 }
 0x5de   : > { %v6679_v20 = vpop.f32.mrf.mxu0  ;;  %v3039_v10 = vadd.f32 %v3032_v39, %v2977_v28  ;;  %v3773_v39 = vpop.permute.xlu1 %3772 }
 0x5df   : > { %v6685_v31 = vpop.f32.mrf.mxu1  ;;  %v3423_v14 = vadd.f32 %v3416_v37, %v3361_v46  ;;  %v2978_v20 = vadd.f32 %v2973_v47, %v2916_v7 }
 0x5e0   : > { %v3363_v32 = vpop.f32.mrf.mxu0 }
 0x5e1   : > { %v3419_v33 = vpop.f32.mrf.mxu1  ;;  %v3364_v15 = vadd.f32 %v3363_v32, %v3314_v12  ;;  %v3040_v31 = vadd.f32 %v3035_v11, %v2978_v20 }
 0x5e2   : > { %v6680_v34 = vpop.f32.mrf.mxu0  ;;  %v3778_v20 = vpop.permute.xlu1 %3777 }
 0x5e3   : > { %v6686_v48 = vpop.f32.mrf.mxu1  ;;  %v3424_v38 = vadd.f32 %v3419_v33, %v3364_v15  ;;  %v3101_v34 = vadd.f32 %v3094_v50, %v3039_v10  ;;  %v3102_v29 = vadd.f32 %v3097_v23, %v3040_v31  ;;  %v7267_v10 = vmov 32  }
 0x5e4   : > { %v3474_v51 = vpop.f32.mrf.mxu0  ;;  %v7268_v31 = vmov 33  }
 0x5e5   : > { %v3531_v62 = vpop.f32.mrf.mxu1  ;;  %v3481_v27 = vadd.f32 %v3474_v51, %v3423_v14  ;;  %v3163_v51 = vadd.f32 %v8209_v57, %v3101_v34  ;;  %v3164_v56 = vadd.f32 %v3159_v16, %v3102_v29  ;;  %v7274_v34 = vmov 35  }
 0x5e6   : > { %v6691_v2 = vpop.f32.mrf.mxu0  ;;  %v7276_v29 = vmov 43  }
 0x5e7   : > { %v6697_v21 = vpop.f32.mrf.mxu1  ;;  %v3538_v41 = vadd.f32 %v3531_v62, %v3481_v27  ;;  %v3225_v2 = vadd.f32 %v8211_v25, %v3163_v51  ;;  %v3226_v14 = vadd.f32 %v3221_v59, %v3164_v56  ;;  %v7293_v51 = vmov 17  }
 0x5e8   : > { %v3477_v22 = vpop.f32.mrf.mxu0  ;;  %v3237_v21 = vpop.permute.xlu0 %3236  ;;  %v7294_v56 = vmov 23  }
 0x5e9   : > { %v3534_v26 = vpop.f32.mrf.mxu1  ;;  %v3482_v13 = vadd.f32 %v3477_v22, %v3424_v38  ;;  %v3240_v28 = vadd.f32 %v3237_v21, %v3226_v14 }
 0x5ea   : > { %v6692_v24 = vpop.f32.mrf.mxu0 }
 0x5eb   : > { %v6698_v45 = vpop.f32.mrf.mxu1  ;;  %v3539_v55 = vadd.f32 %v3534_v26, %v3482_v13  ;;  %v3239_v24 = vadd.f32 %v3232_v35, %v3225_v2  ;;  %v7281_v35 = vmov 50   ;;  %v7298_v2 = vmov 18  }
 0x5ec   : > { %v3588_v19 = vpop.f32.mrf.mxu0 }
 0x5ed   : > { %v3645_v44 = vpop.f32.mrf.mxu1  ;;  %v3595_v37 = vadd.f32 %v3588_v19, %v3538_v41  ;;  %v3241_v19 = vmax.f32 %v3239_v24, 0.0  ;;  %v3242_v41 = vmax.f32 %v3240_v28, 0.0  ;;  %v7302_v24 = vmov 19  }
 0x5ee   : > { %v6703_v52 = vpop.f32.mrf.mxu0 }
 0x5ef   : > { %v6709_v12 = vpop.f32.mrf.mxu1  ;;  %v3652_v49 = vadd.f32 %v3645_v44, %v3595_v37  ;;  %v7266_v52 = vmov 26   ;;  %v7269_v37 = vmov 27  }
 0x5f0   : > { %v3591_v32 = vpop.f32.mrf.mxu0  ;;  %v7270_v12 = vmov 40  }
 0x5f1   : > { %v3648_v36 = vpop.f32.mrf.mxu1  ;;  %v3596_v47 = vadd.f32 %v3591_v32, %v3539_v55  ;;  %v7273_v32 = vmov 36   ;;  %v7277_v55 = vmov 56  }
 0x5f2   : > { %v6704_v46 = vpop.f32.mrf.mxu0 }
 0x5f3   : > { %v6710_v33 = vpop.f32.mrf.mxu1  ;;  %v3653_v50 = vadd.f32 %v3648_v36, %v3596_v47  ;;  %v7279_v36 = vmov 31   ;;  %v7284_v46 = vmov 37   ;;  %v7289_v47 = vmov 53  }
 0x5f4   : > { %v3702_v48 = vpop.f32.mrf.mxu0  ;;  %v7290_v33 = vmov 21  }
 0x5f5   : > { %v3709_v58 = vadd.f32 %v3702_v48, %v3652_v49  ;;  %v3759_v62 = vpop.f32.mrf.mxu1  ;;  %v7287_v49 = vmov 49   ;;  %v7292_v48 = vmov 22  }
 0x5f6   : > { %v6715_v11 = vpop.f32.mrf.mxu0 }
 0x5f7   : > { %v3766_v23 = vadd.f32 %v3759_v62, %v3709_v58  ;;  %v6721_v15 = vpop.f32.mrf.mxu1  ;;  %v7296_v58 = vmov 44   ;;  %v7297_v62 = vmov 58  }
 0x5f8   : > { %v3705_v22 = vpop.f32.mrf.mxu0  ;;  %v7300_v15 = vmov 51  }
 0x5f9   : > { %v3780_v17 = vadd.f32 %v3773_v39, %v3766_v23  ;;  %v3710_v7 = vadd.f32 %v3705_v22, %v3653_v50  ;;  %v3762_v27 = vpop.f32.mrf.mxu1  ;;  %v7299_v50 = vmov 39   ;;  %v7301_v22 = vmov 59  }
 0x5fa   : > { %v6716_v26 = vpop.f32.mrf.mxu0 }
 0x5fb   : > { %v3767_v57 = vadd.f32 %v3762_v27, %v3710_v7  ;;  %v6722_v16 = vpop.f32.mrf.mxu1  ;;  %v3782_v38 = vmax.f32 %v3780_v17, 0.0 }
 0x5fc   : > { %v7303_v16 = vmov 52  }
 0x5fd   : > { %v3781_v45 = vadd.f32 %v3778_v20, %v3767_v57  ;;  %v3784_v59 = vadd.f32 %v3782_v38, %v3241_v19  ;;  %v7305_v19 = vmov 20  }
 0x5ff   : > { %v3783_v25 = vmax.f32 %v3781_v45, 0.0 }
 0x601   : > { %v3785_v13 = vadd.f32 %v3783_v25, %v3242_v41 }
 0x603   : > { %v8215_v44 = vpack.c.bf16 %v3785_v13, %v3784_v59  ;;  %v7306_v59 = vmov 47  }
 0x605   : > { %3951 = vperm.xlu1 %6939, %v8215_v44   ;;  %3948 = vperm.xlu0 %6938, %v8215_v44  }
 0x609   : > { %6940 = vset.pattern.permute.xlu1 %v7266_v52  ;;  %6941 = vset.pattern.permute.xlu0 %v7267_v10  ;;  %v7307_v10 = vmov 61  }
 0x60a   : > { %3954 = vperm.xlu1 %6940, %v8215_v44   ;;  %3979 = vperm.xlu0 %6941, %v8215_v44  }
 0x60e   : > { %6942 = vset.pattern.permute.xlu1 %v7268_v31  ;;  %6944 = vset.pattern.permute.xlu0 %v7224_v0  ;;  %v7271_v0 = vmov 34  }
 0x60f   : > { %3982 = vperm.xlu1 %6942, %v8215_v44   ;;  %3854 = vperm.xlu0 %6944, %v8215_v44  }
 0x613   : > { %6943 = vset.pattern.permute.xlu1 %v7225_v1  ;;  %6947 = vset.pattern.permute.xlu0 %v7226_v4  ;;  %v7272_v4 = vmov 28  }
 0x614   : > { %3851 = vperm.xlu1 %6943, %v8215_v44   ;;  %3857 = vperm.xlu0 %6947, %v8215_v44  }
 0x618   : > { %6945 = vset.pattern.permute.xlu1 %v7269_v37  ;;  %6950 = vset.pattern.permute.xlu0 %v7270_v12 }
 0x619   : > { %3957 = vperm.xlu1 %6945, %v8215_v44   ;;  %4010 = vperm.xlu0 %6950, %v8215_v44  }
 0x61d   : > { %6946 = vset.pattern.permute.xlu1 %v7271_v0  ;;  %6953 = vset.pattern.permute.xlu0 %v7248_v63  ;;  %v7275_v63 = vmov 41  }
 0x61e   : > { %3985 = vperm.xlu1 %6946, %v8215_v44   ;;  %3886 = vperm.xlu0 %6953, %v8215_v44  }
 0x622   : > { %6948 = vset.pattern.permute.xlu1 %v7272_v4  ;;  %6956 = vset.pattern.permute.xlu0 %v7273_v32  ;;  %v7308_v4 = vmov 54  }
 0x623   : > { %3960 = vperm.xlu1 %6948, %v8215_v44   ;;  %3991 = vperm.xlu0 %6956, %v8215_v44  }
 0x627   : > { %6949 = vset.pattern.permute.xlu1 %v7274_v34  ;;  %6959 = vset.pattern.permute.xlu0 %v7250_v8  ;;  %v7278_v8 = vmov 29   ;;  %v7309_v34 = vmov 62  }
 0x628   : > { %3988 = vperm.xlu1 %6949, %v8215_v44   ;;  %3892 = vperm.xlu0 %6959, %v8215_v44  }
 0x62c   : > { %6951 = vset.pattern.permute.xlu1 %v7275_v63  ;;  %6962 = vset.pattern.permute.xlu0 %v7276_v29 }
 0x62d   : > { %4013 = vperm.xlu1 %6951, %v8215_v44   ;;  %4019 = vperm.xlu0 %6962, %v8215_v44  }
 0x631   : > { %6952 = vset.pattern.permute.xlu1 %v7227_v5  ;;  %6965 = vset.pattern.permute.xlu0 %v7277_v55  ;;  %v7280_v5 = vmov 42   ;;  %v7310_v55 = vmov 55  }
 0x632   : > { %3860 = vperm.xlu1 %6952, %v8215_v44   ;;  %4072 = vperm.xlu0 %6965, %v8215_v44  }
 0x636   : > { %6954 = vset.pattern.permute.xlu1 %v7249_v3  ;;  %6968 = vset.pattern.permute.xlu0 %v7251_v9  ;;  %v7282_v3 = vmov 30   ;;  %v7283_v9 = vmov 45  }
 0x637   : > { %3889 = vperm.xlu1 %6954, %v8215_v44   ;;  %3895 = vperm.xlu0 %6968, %v8215_v44  }
 0x63b   : > { %6955 = vset.pattern.permute.xlu1 %v7278_v8  ;;  %6971 = vset.pattern.permute.xlu0 %v7279_v36 }
 0x63c   : > { %3963 = vperm.xlu1 %6955, %v8215_v44   ;;  %3969 = vperm.xlu0 %6971, %v8215_v44  }
 0x640   : > { %6957 = vset.pattern.permute.xlu1 %v7280_v5  ;;  %6974 = vset.pattern.permute.xlu0 %v7281_v35 }
 0x641   : > { %4016 = vperm.xlu1 %6957, %v8215_v44   ;;  %4047 = vperm.xlu0 %6974, %v8215_v44  }
 0x645   : > { %6958 = vset.pattern.permute.xlu1 %v7242_v18  ;;  %6977 = vset.pattern.permute.xlu0 %v7252_v40  ;;  %v7285_v18 = vmov 48   ;;  %v7286_v40 = vmov 46  }
 0x646   : > { %3863 = vperm.xlu1 %6958, %v8215_v44   ;;  %3898 = vperm.xlu0 %6977, %v8215_v44  }
 0x64a   : > { %6960 = vset.pattern.permute.xlu1 %v7282_v3  ;;  %6980 = vset.pattern.permute.xlu0 %v7283_v9 }
 0x64b   : > { %3966 = vperm.xlu1 %6960, %v8215_v44   ;;  %4025 = vperm.xlu0 %6980, %v8215_v44  }
 0x64f   : > { %6961 = vset.pattern.permute.xlu1 %v7284_v46  ;;  %6983 = vset.pattern.permute.xlu0 %v7243_v43  ;;  %v7288_v43 = vmov 57   ;;  %v7311_v46 = vmov 63  }
 0x650   : > { %3994 = vperm.xlu1 %6961, %v8215_v44   ;;  %3872 = vperm.xlu0 %6983, %v8215_v44  }
 0x654   : > { %6963 = vset.pattern.permute.xlu1 %v7285_v18  ;;  %6986 = vset.pattern.permute.xlu0 %v7286_v40 }
 0x655   : > { %4041 = vperm.xlu1 %6963, %v8215_v44   ;;  %4028 = vperm.xlu0 %6986, %v8215_v44  }
 0x659   : > { %6964 = vset.pattern.permute.xlu1 %v7287_v49  ;;  %6989 = vset.pattern.permute.xlu0 %v7253_v54  ;;  %v7291_v54 = vmov 16  }
 0x65a   : > { %4044 = vperm.xlu1 %6964, %v8215_v44   ;;  %3904 = vperm.xlu0 %6989, %v8215_v44  }
 0x65e   : > { %6966 = vset.pattern.permute.xlu1 %v7288_v43  ;;  %6992 = vset.pattern.permute.xlu0 %v7289_v47 }
 0x65f   : > { %4075 = vperm.xlu1 %6966, %v8215_v44   ;;  %4056 = vperm.xlu0 %6992, %v8215_v44  }
 0x663   : > { %6967 = vset.pattern.permute.xlu1 %v7245_v53  ;;  %6995 = vset.pattern.permute.xlu0 %v7290_v33  ;;  %v7295_v53 = vmov 38  }
 0x664   : > { %3866 = vperm.xlu1 %6967, %v8215_v44   ;;  %3932 = vperm.xlu0 %6995, %v8215_v44  }
 0x668   : > { %6969 = vset.pattern.permute.xlu1 %v7291_v54  ;;  %6998 = vset.pattern.permute.xlu0 %v7292_v48 }
 0x669   : > { %3917 = vperm.xlu1 %6969, %v8215_v44   ;;  %3935 = vperm.xlu0 %6998, %v8215_v44  }
 0x66d   : > { %6970 = vset.pattern.permute.xlu1 %v7293_v51  ;;  %7001 = vset.pattern.permute.xlu0 %v7294_v56 }
 0x66e   : > { %3920 = vperm.xlu1 %6970, %v8215_v44   ;;  %3938 = vperm.xlu0 %7001, %v8215_v44  }
 0x672   : > { %6972 = vset.pattern.permute.xlu1 %v7295_v53  ;;  %7002 = vset.pattern.permute.xlu0 %v7225_v1 }
 0x673   : > { %3997 = vperm.xlu1 %6972, %v8215_v44  }
 0x677   : > { %6973 = vset.pattern.permute.xlu1 %v7296_v58 }
 0x678   : > { %4022 = vperm.xlu1 %6973, %v8215_v44  }
 0x67c   : > { %6975 = vset.pattern.permute.xlu1 %v7297_v62 }
 0x67d   : > { %4078 = vperm.xlu1 %6975, %v8215_v44  }
 0x680   : > { %v8278_v39 = vpop.permute.xlu1 %3951 }
 0x681   : > { %6976 = vset.pattern.permute.xlu1 %v7247_v61  ;;  %v3949_v61 = vpop.permute.xlu0 %3948 }
 0x682   : > { %3869 = vperm.xlu1 %6976, %v8215_v44  }
 0x685   : > { %v8282_v11 = vpop.permute.xlu1 %3954  ;;  %v8292_v17 = vpop.permute.xlu0 %3979 }
 0x686   : > { %6978 = vset.pattern.permute.xlu1 %v7298_v2 }
 0x687   : > { %3923 = vperm.xlu1 %6978, %v8215_v44  }
 0x68a   : > { %v8285_v14 = vpop.permute.xlu1 %3982  ;;  %v8298_v27 = vpop.permute.xlu0 %3854 }
 0x68b   : > { %6979 = vset.pattern.permute.xlu1 %v7299_v50 }
 0x68c   : > { %4000 = vperm.xlu1 %6979, %v8215_v44  }
 0x68f   : > { %v8288_v23 = vpop.permute.xlu1 %3851  ;;  %v8303_v57 = vpop.permute.xlu0 %3857 }
 0x690   : > { %6981 = vset.pattern.permute.xlu1 %v7300_v15  ;;  %v3874_v58 = vsel %vm825_vm0, %v8288_v23, %v8298_v27  ;;  %v4002_v23 = vsel %vm825_vm0, %v8292_v17, %v8285_v14 }
 0x691   : > { %4050 = vperm.xlu1 %6981, %v8215_v44  }
 0x694   : > { %v3958_v21 = vpop.permute.xlu1 %3957  ;;  %v8308_v38 = vpop.permute.xlu0 %4010 }
 0x695   : > { %6982 = vset.pattern.permute.xlu1 %v7301_v22 }
 0x696   : > { %4081 = vperm.xlu1 %6982, %v8215_v44  }
 0x699   : > { %v8294_v7 = vpop.permute.xlu1 %3985  ;;  %v8314_v41 = vpop.permute.xlu0 %3886 }
 0x69a   : > { %6984 = vset.pattern.permute.xlu1 %v7244_v42  ;;  %v7304_v42 = vmov 60   ;;  %v4003_v27 = vsel %vm8946_vm8, %v4002_v23, %v8294_v7 }
 0x69b   : > { %3901 = vperm.xlu1 %6984, %v8215_v44  }
 0x69e   : > { %v3961_v26 = vpop.permute.xlu1 %3960  ;;  %v8319_v13 = vpop.permute.xlu0 %3991 }
 0x69f   : > { %6985 = vset.pattern.permute.xlu1 %v7302_v24 }
 0x6a0   : > { %3926 = vperm.xlu1 %6985, %v8215_v44  }
 0x6a3   : > { %v8301_v28 = vpop.permute.xlu1 %3988  ;;  %v8322_v31 = vpop.permute.xlu0 %3892 }
 0x6a4   : > { %6987 = vset.pattern.permute.xlu1 %v7303_v16 }
 0x6a5   : > { %4053 = vperm.xlu1 %6987, %v8215_v44  }
 0x6a8   : > { %v8306_v20 = vpop.permute.xlu1 %4013  ;;  %v8328_v0 = vpop.permute.xlu0 %4019 }
 0x6a9   : > { %6988 = vset.pattern.permute.xlu1 %v7304_v42 }
 0x6aa   : > { %4084 = vperm.xlu1 %6988, %v8215_v44  }
 0x6ad   : > { %v8311_v45 = vpop.permute.xlu1 %3860  ;;  %v8331_v63 = vpop.permute.xlu0 %4072 }
 0x6ae   : > { %6990 = vset.pattern.permute.xlu1 %v7305_v19 }
 0x6af   : > { %3929 = vperm.xlu1 %6990, %v8215_v44  }
 0x6b2   : > { %v8316_v25 = vpop.permute.xlu1 %3889  ;;  %v8339_v36 = vpop.permute.xlu0 %3895 }
 0x6b3   : > { %6991 = vset.pattern.permute.xlu1 %v7306_v59 }
 0x6b4   : > { %4031 = vperm.xlu1 %6991, %v8215_v44  }
 0x6b7   : > { %v3964_v52 = vpop.permute.xlu1 %3963  ;;  %v3970_v40 = vpop.permute.xlu0 %3969 }
 0x6b8   : > { %6993 = vset.pattern.permute.xlu1 %v7307_v10 }
 0x6b9   : > { %4087 = vperm.xlu1 %6993, %v8215_v44  }
 0x6bc   : > { %v8324_v37 = vpop.permute.xlu1 %4016 }
 0x6bd   : > { %6994 = vset.pattern.permute.xlu1 %v7246_v30  ;;  %v3971_v30 = vsel %vm825_vm0, %v3949_v61, %v8278_v39 }
 0x6be   : > { %3907 = vperm.xlu1 %6994, %v8215_v44   ;;  %v3972_v8 = vsel %vm8942_vm12, %v3971_v30, %v8282_v11  ;;  %v3875_v11 = vsel %vm8944_vm5, %v3874_v58, %v8303_v57  ;;  %vm8947_vm12 = vmmov %vm8945_vm6 }
 0x6bf   : > { %v3973_v5 = vsel %vm8943_vm14, %v3972_v8, %v3958_v21  ;;  %v3876_v2 = vsel %vm8945_vm6, %v3875_v11, %v8311_v45  ;;  %v4004_v24 = vsel %vm8947_vm12, %v4003_v27, %v8301_v28  ;;  %vm8948_vm14 = vmmov %vm8944_vm5  ;;  %v3909_v8 = vsel %vm825_vm0, %v8314_v41, %v8316_v25 }
 0x6c0   : > { %v3974_v35 = vsel %vm3877_vm11, %v3973_v5, %v3961_v26  ;;  %v4005_v16 = vsel %vm3877_vm11, %v4004_v24, %v8319_v13  ;;  %v4033_v13 = vsel %vm825_vm0, %v8308_v38, %v8306_v20  ;;  %vm8949_vm5 = vmmov %vm8945_vm6 }
 0x6c1   : > { %v3864_v12 = vpop.permute.xlu1 %3863  ;;  %v3975_v9 = vsel %vm3879_vm13, %v3974_v35, %v3964_v52  ;;  %vm8950_vm6 = vmmov %vm8946_vm8 }
 0x6c2   : > { %6996 = vset.pattern.permute.xlu1 %v7308_v4  ;;  %v3878_v50 = vsel %vm3877_vm11, %v3876_v2, %v3864_v12  ;;  %v4034_v12 = vsel %vm8948_vm14, %v4033_v13, %v8324_v37  ;;  %v3910_v37 = vsel %vm8950_vm6, %v3909_v8, %v8322_v31  ;;  %vm8951_vm8 = vmmov %vm8949_vm5 }
 0x6c3   : > { %4059 = vperm.xlu1 %6996, %v8215_v44   ;;  %vm8952_vm12 = vmmov %vm8950_vm6 }
 0x6c4   : > { %vm8953_vm14 = vmmov %vm8949_vm5 }
 0x6c6   : > { %v3967_v32 = vpop.permute.xlu1 %3966 }
 0x6c7   : > { %6997 = vset.pattern.permute.xlu1 %v7309_v34  ;;  %v3976_v18 = vsel %vm3881_vm1, %v3975_v9, %v3967_v32  ;;  %v4035_v32 = vsel %vm8949_vm5, %v4034_v12, %v8328_v0  ;;  %v3911_v0 = vsel %vm8951_vm8, %v3910_v37, %v8339_v36  ;;  %vm8954_vm5 = vmmov %vm8950_vm6 }
 0x6c8   : > { %4090 = vperm.xlu1 %6997, %v8215_v44   ;;  %v3977_v43 = vsel %vm3883_vm2, %v3976_v18, %v3970_v40  ;;  %vm8955_vm6 = vmmov %vm8951_vm8 }
 0x6c9   : > { %vm8956_vm8 = vmmov %vm8954_vm5 }
 0x6cb   : > { %v3995_v29 = vpop.permute.xlu1 %3994 }
 0x6cc   : > { %6999 = vset.pattern.permute.xlu1 %v7310_v55  ;;  %v4006_v42 = vsel %vm3879_vm13, %v4005_v16, %v3995_v29 }
 0x6cd   : > { %4062 = vperm.xlu1 %6999, %v8215_v44  }
 0x6d0   : > { %v8343_v3 = vpop.permute.xlu1 %4041 }
 0x6d1   : > { %7000 = vset.pattern.permute.xlu1 %v7311_v46 }
 0x6d2   : > { %4093 = vperm.xlu1 %7000, %v8215_v44   ;;  %v8356_v44 = vpop.permute.xlu0 %4047 }
 0x6d5   : > { %v8348_v49 = vpop.permute.xlu1 %4044 }
 0x6d6   : > { %4118 = vrot.lane.b32.xlu1 %v3977_v43, %s7312_s4  ;;  %v3899_v56 = vpop.permute.xlu0 %3898 }
 0x6d7   : > { %7003 = vset.pattern.permute.xlu1 %v7225_v1  ;;  %v3912_v46 = vsel %vm3877_vm11, %v3911_v0, %v3899_v56 }
 0x6da   : > { %v8353_v47 = vpop.permute.xlu1 %4075  ;;  %4120 = vrot.lane.b32.xlu1 %v3977_v43, %s7313_s17  ;;  %v4026_v62 = vpop.permute.xlu0 %4025 }
 0x6de   : > { %v3873_v21 = vpop.permute.xlu0 %3872 }
 0x6df   : > { %v3867_v33 = vpop.permute.xlu1 %3866 }
 0x6e0   : > { %v3880_v15 = vsel %vm3879_vm13, %v3878_v50, %v3867_v33 }
 0x6e2   : > { %v4029_v10 = vpop.permute.xlu0 %4028 }
 0x6e4   : > { %v3918_v54 = vpop.permute.xlu1 %3917 }
 0x6e6   : > { %v3905_v34 = vpop.permute.xlu0 %3904 }
 0x6e9   : > { %v3921_v48 = vpop.permute.xlu1 %3920 }
 0x6ea   : > { %v4057_v5 = vpop.permute.xlu0 %4056  ;;  %v3940_v41 = vsel %vm825_vm0, %v3918_v54, %v3921_v48  ;;  %v4064_v54 = vsel %vm825_vm0, %v8343_v3, %v8348_v49  ;;  %v4095_v3 = vsel %vm825_vm0, %v8331_v63, %v8353_v47  ;;  %v4725_v47 = vld [vmem:[%s7572_s24] sm:$0xff]  ;;  %vm4158_vm0 = vcmask 7168   ;;  %s7316_s24 = smov 95  }
 0x6eb   : > { %v4065_v11 = vsel %vm8954_vm5, %v4064_v54, %v8356_v44  ;;  %vm4151_vm5 = vcmask 793600  }
 0x6ee   : > { %v3998_v51 = vpop.permute.xlu1 %3997  ;;  %v3933_v18 = vpop.permute.xlu0 %3932 }
 0x6ef   : > { %v4007_v45 = vsel %vm3881_vm1, %v4006_v42, %v3998_v51 }
 0x6f3   : > { %v4023_v53 = vpop.permute.xlu1 %4022 }
 0x6f4   : > { %v4036_v29 = vsel %vm3877_vm11, %v4035_v32, %v4023_v53  ;;  %v3936_v53 = vpop.permute.xlu0 %3935  ;;  %v3788_v32 = vadd.s32 256, %v7632_v60 }
 0x6f5   : > { %v4037_v30 = vsel %vm3879_vm13, %v4036_v29, %v4026_v62 }
 0x6f6   : > { %v4038_v20 = vsel %vm3881_vm1, %v4037_v30, %v4029_v10  ;;  %v3793_v30 = vand.u32 15, %v7632_v60  ;;  %v3807_v8 = vand.u32 15, %v3788_v32 }
 0x6f8   : > { %v8361_v39 = vpop.permute.xlu1 %4078  ;;  %v3939_v62 = vpop.permute.xlu0 %3938 }
 0x6fd   : > { %v3870_v61 = vpop.permute.xlu1 %3869 }
 0x6fe   : > { %v3882_v22 = vsel %vm3881_vm1, %v3880_v15, %v3870_v61 }
 0x6ff   : > { %v3884_v26 = vsel %vm3883_vm2, %v3882_v22, %v3873_v21  ;;  %v4096_v22 = vsel %vm8956_vm8, %v4095_v3, %v8361_v39  ;;  %vm4154_vm8 = vcmask 924672  }
 0x700   : > { %4103 = vrot.lane.b32.xlu1 %v3884_v26, %s7232_s27 }
 0x702   : > { %v3924_v57 = vpop.permute.xlu1 %3923 }
 0x703   : > { %v3941_v40 = vsel %vm8952_vm12, %v3940_v41, %v3924_v57  ;;  %vm8957_vm12 = vmmov %vm8955_vm6 }
 0x704   : > { %4105 = vrot.lane.b32.xlu1 %v3884_v26, %s7254_s6 }
 0x707   : > { %v4001_v19 = vpop.permute.xlu1 %4000 }
 0x708   : > { %v4008_v14 = vsel %vm3883_vm2, %v4007_v45, %v4001_v19  ;;  %v6273_v45 = vcombine.low %v4725_v47, %v4725_v47  ;;  %v6274_v19 = vcombine.high %v4725_v47, %v4725_v47 }
 0x709   : > { %4123 = vrot.lane.b32.xlu0 %v4008_v14, %s7232_s27 }
 0x70c   : > { %v4051_v17 = vpop.permute.xlu1 %4050 }
 0x70d   : > { %4125 = vrot.lane.b32.xlu0 %v4008_v14, %s7254_s6  ;;  %v4066_v50 = vsel %vm8955_vm6, %v4065_v11, %v4051_v17  ;;  %s7314_s6 = smov 81   ;;  %vm3839_vm6 = vcmp.ne.s32.totalorder %v3807_v8, 1 }
 0x711   : > { %v4082_v7 = vpop.permute.xlu1 %4081 }
 0x712   : > { %v4097_v23 = vsel %vm8957_vm12, %v4096_v22, %v4082_v7  ;;  %vm3827_vm12 = vcmp.ne.s32.totalorder %v3807_v8, 0  ;;  %v4191_v22 = vld [vmem:[%s8959_s21] sm:$0xf] }
 0x716   : > { %v3902_v28 = vpop.permute.xlu1 %3901 }
 0x717   : > { %v3913_v25 = vsel %vm3879_vm13, %v3912_v46, %v3902_v28 }
 0x718   : > { %v3914_v51 = vsel %vm3881_vm1, %v3913_v25, %v3905_v34 }
 0x71b   : > { %v3927_v59 = vpop.permute.xlu1 %3926 }
 0x71c   : > { %v3942_v43 = vsel %vm8953_vm14, %v3941_v40, %v3927_v59  ;;  %vm4177_vm14 = vcmask 392192  }
 0x720   : > { %v4054_v52 = vpop.permute.xlu1 %4053 }
 0x721   : > { %v4067_v61 = vsel %vm3877_vm11, %v4066_v50, %v4054_v52 }
 0x722   : > { %v4068_v21 = vsel %vm3879_vm13, %v4067_v61, %v4057_v5 }
 0x725   : > { %v4085_v4 = vpop.permute.xlu1 %4084 }
 0x726   : > { %v4098_v27 = vsel %vm3877_vm11, %v4097_v23, %v4085_v4  ;;  %v8447_v4 = vadd.s32 128, %v7632_v60 }
 0x72a   : > { %v3930_v55 = vpop.permute.xlu1 %3929 }
 0x72b   : > { %v3943_v31 = vsel %vm3877_vm11, %v3942_v43, %v3930_v55  ;;  %v3800_v55 = vand.u32 15, %v8447_v4 }
 0x72c   : > { %v3944_v56 = vsel %vm3879_vm13, %v3943_v31, %v3933_v18 }
 0x72d   : > { %v3945_v48 = vsel %vm3881_vm1, %v3944_v56, %v3936_v53 }
 0x72e   : > { %v3946_v2 = vsel %vm3883_vm2, %v3945_v48, %v3939_v62 }
 0x72f   : > { %v4032_v35 = vpop.permute.xlu1 %4031 }
 0x730   : > { %v4039_v38 = vsel %vm3883_vm2, %v4038_v20, %v4032_v35 }
 0x731   : > { %4128 = vrot.lane.b32.xlu0 %v4039_v38, %s7257_s18 }
 0x734   : > { %v4088_v9 = vpop.permute.xlu1 %4087 }
 0x735   : > { %4130 = vrot.lane.b32.xlu0 %v4039_v38, %s7259_s29  ;;  %v4099_v24 = vsel %vm3879_vm13, %v4098_v27, %v4088_v9  ;;  %vm3826_vm13 = vcmp.ne.s32.totalorder %v3800_v55, 0 }
 0x736   : > { %v6251_v46 = vsel %vm3826_vm13, 1.0, %v7233_v6  ;;  %vm4428_vm13 = vcmask 908288  }
 0x739   : > { %v3908_v33 = vpop.permute.xlu1 %3907 }
 0x73a   : > { %v3915_v36 = vsel %vm3883_vm2, %v3914_v51, %v3908_v33  ;;  %v6255_v33 = vsel %vm3839_vm6, 1.0, %v7233_v6  ;;  %vm4546_vm6 = vcmask 785408  }
 0x73b   : > { %4108 = vrot.lane.b32.xlu1 %v3915_v36, %s7257_s18  ;;  %s7315_s18 = smov 97   ;;  %v8474_v11 = vpack.c.bf16 %v6255_v33, %v6255_v33  ;;  %v6259_v33 = vld [vmem:[%s8959_s21 + $0x8] sm:$0xf] }
 0x73e   : > { %v4060_v58 = vpop.permute.xlu1 %4059 }
 0x73f   : > { %4110 = vrot.lane.b32.xlu1 %v3915_v36, %s7259_s29  ;;  %v4069_v49 = vsel %vm3881_vm1, %v4068_v21, %v4060_v58  ;;  %v8468_v36 = vpack.c.bf16 %v6251_v46, %v6251_v46  ;;  %s8958_s29 = smov 126  }
 0x743   : > { %v4091_v15 = vpop.permute.xlu1 %4090  ;;  %4113 = vrot.lane.b32.xlu1 %v3946_v2, %s7314_s6 }
 0x744   : > { %v4100_v57 = vsel %vm3881_vm1, %v4099_v24, %v4091_v15  ;;  %vm4148_vm1 = vcmask 662528   ;;  %v6252_v15 = vsel %vm3827_vm12, 1.0, %v7233_v6 }
 0x747   : > { %4115 = vrot.lane.b32.xlu1 %v3946_v2, %s7315_s18 }
 0x748   : > { %v4063_v44 = vpop.permute.xlu1 %4062 }
 0x749   : > { %v4070_v26 = vsel %vm3883_vm2, %v4069_v49, %v4063_v44  ;;  %v8483_v49 = vpack.c.bf16 %v6252_v15, %v6252_v15  ;;  %v6263_v15 = vld [vmem:[%s8959_s21 + $0x10] sm:$0xf] }
 0x74a   : > { %4133 = vrot.lane.b32.xlu0 %v4070_v26, %s7314_s6  ;;  %s8962_s6 = sld [smem:[#allocation24_spill]] }
 0x74d   : > { %v4094_v16 = vpop.permute.xlu1 %4093 }
 0x74e   : > { %v4101_v63 = vsel %vm3883_vm2, %v4100_v57, %v4094_v16  ;;  %4135 = vrot.lane.b32.xlu0 %v4070_v26, %s7315_s18  ;;  %vm3825_vm2 = vcmp.ne.s32.totalorder %v3793_v30, 0 }
 0x74f   : > { %v4176_v42 = vsel %vm3273_vm4, %v4101_v63, 0  ;;  %v6250_v40 = vsel %vm3825_vm2, 1.0, %v7233_v6  ;;  %vm4487_vm2 = vcmask 900096  }
 0x750   : > { %v4178_v39 = vsel %vm4177_vm14, %v4176_v42, 0  ;;  %v8471_v58 = vpack.c.bf16 %v6250_v40, %v6250_v40  ;;  %vm4203_vm14 = vcmask 1039360  }
 0x751   : > { %4180 = vrot.lane.b32.xlu1 %v4178_v39, %s7313_s17  ;;  %v4119_v14 = vpop.permute.xlu1 %4118  ;;  %s8960_s17 = sld [smem:[#allocation23_spill]] }
 0x752   : > { %4138 = vrot.lane.b32.xlu0 %v4101_v63, %s7312_s4 }
 0x755   : > { %4731 = vrot.lane.b32.xlu1 %v6273_v45, %s7232_s27  ;;  %v4121_v17 = vpop.permute.xlu1 %4120 }
 0x756   : > { %4733 = vrot.lane.b32.xlu0 %v6274_v19, %s7232_s27  ;;  %v4160_v38 = vsel %vm4158_vm0, %v4119_v14, %v4121_v17 }
 0x772   : > { %v4104_v7 = vpop.permute.xlu1 %4103 }
 0x773   : > { %v4141_v5 = vsel %vm982_vm7, 0, %v4104_v7 }
 0x776   : > { %v4106_v59 = vpop.permute.xlu1 %4105 }
 0x777   : > { %v4143_v20 = vsel %vm2636_vm15, %v4141_v5, %v4106_v59 }
 0x77b   : > { %v4124_v28 = vpop.permute.xlu0 %4123 }
 0x77c   : > { %v4162_v60 = vsel %vm982_vm7, %v4160_v38, %v4124_v28 }
 0x77f   : > { %v4126_v10 = vpop.permute.xlu0 %4125 }
 0x780   : > { %v4164_v18 = vsel %vm2636_vm15, %v4162_v60, %v4126_v10  ;;  %vm3837_vm15 = vcmp.ne.s32.totalorder %v3793_v30, 1  ;;  %v5304_v10 = vld [vmem:[%s8961_s19] sm:$0xff] }
 0x781   : > { %v6253_v26 = vsel %vm3837_vm15, 1.0, %v7233_v6 }
 0x782   : > { %v8500_v23 = vpack.c.bf16 %v6253_v26, %v6253_v26  ;;  %v6265_v26 = vld [vmem:[%s8959_s21 + $0x14] sm:$0xf] }
 0x7a3   : > { %v4129_v13 = vpop.permute.xlu0 %4128 }
 0x7a4   : > { %v4166_v43 = vsel %vm2646_vm3, %v4164_v18, %v4129_v13 }
 0x7a7   : > { %v4131_v34 = vpop.permute.xlu0 %4130 }
 0x7a8   : > { %v4168_v51 = vsel %vm2656_vm9, %v4166_v43, %v4131_v34 }
 0x7ad   : > { %v4109_v52 = vpop.permute.xlu1 %4108 }
 0x7ae   : > { %v4145_v37 = vsel %vm2646_vm3, %v4143_v20, %v4109_v52  ;;  %v4715_v52 = vld [vmem:[%s8960_s17] sm:$0xff]  ;;  %s8963_s17 = sld [smem:[#allocation27_spill]] }
 0x7b1   : > { %v4111_v12 = vpop.permute.xlu1 %4110 }
 0x7b2   : > { %v4147_v9 = vsel %vm2656_vm9, %v4145_v37, %v4111_v12  ;;  %vm3838_vm9 = vcmp.ne.s32.totalorder %v3800_v55, 1 }
 0x7b3   : > { %v6254_v24 = vsel %vm3838_vm9, 1.0, %v7233_v6 }
 0x7b4   : > { %v8510_v57 = vpack.c.bf16 %v6254_v24, %v6254_v24 }
 0x7b5   : > { %v4114_v29 = vpop.permute.xlu1 %4113 }
 0x7b6   : > { %v4150_v41 = vsel %vm4148_vm1, %v4147_v9, %v4114_v29 }
 0x7b9   : > { %v4116_v0 = vpop.permute.xlu1 %4115 }
 0x7ba   : > { %v4153_v31 = vsel %vm4151_vm5, %v4150_v41, %v4116_v0  ;;  %v6256_v0 = vld [vmem:[%s8959_s21 + $0x4] sm:$0xf] }
 0x7bb   : > { %v4156_v54 = vsel %vm4154_vm8, %v4153_v31, %v4119_v14 }
 0x7bc   : > { %v4134_v35 = vpop.permute.xlu0 %4133  ;;  %v4185_v21 = vmul.bf16 %v4156_v54, %v8471_v58  ;;  %v4188_v27 = vmul.bf16 %v4156_v54, %v8500_v23 }
 0x7bd   : > { %v4170_v53 = vsel %vm4148_vm1, %v4168_v51, %v4134_v35  ;;  %vm4369_vm1 = vcmask 916480  }
 0x7c0   : > { %v4136_v25 = vpop.permute.xlu0 %4135 }
 0x7c1   : > { %v4172_v48 = vsel %vm4151_vm5, %v4170_v53, %v4136_v25  ;;  %vm4605_vm5 = vcmask 777216  }
 0x7c3   : > { %v4181_v56 = vpop.permute.xlu1 %4180 }
 0x7c4   : > { %v4139_v62 = vpop.permute.xlu0 %4138 }
 0x7c5   : > { %v4174_v2 = vsel %vm4154_vm8, %v4172_v48, %v4139_v62  ;;  %v4183_v50 = vsel %vm4158_vm0, %v4139_v62, %v4181_v56  ;;  %vm4307_vm0 = vcmask 1031168   ;;  %v6261_v62 = vld [vmem:[%s8959_s21 + $0xc] sm:$0xf]  ;;  %vm4664_vm8 = vcmask 769024  }
 0x7c6   : > { %4426 = vrot.lane.b32.xlu0 %v4183_v50, %s7262_s26  ;;  %4201 = vrot.lane.b32.xlu1 %v4183_v50, %s7234_s1  ;;  %v4186_v61 = vmul.bf16 %v4174_v2, %v8468_v36  ;;  %v4190_v3 = vmul.bf16 %v4183_v50, %v8474_v11  ;;  %v4187_v44 = vmul.bf16 %v4183_v50, %v8483_v49 }
 0x7c7   : > { %v4189_v16 = vmul.bf16 %v4174_v2, %v8510_v57  ;;  %v4732_v63 = vpop.permute.xlu1 %4731 }
 0x7c8   : > { %4269 = vmatprep.subr.bf16.mxu1 %v4186_v61  ;;  %v4734_v47 = vpop.permute.xlu0 %4733  ;;  %v4739_v42 = vsel %vm982_vm7, 0, %v4732_v63 }
 0x7c9   : > { %4270 = vmatpush1.bf16.msra.mxu1 %v4185_v21  ;;  %v4736_v6 = vsel %vm982_vm7, %v4732_v63, %v4734_v47  ;;  %v4748_v39 = vmul.bf16 %v4739_v42, %v8500_v23  ;;  %v4742_v45 = vsel %vm982_vm7, %v4734_v47, 0  ;;  %v8537_v7 = vmul.bf16 %v4739_v42, %v8471_v58 }
 0x7ca   : > { %4603 = vrot.lane.b32.xlu1 %v4183_v50, %s7316_s24  ;;  %4305 = vrot.lane.b32.xlu0 %v4190_v3, %s8958_s29  ;;  %v4743_v19 = vsel %vm2646_vm3, %v4742_v45, 0  ;;  %v4749_v17 = vmul.bf16 %v4736_v6, %v8510_v57  ;;  %v8540_v28 = vmul.bf16 %v4736_v6, %v8468_v36 }
 0x7cb   : > { %v4750_v14 = vmul.bf16 %v4743_v19, %v8474_v11  ;;  %v4747_v59 = vmul.bf16 %v4743_v19, %v8483_v49 }
 0x7cc   : > { %6258 = vmatmul.mubr.msk.bf16.vlgmr.msra.gmra.mxu1 %vm3273_vm4, %v4191_v22 }
 0x7cd   : > { %4409 = vmatprep.mubr.bf16.mxu1 %v7225_v1 }
 0x7ce   : > { %4544 = vrot.lane.b32.xlu0 %v4187_v44, %s7317_s23  ;;  %4367 = vrot.lane.b32.xlu1 %v4187_v44, %s7261_s2 }
 0x7d2   : > { %4197 = vrot.lane.b32.xlu0 %v4156_v54, %s7234_s1  ;;  %4485 = vrot.lane.b32.xlu1 %v4190_v3, %s7263_s5 }
 0x7d6   : > { %4599 = vrot.lane.b32.xlu0 %v4156_v54, %s7316_s24  ;;  %4422 = vrot.lane.b32.xlu1 %v4156_v54, %s7262_s26 }
 0x7da   : > { %4424 = vrot.lane.b32.xlu1 %v4174_v2, %s7262_s26  ;;  %4199 = vrot.lane.b32.xlu0 %v4174_v2, %s7234_s1 }
 0x7de   : > { %4301 = vrot.lane.b32.xlu1 %v4188_v27, %s8958_s29  ;;  %4601 = vrot.lane.b32.xlu0 %v4174_v2, %s7316_s24 }
 0x7e2   : > { %4540 = vrot.lane.b32.xlu1 %v4185_v21, %s7317_s23  ;;  %4363 = vrot.lane.b32.xlu0 %v4185_v21, %s7261_s2 }
 0x7e6   : > { %4481 = vrot.lane.b32.xlu0 %v4188_v27, %s7263_s5  ;;  %4303 = vrot.lane.b32.xlu1 %v4189_v16, %s8958_s29 }
 0x7ea   : > { %4658 = vrot.lane.b32.xlu1 %v4188_v27, %s7318_s22  ;;  %4365 = vrot.lane.b32.xlu0 %v4186_v61, %s7261_s2 }
 0x7ee   : > { %4662 = vrot.lane.b32.xlu0 %v4190_v3, %s7318_s22  ;;  %4758 = vrot.lane.b32.xlu1 %v4736_v6, %s7234_s1 }
 0x7f2   : > { %4483 = vrot.lane.b32.xlu0 %v4189_v16, %s7263_s5  ;;  %4869 = vrot.lane.b32.xlu1 %v4748_v39, %s8958_s29 }
 0x7f6   : > { %4756 = vrot.lane.b32.xlu0 %v4739_v42, %s7234_s1  ;;  %4542 = vrot.lane.b32.xlu1 %v4186_v61, %s7317_s23 }
 0x7fa   : > { %4760 = vrot.lane.b32.xlu0 %v4743_v19, %s7234_s1  ;;  %4873 = vrot.lane.b32.xlu1 %v4750_v14, %s8958_s29 }
 0x7fe   : > { %4660 = vrot.lane.b32.xlu1 %v4189_v16, %s7318_s22  ;;  %4871 = vrot.lane.b32.xlu0 %v4749_v17, %s8958_s29 }
 0x802   : > { %4934 = vrot.lane.b32.xlu0 %v8537_v7, %s7261_s2  ;;  %4936 = vrot.lane.b32.xlu1 %v8540_v28, %s7261_s2 }
 0x806   : > { %4938 = vrot.lane.b32.xlu0 %v4747_v59, %s7261_s2  ;;  %4996 = vrot.lane.b32.xlu1 %v4739_v42, %s7262_s26 }
 0x80a   : > { %4998 = vrot.lane.b32.xlu0 %v4736_v6, %s7262_s26  ;;  %5000 = vrot.lane.b32.xlu1 %v4743_v19, %s7262_s26 }
 0x80e   : > { %5058 = vrot.lane.b32.xlu0 %v4748_v39, %s7263_s5  ;;  %5060 = vrot.lane.b32.xlu1 %v4749_v17, %s7263_s5 }
 0x812   : > { %5062 = vrot.lane.b32.xlu0 %v4750_v14, %s7263_s5  ;;  %5120 = vrot.lane.b32.xlu1 %v8537_v7, %s7317_s23 }
 0x816   : > { %5122 = vrot.lane.b32.xlu0 %v8540_v28, %s7317_s23  ;;  %5124 = vrot.lane.b32.xlu1 %v4747_v59, %s7317_s23 }
 0x81a   : > { %5182 = vrot.lane.b32.xlu0 %v4739_v42, %s7316_s24  ;;  %5184 = vrot.lane.b32.xlu1 %v4736_v6, %s7316_s24  ;;  %v6267_v6 = vld [vmem:[%s8959_s21 + $0x18] sm:$0xf] }
 0x81e   : > { %5186 = vrot.lane.b32.xlu0 %v4743_v19, %s7316_s24  ;;  %5244 = vrot.lane.b32.xlu1 %v4748_v39, %s7318_s22 }
 0x822   : > { %5246 = vrot.lane.b32.xlu0 %v4749_v17, %s7318_s22  ;;  %5248 = vrot.lane.b32.xlu1 %v4750_v14, %s7318_s22  ;;  %v6269_v14 = vld [vmem:[%s8959_s21 + $0x1c] sm:$0xf] }
 0x826   : > { %4718 = vperm.xlu0 %7002, %v4715_v52   ;;  %5307 = vperm.xlu1 %7003, %v5304_v10  }
 0x838   : > { %v4202_v13 = vpop.permute.xlu1 %4201  ;;  %v4427_v12 = vpop.permute.xlu0 %4426 }
 0x83c   : > { %v4604_v4 = vpop.permute.xlu1 %4603  ;;  %v4306_v32 = vpop.permute.xlu0 %4305 }
 0x840   : > { %v4368_v34 = vpop.permute.xlu1 %4367  ;;  %v8571_v29 = vpop.permute.xlu0 %4544 }
 0x844   : > { %v4486_v55 = vpop.permute.xlu1 %4485  ;;  %v4198_v30 = vpop.permute.xlu0 %4197 }
 0x848   : > { %v4423_v8 = vpop.permute.xlu1 %4422  ;;  %v4600_v5 = vpop.permute.xlu0 %4599 }
 0x84c   : > { %v4425_v35 = vpop.permute.xlu1 %4424  ;;  %v4200_v20 = vpop.permute.xlu0 %4199 }
 0x84d   : > { %v4204_v38 = vsel %vm4203_vm14, %v4198_v30, %v4200_v20  ;;  %v4205_v37 = vsel %vm4203_vm14, %v4200_v20, %v4202_v13  ;;  %v4430_v31 = vsel %vm4428_vm13, %v4425_v35, %v4427_v12  ;;  %v4429_v48 = vsel %vm4428_vm13, %v4423_v8, %v4425_v35  ;;  %v6275_v30 = vld [vmem:[%s8962_s6 + $0x4] sm:$0xf]  ;;  %v4751_v20 = vld [vmem:[%s8962_s6] sm:$0xf] }
 0x84e   : > { %4225 = vmatprep.subr.bf16.mxu0 %v4205_v37 }
 0x84f   : > { %4226 = vmatpush1.bf16.msra.mxu0 %v4204_v38 }
 0x850   : > { %v4302_v60 = vpop.permute.xlu1 %4301  ;;  %v4602_v9 = vpop.permute.xlu0 %4601 }
 0x851   : > { %v4607_v22 = vsel %vm4605_vm5, %v4602_v9, %v4604_v4  ;;  %v4606_v47 = vsel %vm4605_vm5, %v4600_v5, %v4602_v9  ;;  %v6271_v4 = vld [vmem:[%s8959_s21 + $0x20] sm:$0xf] }
 0x852   : > { %6257 = vmatmul.mubr.msk.bf16.vlgmr.msra.gmra.mxu0 %vm3273_vm4, %v6256_v0 }
 0x853   : > { %4347 = vmatprep.mubr.bf16.mxu0 %v7225_v1 }
 0x854   : > { %v4541_v46 = vpop.permute.xlu1 %4540  ;;  %v4364_v18 = vpop.permute.xlu0 %4363 }
 0x858   : > { %v4304_v41 = vpop.permute.xlu1 %4303  ;;  %v4482_v25 = vpop.permute.xlu0 %4481 }
 0x859   : > { %v4308_v40 = vsel %vm4307_vm0, %v4302_v60, %v4304_v41  ;;  %v4309_v43 = vsel %vm4307_vm0, %v4304_v41, %v4306_v32 }
 0x85a   : > { %4329 = vmatprep.subr.bf16.mxu0 %v4309_v43  ;;  %v6283_v43 = vld [vmem:[%s8962_s6 + $0xc] sm:$0xf] }
 0x85b   : > { %4330 = vmatpush1.bf16.msra.mxu0 %v4308_v40 }
 0x85c   : > { %v4659_v51 = vpop.permute.xlu1 %4658  ;;  %4450 = vmatprep.subr.bf16.mxu0 %v4430_v31  ;;  %v4366_v53 = vpop.permute.xlu0 %4365 }
 0x85d   : > { %v4370_v56 = vsel %vm4369_vm1, %v4364_v18, %v4366_v53  ;;  %v4371_v54 = vsel %vm4369_vm1, %v4366_v53, %v4368_v34 }
 0x85e   : > { %6260 = vmatmul.mubr.msk.bf16.vlgmr.msra.gmra.mxu0 %vm3273_vm4, %v6259_v33  ;;  %4391 = vmatprep.subr.bf16.mxu1 %v4371_v54 }
 0x85f   : > { %4392 = vmatpush1.bf16.msra.mxu1 %v4370_v56  ;;  %4451 = vmatpush1.bf16.msra.mxu0 %v4429_v48  ;;  %v6286_v56 = vld [vmem:[%s8962_s6 + $0x10] sm:$0xf] }
 0x860   : > { %v4759_v2 = vpop.permute.xlu1 %4758  ;;  %v4663_v50 = vpop.permute.xlu0 %4662  ;;  %4468 = vmatprep.mubr.bf16.mxu0 %v7225_v1 }
 0x862   : > { %6262 = vmatmul.mubr.msk.bf16.vlgmr.msra.gmra.mxu1 %vm3273_vm4, %v6261_v62 }
 0x863   : > { %4527 = vmatprep.mubr.bf16.mxu1 %v7225_v1 }
 0x864   : > { %v4870_v61 = vpop.permute.xlu1 %4869  ;;  %v4484_v21 = vpop.permute.xlu0 %4483 }
 0x865   : > { %v4488_v3 = vsel %vm4487_vm2, %v4482_v25, %v4484_v21  ;;  %v4489_v44 = vsel %vm4487_vm2, %v4484_v21, %v4486_v55 }
 0x866   : > { %6264 = vmatmul.mubr.msk.bf16.vlgmr.msra.gmra.mxu0 %vm3273_vm4, %v6263_v15  ;;  %4509 = vmatprep.subr.bf16.mxu1 %v4489_v44  ;;  %v6289_v15 = vld [vmem:[%s8962_s6 + $0x14] sm:$0xf]  ;;  %v6292_v44 = vld [vmem:[%s8962_s6 + $0x18] sm:$0xf] }
 0x867   : > { %4510 = vmatpush1.bf16.msra.mxu1 %v4488_v3  ;;  %4586 = vmatprep.mubr.bf16.mxu0 %v7225_v1 }
 0x868   : > { %v4543_v27 = vpop.permute.xlu1 %4542  ;;  %4627 = vmatprep.subr.bf16.mxu1 %v4607_v22  ;;  %v4757_v24 = vpop.permute.xlu0 %4756 }
 0x869   : > { %v4547_v16 = vsel %vm4546_vm6, %v4541_v46, %v4543_v27  ;;  %v4548_v63 = vsel %vm4546_vm6, %v4543_v27, %v8571_v29  ;;  %v4762_v19 = vsel %vm4203_vm14, %v4757_v24, %v4759_v2  ;;  %v4818_v29 = vsel %vm1750_vm10, %v8537_v7, 0  ;;  %v6280_v46 = vld [vmem:[%s8962_s6 + $0x8] sm:$0xf] }
 0x86a   : > { %6266 = vmatmul.mubr.msk.bf16.vlgmr.msra.gmra.mxu1 %vm3273_vm4, %v6265_v26  ;;  %4568 = vmatprep.subr.bf16.mxu0 %v4548_v63  ;;  %v4768_v12 = vsel %vm1750_vm10, %v4762_v19, 0  ;;  %v6298_v19 = vld [vmem:[%s8962_s6 + $0x20] sm:$0xf] }
 0x86b   : > { %4569 = vmatpush1.bf16.msra.mxu0 %v4547_v16  ;;  %4628 = vmatpush1.bf16.msra.mxu1 %v4606_v47  ;;  %v6295_v16 = vld [vmem:[%s8962_s6 + $0x1c] sm:$0xf] }
 0x86c   : > { %v4874_v42 = vpop.permute.xlu1 %4873  ;;  %v4761_v39 = vpop.permute.xlu0 %4760  ;;  %4645 = vmatprep.mubr.bf16.mxu1 %v7225_v1 }
 0x86d   : > { %v4763_v45 = vsel %vm4203_vm14, %v4759_v2, %v4761_v39 }
 0x86e   : > { %6268 = vmatmul.mubr.msk.bf16.vlgmr.msra.gmra.mxu0 %vm3273_vm4, %v6267_v6  ;;  %6276 = vmatprep.subr.msk.bf16.mxu1 %vm1750_vm10, %v4763_v45 }
 0x86f   : > { %4704 = vmatprep.mubr.bf16.mxu0 %v7225_v1 }
 0x870   : > { %v4661_v17 = vpop.permute.xlu1 %4660  ;;  %v4872_v59 = vpop.permute.xlu0 %4871 }
 0x871   : > { %v4665_v52 = vsel %vm4664_vm8, %v4659_v51, %v4661_v17  ;;  %v4876_v10 = vsel %vm4307_vm0, %v4872_v59, %v4874_v42  ;;  %v4666_v13 = vsel %vm4664_vm8, %v4661_v17, %v4663_v50  ;;  %v4875_v55 = vsel %vm4307_vm0, %v4870_v61, %v4872_v59 }
 0x872   : > { %6270 = vmatmul.mubr.msk.bf16.vlgmr.msra.gmra.mxu1 %vm3273_vm4, %v6269_v14  ;;  %4686 = vmatprep.subr.bf16.mxu0 %v4666_v13  ;;  %v4881_v35 = vsel %vm1750_vm10, %v4875_v55, 0 }
 0x873   : > { %4788 = vmatpush1.bf16.msra.mxu1 %v4768_v12  ;;  %4687 = vmatpush1.bf16.msra.mxu0 %v4665_v52 }
 0x874   : > { %6281 = vmatprep.subr.msk.bf16.mxu1 %vm1750_vm10, %v4876_v10  ;;  %v4937_v32 = vpop.permute.xlu1 %4936  ;;  %6278 = vmatprep.subr.msk.bf16.mxu0 %vm1750_vm10, %v8540_v28  ;;  %v4935_v34 = vpop.permute.xlu0 %4934 }
 0x875   : > { %4805 = vmatprep.mubr.bf16.mxu1 %v7225_v1  ;;  %v4940_v7 = vsel %vm4369_vm1, %v4935_v34, %v4937_v32 }
 0x876   : > { %6272 = vmatmul.mubr.msk.bf16.vlgmr.msra.gmra.mxu0 %vm3273_vm4, %v6271_v4  ;;  %v4946_v60 = vsel %vm1750_vm10, %v4940_v7, 0 }
 0x877   : > { %4838 = vmatpush1.bf16.msra.mxu0 %v4818_v29  ;;  %4855 = vmatprep.mubr.bf16.mxu0 %v7225_v1 }
 0x878   : > { %v4997_v8 = vpop.permute.xlu1 %4996  ;;  %v4939_v5 = vpop.permute.xlu0 %4938 }
 0x879   : > { %v4941_v28 = vsel %vm4369_vm1, %v4937_v32, %v4939_v5 }
 0x87a   : > { %6277 = vmatmul.mubr.msk.bf16.vlgmr.msra.gmra.mxu1 %vm3877_vm11, %v6275_v30  ;;  %6284 = vmatprep.subr.msk.bf16.mxu0 %vm1750_vm10, %v4941_v28 }
 0x87b   : > { %4901 = vmatpush1.bf16.msra.mxu1 %v4881_v35  ;;  %4918 = vmatprep.mubr.bf16.mxu1 %v7225_v1 }
 0x87c   : > { %v5001_v38 = vpop.permute.xlu1 %5000  ;;  %v4999_v37 = vpop.permute.xlu0 %4998 }
 0x87d   : > { %v5003_v0 = vsel %vm4428_vm13, %v4999_v37, %v5001_v38  ;;  %v5002_v9 = vsel %vm4428_vm13, %v4997_v8, %v4999_v37 }
 0x87e   : > { %6279 = vmatmul.mubr.msk.bf16.vlgmr.msra.gmra.mxu0 %vm3877_vm11, %v4751_v20  ;;  %6287 = vmatprep.subr.msk.bf16.mxu1 %vm1750_vm10, %v5003_v0  ;;  %v5008_v25 = vsel %vm1750_vm10, %v5002_v9, 0 }
 0x87f   : > { %4966 = vmatpush1.bf16.msra.mxu0 %v4946_v60  ;;  %4983 = vmatprep.mubr.bf16.mxu0 %v7225_v1 }
 0x880   : > { %v5061_v18 = vpop.permute.xlu1 %5060  ;;  %v5059_v41 = vpop.permute.xlu0 %5058 }
 0x881   : > { %v5064_v40 = vsel %vm4487_vm2, %v5059_v41, %v5061_v18 }
 0x882   : > { %6282 = vmatmul.mubr.msk.bf16.vlgmr.msra.gmra.mxu1 %vm3877_vm11, %v6280_v46  ;;  %v5070_v53 = vsel %vm1750_vm10, %v5064_v40, 0 }
 0x883   : > { %5028 = vmatpush1.bf16.msra.mxu1 %v5008_v25  ;;  %5045 = vmatprep.mubr.bf16.mxu1 %v7225_v1 }
 0x884   : > { %v5121_v31 = vpop.permute.xlu1 %5120  ;;  %v5063_v33 = vpop.permute.xlu0 %5062 }
 0x885   : > { %v5065_v51 = vsel %vm4487_vm2, %v5061_v18, %v5063_v33 }
 0x886   : > { %6285 = vmatmul.mubr.msk.bf16.vlgmr.msra.gmra.mxu0 %vm3877_vm11, %v6283_v43  ;;  %6290 = vmatprep.subr.msk.bf16.mxu0 %vm1750_vm10, %v5065_v51 }
 0x887   : > { %5090 = vmatpush1.bf16.msra.mxu0 %v5070_v53  ;;  %5107 = vmatprep.mubr.bf16.mxu0 %v7225_v1 }
 0x888   : > { %v5125_v54 = vpop.permute.xlu1 %5124  ;;  %v5123_v48 = vpop.permute.xlu0 %5122 }
 0x889   : > { %v5126_v62 = vsel %vm4546_vm6, %v5121_v31, %v5123_v48  ;;  %v5127_v2 = vsel %vm4546_vm6, %v5123_v48, %v5125_v54 }
 0x88a   : > { %v5132_v50 = vsel %vm1750_vm10, %v5126_v62, 0  ;;  %6288 = vmatmul.mubr.msk.bf16.vlgmr.msra.gmra.mxu1 %vm3877_vm11, %v6286_v56  ;;  %6293 = vmatprep.subr.msk.bf16.mxu1 %vm1750_vm10, %v5127_v2 }
 0x88b   : > { %5152 = vmatpush1.bf16.msra.mxu1 %v5132_v50  ;;  %5169 = vmatprep.mubr.bf16.mxu1 %v7225_v1 }
 0x88c   : > { %v5185_v61 = vpop.permute.xlu1 %5184  ;;  %v5183_v21 = vpop.permute.xlu0 %5182 }
 0x88d   : > { %v5188_v3 = vsel %vm4605_vm5, %v5183_v21, %v5185_v61  ;;  %v4289_v39 = vpop.f32.mrf.mxu1 }
 0x88e   : > { %6291 = vmatmul.mubr.msk.bf16.vlgmr.msra.gmra.mxu0 %vm3877_vm11, %v6289_v15  ;;  %v5194_v24 = vsel %vm1750_vm10, %v5188_v3, 0 }
 0x88f   : > { %5231 = vmatprep.mubr.bf16.mxu0 %v7225_v1  ;;  %v4291_v14 = vpop.f32.mrf.mxu1 }
 0x890   : > { %v5245_v22 = vpop.permute.xlu1 %5244  ;;  %v5187_v26 = vpop.permute.xlu0 %5186 }
 0x891   : > { %v5189_v27 = vsel %vm4605_vm5, %v5185_v61, %v5187_v26  ;;  %v4293_v17 = vpop.f32.mrf.mxu1 }
 0x892   : > { %6294 = vmatmul.mubr.msk.bf16.vlgmr.msra.gmra.mxu1 %vm3877_vm11, %v6292_v44  ;;  %6296 = vmatprep.subr.msk.bf16.mxu0 %vm1750_vm10, %v5189_v27 }
 0x893   : > { %5214 = vmatpush1.bf16.msra.mxu0 %v5194_v24  ;;  %5293 = vmatprep.mubr.bf16.mxu1 %v7225_v1  ;;  %v4294_v59 = vpop.f32.mrf.mxu1 }
 0x894   : > { %v5249_v63 = vpop.permute.xlu1 %5248  ;;  %v5247_v47 = vpop.permute.xlu0 %5246 }
 0x895   : > { %v5250_v6 = vsel %vm4664_vm8, %v5245_v22, %v5247_v47  ;;  %v5251_v42 = vsel %vm4664_vm8, %v5247_v47, %v5249_v63 }
 0x896   : > { %v5256_v45 = vsel %vm1750_vm10, %v5250_v6, 0  ;;  %6297 = vmatmul.mubr.msk.bf16.vlgmr.msra.gmra.mxu0 %vm3877_vm11, %v6295_v16  ;;  %6299 = vmatprep.subr.msk.bf16.mxu1 %vm1750_vm10, %v5251_v42 }
 0x897   : > { %5276 = vmatpush1.bf16.msra.mxu1 %v5256_v45  ;;  %5393 = vmatprep.mubr.bf16.mxu0 %v7225_v1 }
 0x89a   : > { %6300 = vmatmul.mubr.msk.bf16.vlgmr.msra.gmra.mxu1 %vm3877_vm11, %v6298_v19 }
 0x89b   : > { %5443 = vmatprep.mubr.bf16.mxu1 %v7225_v1 }
 0x912   : > { %v4245_v52 = vpop.f32.mrf.mxu0 }
 0x913   : > { %v4290_v16 = vadd.f32 %v4289_v39, %v4245_v52 }
 0x914   : > { %v4247_v10 = vpop.f32.mrf.mxu0 }
 0x915   : > { %v4292_v6 = vadd.f32 %v4291_v14, %v4247_v10 }
 0x916   : > { %v4249_v13 = vpop.f32.mrf.mxu0 }
 0x918   : > { %v4250_v12 = vpop.f32.mrf.mxu0 }
 0x91e   : > { %v4349_v4 = vpop.f32.mrf.mxu0 }
 0x91f   : > { %v4356_v42 = vadd.f32 %v4349_v4, %v4290_v16 }
 0x920   : > { %v4351_v32 = vpop.f32.mrf.mxu0 }
 0x921   : > { %v4357_v17 = vadd.f32 %v4351_v32, %v4292_v6 }
 0x922   : > { %v4353_v34 = vpop.f32.mrf.mxu0  ;;  %v4411_v29 = vpop.f32.mrf.mxu1 }
 0x923   : > { %v4418_v59 = vadd.f32 %v4411_v29, %v4356_v42 }
 0x924   : > { %v4354_v55 = vpop.f32.mrf.mxu0  ;;  %v4413_v30 = vpop.f32.mrf.mxu1 }
 0x925   : > { %v4419_v55 = vadd.f32 %v4413_v30, %v4357_v17 }
 0x926   : > { %v4415_v8 = vpop.f32.mrf.mxu1  ;;  %v4470_v5 = vpop.f32.mrf.mxu0 }
 0x927   : > { %v4477_v8 = vadd.f32 %v4470_v5, %v4418_v59 }
 0x928   : > { %v4416_v28 = vpop.f32.mrf.mxu1  ;;  %v4472_v35 = vpop.f32.mrf.mxu0 }
 0x92a   : > { %v4474_v7 = vpop.f32.mrf.mxu0  ;;  %v4529_v20 = vpop.f32.mrf.mxu1 }
 0x92c   : > { %v4475_v38 = vpop.f32.mrf.mxu0  ;;  %v4531_v37 = vpop.f32.mrf.mxu1 }
 0x92e   : > { %v4533_v0 = vpop.f32.mrf.mxu1  ;;  %v4588_v60 = vpop.f32.mrf.mxu0 }
 0x930   : > { %v4534_v9 = vpop.f32.mrf.mxu1  ;;  %v4590_v46 = vpop.f32.mrf.mxu0 }
 0x931   : > { %v4478_v9 = vadd.f32 %v4472_v35, %v4419_v55  ;;  %v4719_v35 = vpop.permute.xlu0 %4718 }
 0x932   : > { %v4592_v18 = vpop.f32.mrf.mxu0  ;;  %v4647_v41 = vpop.f32.mrf.mxu1 }
 0x933   : > { %v4536_v18 = vadd.f32 %v4529_v20, %v4477_v8  ;;  %v4537_v10 = vadd.f32 %v4531_v37, %v4478_v9 }
 0x934   : > { %v4593_v25 = vpop.f32.mrf.mxu0  ;;  %v4649_v40 = vpop.f32.mrf.mxu1 }
 0x935   : > { %v4595_v4 = vadd.f32 %v4588_v60, %v4536_v18  ;;  %v5339_v18 = vld [vmem:[%s8963_s17] sm:$0xf] }
 0x936   : > { %v4651_v43 = vpop.f32.mrf.mxu1  ;;  %v4706_v31 = vpop.f32.mrf.mxu0 }
 0x938   : > { %v4652_v33 = vpop.f32.mrf.mxu1  ;;  %v4708_v51 = vpop.f32.mrf.mxu0 }
 0x93a   : > { %v4710_v53 = vpop.f32.mrf.mxu0  ;;  %v4807_v56 = vpop.f32.mrf.mxu1 }
 0x93b   : > { %v4596_v53 = vadd.f32 %v4590_v46, %v4537_v10 }
 0x93c   : > { %v4711_v54 = vpop.f32.mrf.mxu0  ;;  %v4809_v48 = vpop.f32.mrf.mxu1 }
 0x93e   : > { %v4811_v62 = vpop.f32.mrf.mxu1  ;;  %v4857_v2 = vpop.f32.mrf.mxu0 }
 0x93f   : > { %v4858_v13 = vadd.f32 %v4857_v2, %v4807_v56  ;;  %v4654_v56 = vadd.f32 %v4647_v41, %v4595_v4  ;;  %v4655_v62 = vadd.f32 %v4649_v40, %v4596_v53 }
 0x940   : > { %v4812_v50 = vpop.f32.mrf.mxu1  ;;  %v4859_v15 = vpop.f32.mrf.mxu0 }
 0x941   : > { %v4860_v28 = vadd.f32 %v4859_v15, %v4809_v48  ;;  %v4713_v2 = vadd.f32 %v4706_v31, %v4654_v56  ;;  %v6301_v56 = vld [vmem:[%s8963_s17 + $0x4] sm:$0xf] }
 0x942   : > { %v4861_v61 = vpop.f32.mrf.mxu0  ;;  %v4920_v21 = vpop.f32.mrf.mxu1 }
 0x943   : > { %v4927_v7 = vadd.f32 %v4920_v21, %v4858_v13  ;;  %v4714_v21 = vadd.f32 %v4708_v51, %v4655_v62 }
 0x944   : > { %v4862_v3 = vpop.f32.mrf.mxu0  ;;  %v4922_v44 = vpop.f32.mrf.mxu1 }
 0x945   : > { %v4928_v39 = vadd.f32 %v4922_v44, %v4860_v28  ;;  %v5308_v3 = vpop.permute.xlu1 %5307  ;;  %v4722_v16 = vadd.f32 %v4719_v35, %v4714_v21 }
 0x946   : > { %v4924_v22 = vpop.f32.mrf.mxu1  ;;  %v4985_v26 = vpop.f32.mrf.mxu0 }
 0x947   : > { %v4992_v52 = vadd.f32 %v4985_v26, %v4927_v7  ;;  %v4721_v26 = vadd.f32 %v4719_v35, %v4713_v2 }
 0x948   : > { %v4925_v27 = vpop.f32.mrf.mxu1  ;;  %v4987_v24 = vpop.f32.mrf.mxu0 }
 0x949   : > { %v4993_v43 = vadd.f32 %v4987_v24, %v4928_v39 }
 0x94a   : > { %v4989_v63 = vpop.f32.mrf.mxu0  ;;  %v5047_v47 = vpop.f32.mrf.mxu1 }
 0x94b   : > { %v5054_v32 = vadd.f32 %v5047_v47, %v4992_v52  ;;  %v4723_v47 = vmax.f32 %v4721_v26, 0.0 }
 0x94c   : > { %v4990_v45 = vpop.f32.mrf.mxu0  ;;  %v5049_v19 = vpop.f32.mrf.mxu1 }
 0x94d   : > { %v5055_v30 = vadd.f32 %v5049_v19, %v4993_v43  ;;  %v4724_v19 = vmax.f32 %v4722_v16, 0.0 }
 0x94e   : > { %v5051_v12 = vpop.f32.mrf.mxu1  ;;  %v5109_v34 = vpop.f32.mrf.mxu0 }
 0x94f   : > { %v5116_v5 = vadd.f32 %v5109_v34, %v5054_v32 }
 0x950   : > { %v5052_v38 = vpop.f32.mrf.mxu1  ;;  %v5111_v0 = vpop.f32.mrf.mxu0 }
 0x951   : > { %v5117_v20 = vadd.f32 %v5111_v0, %v5055_v30 }
 0x952   : > { %v5113_v25 = vpop.f32.mrf.mxu0  ;;  %v5171_v14 = vpop.f32.mrf.mxu1 }
 0x953   : > { %v5178_v50 = vadd.f32 %v5171_v14, %v5116_v5 }
 0x954   : > { %v5114_v29 = vpop.f32.mrf.mxu0  ;;  %v5173_v33 = vpop.f32.mrf.mxu1 }
 0x955   : > { %v5179_v37 = vadd.f32 %v5173_v33, %v5117_v20 }
 0x956   : > { %v5175_v54 = vpop.f32.mrf.mxu1  ;;  %v5233_v48 = vpop.f32.mrf.mxu0 }
 0x957   : > { %v5240_v60 = vadd.f32 %v5233_v48, %v5178_v50 }
 0x958   : > { %v5176_v15 = vpop.f32.mrf.mxu1  ;;  %v5235_v61 = vpop.f32.mrf.mxu0 }
 0x959   : > { %v5241_v46 = vadd.f32 %v5235_v61, %v5179_v37  ;;  %v6306_v61 = vld [vmem:[%s8963_s17 + $0x8] sm:$0xf] }
 0x95a   : > { %v5237_v44 = vpop.f32.mrf.mxu0  ;;  %v5295_v22 = vpop.f32.mrf.mxu1 }
 0x95b   : > { %v5302_v41 = vadd.f32 %v5295_v22, %v5240_v60  ;;  %v6309_v22 = vld [vmem:[%s8963_s17 + $0xc] sm:$0xf] }
 0x95c   : > { %v5238_v27 = vpop.f32.mrf.mxu0  ;;  %v5297_v24 = vpop.f32.mrf.mxu1 }
 0x95d   : > { %v5310_v63 = vadd.f32 %v5308_v3, %v5302_v41  ;;  %v5303_v40 = vadd.f32 %v5297_v24, %v5241_v46  ;;  %v6312_v27 = vld [vmem:[%s8963_s17 + $0x10] sm:$0xf] }
 0x95e   : > { %v5299_v31 = vpop.f32.mrf.mxu1 }
 0x95f   : > { %v5312_v6 = vmax.f32 %v5310_v63, 0.0  ;;  %v5311_v42 = vadd.f32 %v5308_v3, %v5303_v40 }
 0x960   : > { %v5300_v45 = vpop.f32.mrf.mxu1 }
 0x961   : > { %v5314_v51 = vadd.f32 %v5312_v6, %v4723_v47  ;;  %v5313_v17 = vmax.f32 %v5311_v42, 0.0  ;;  %v6315_v47 = vld [vmem:[%s8963_s17 + $0x14] sm:$0xf] }
 0x963   : > { %v5316_v59 = vpack.c.bf16 %v5314_v51, %v5314_v51  ;;  %v5315_v13 = vadd.f32 %v5313_v17, %v4724_v19  ;;  %v6318_v17 = vld [vmem:[%s8963_s17 + $0x18] sm:$0xf] }
 0x965   : > { %v5317_v12 = vpack.c.bf16 %v5315_v13, %v5315_v13  ;;  %5320 = vrot.lane.b32.xlu0 %v5316_v59, %s7232_s27 }
 0x967   : > { %5322 = vrot.lane.b32.xlu1 %v5317_v12, %s7232_s27  ;;  %s8966_s27 = sld [smem:[#allocation29_spill]] }
 0x96d   : > { %s8967_s4 = smov %s8966_s27 }
 0x9d7   : > { %v5321_v34 = vpop.permute.xlu0 %5320 }
 0x9d8   : > { %v5327_v55 = vsel %vm982_vm7, 0, %v5321_v34 }
 0x9d9   : > { %v5323_v8 = vpop.permute.xlu1 %5322  ;;  %5584 = vrot.lane.b32.xlu0 %v5327_v55, %s7262_s26  ;;  %5344 = vrot.lane.b32.xlu1 %v5327_v55, %s7234_s1  ;;  %v5333_v7 = vmul.bf16 %v5327_v55, %v8471_v58  ;;  %v5336_v9 = vmul.bf16 %v5327_v55, %v8500_v23 }
 0x9da   : > { %v5324_v28 = vsel %vm982_vm7, %v5321_v34, %v5323_v8  ;;  %v5330_v39 = vsel %vm982_vm7, %v5323_v8, 0 }
 0x9db   : > { %v5334_v38 = vmul.bf16 %v5324_v28, %v8468_v36  ;;  %v5406_v0 = vsel %vm1750_vm10, %v5333_v7, 0  ;;  %v5331_v36 = vsel %vm2646_vm3, %v5330_v39, 0  ;;  %v5337_v58 = vmul.bf16 %v5324_v28, %v8510_v57 }
 0x9dc   : > { %v5338_v23 = vmul.bf16 %v5331_v36, %v8474_v11  ;;  %v5335_v52 = vmul.bf16 %v5331_v36, %v8483_v49 }
 0x9dd   : > { %5522 = vrot.lane.b32.xlu1 %v5333_v7, %s7261_s2  ;;  %5346 = vrot.lane.b32.xlu0 %v5324_v28, %s7234_s1 }
 0x9de   : > { %6304 = vmatprep.subr.msk.bf16.mxu1 %vm1750_vm10, %v5334_v38 }
 0x9df   : > { %5426 = vmatpush1.bf16.msra.mxu1 %v5406_v0 }
 0x9e1   : > { %5586 = vrot.lane.b32.xlu1 %v5324_v28, %s7262_s26  ;;  %5457 = vrot.lane.b32.xlu0 %v5336_v9, %s8958_s29 }
 0x9e2   : > { %6305 = vmatmul.mubr.msk.bf16.vlgmr.msra.gmra.mxu1 %vm3877_vm11, %v5339_v18 }
 0x9e3   : > { %5571 = vmatprep.mubr.bf16.mxu1 %v7225_v1 }
 0x9e5   : > { %5348 = vrot.lane.b32.xlu1 %v5331_v36, %s7234_s1  ;;  %5588 = vrot.lane.b32.xlu0 %v5331_v36, %s7262_s26  ;;  %s8964_s26 = sld [smem:[#allocation28_spill]] }
 0x9e9   : > { %5646 = vrot.lane.b32.xlu1 %v5336_v9, %s7263_s5  ;;  %5524 = vrot.lane.b32.xlu0 %v5334_v38, %s7261_s2 }
 0x9eb   : > { %v5892_v11 = vld [vmem:[%s8964_s26] sm:$0xff] }
 0x9ed   : > { %5459 = vrot.lane.b32.xlu1 %v5337_v58, %s8958_s29  ;;  %5461 = vrot.lane.b32.xlu0 %v5338_v23, %s8958_s29  ;;  %s6059_s29 = sshll.u32 %s7568_s7, 4 }
 0x9ee   : > { %s675_s18 = scalar_lea.vmem [#allocation8], %s6059_s29 }
 0x9ef   : > { %s5919_s19 = sshll.u32 %s675_s18, 4  ;;  %s5920_s19 = int_to_ptr.vmem [resolvable:$true] %s5919_s19 }
 0x9f0   : > { %s7145_s26 = scalar_lea.vmem %s5920_s19, 256 }
 0x9f1   : > { %5526 = vrot.lane.b32.xlu1 %v5335_v52, %s7261_s2  ;;  %5648 = vrot.lane.b32.xlu0 %v5337_v58, %s7263_s5  ;;  %s5905_s2 = scalar_lea.sflag [#allocation4], %s7568_s7  ;;  %p7146_p9 = scmp.ne.s32.totalorder %s5920_s19, %s7145_s26 }
 0x9f5   : > { %5710 = vrot.lane.b32.xlu1 %v5334_v38, %s7317_s23  ;;  %5708 = vrot.lane.b32.xlu0 %v5333_v7, %s7317_s23 }
 0x9f9   : > { %5650 = vrot.lane.b32.xlu1 %v5338_v23, %s7263_s5  ;;  %5772 = vrot.lane.b32.xlu0 %v5324_v28, %s7316_s24 }
 0x9fd   : > { %5770 = vrot.lane.b32.xlu1 %v5327_v55, %s7316_s24  ;;  %5712 = vrot.lane.b32.xlu0 %v5335_v52, %s7317_s23  ;;  %v6321_v55 = vld [vmem:[%s8963_s17 + $0x1c] sm:$0xf]  ;;  %s8965_s23 = sld [smem:[#allocation18_spill]] }
 0xa01   : > { %5774 = vrot.lane.b32.xlu1 %v5331_v36, %s7316_s24  ;;  %5832 = vrot.lane.b32.xlu0 %v5336_v9, %s7318_s22  ;;  %v6324_v9 = vld [vmem:[%s8963_s17 + $0x20] sm:$0xf] }
 0xa03   : > { %p8968_p10 = scmp.ne.s32.totalorder %s8965_s23, 0 }
 0xa05   : > { %5834 = vrot.lane.b32.xlu1 %v5337_v58, %s7318_s22  ;;  %5836 = vrot.lane.b32.xlu0 %v5338_v23, %s7318_s22  ;;  %s6335_s22 = sshll.u32 %s7436_s0, 8  ;;  %p7147_p12 = pnand %p7146_p9, %p8968_p10 }
 0xa06   : > { %s5917_s1 = scalar_lea.hbm %s8966_s27, %s6335_s22  ;;  %s7319_s0 = smov [#allocation8]  }
 0xa07   : > { %p7148_p13 = pneg %p7147_p12  ;;  %s7149_s5 = sshll.u32 %s7319_s0, 4  ;;  %s7150_s5 = int_to_ptr.vmem [resolvable:$false] %s7149_s5 }
 0xa08   : > { %s7151_s24 = scalar_lea.vmem %s7150_s5, 512  ;;  %p7152_p0 = scmp.lt.s32.totalorder %s5920_s19, %s7150_s5 }
 0xa09   : > { %5895 = vperm.xlu1 %7003, %v5892_v11   ;;  %p7153_p5 = scmp.lt.s32.totalorder %s7151_s24, %s7145_s26 }
 0xa0b   : > { %p7154_p2 = por %p7153_p5, %p7152_p0 }
 0xa0d   : > { %p7155_p1 = pnand %p7154_p2, %p7148_p13 }
 0xa4b   : > { %v5585_v49 = vpop.permute.xlu0 %5584  ;;  %v5345_v57 = vpop.permute.xlu1 %5344 }
 0xa4f   : > { %v5523_v25 = vpop.permute.xlu1 %5522  ;;  %v5347_v14 = vpop.permute.xlu0 %5346 }
 0xa50   : > { %v5350_v43 = vsel %vm4203_vm14, %v5345_v57, %v5347_v14 }
 0xa51   : > { %v5356_v53 = vsel %vm1750_vm10, %v5350_v43, 0 }
 0xa53   : > { %v5587_v10 = vpop.permute.xlu1 %5586  ;;  %v5458_v4 = vpop.permute.xlu0 %5457 }
 0xa54   : > { %v5590_v20 = vsel %vm4428_vm13, %v5585_v49, %v5587_v10 }
 0xa55   : > { %v5596_v3 = vsel %vm1750_vm10, %v5590_v20, 0 }
 0xa57   : > { %v5349_v32 = vpop.permute.xlu1 %5348  ;;  %v5589_v29 = vpop.permute.xlu0 %5588 }
 0xa58   : > { %v5351_v33 = vsel %vm4203_vm14, %v5347_v14, %v5349_v32  ;;  %v5591_v50 = vsel %vm4428_vm13, %v5587_v10, %v5589_v29 }
 0xa59   : > { %6302 = vmatprep.subr.msk.bf16.mxu0 %vm1750_vm10, %v5351_v33 }
 0xa5a   : > { %5376 = vmatpush1.bf16.msra.mxu0 %v5356_v53 }
 0xa5b   : > { %v5647_v30 = vpop.permute.xlu1 %5646  ;;  %v5525_v5 = vpop.permute.xlu0 %5524 }
 0xa5c   : > { %v5528_v15 = vsel %vm4369_vm1, %v5523_v25, %v5525_v5 }
 0xa5d   : > { %6303 = vmatmul.mubr.msk.bf16.vlgmr.msra.gmra.mxu0 %vm3877_vm11, %v6301_v56  ;;  %v5534_v44 = vsel %vm1750_vm10, %v5528_v15, 0 }
 0xa5e   : > { %5506 = vmatprep.mubr.bf16.mxu0 %v7225_v1 }
 0xa5f   : > { %v5460_v54 = vpop.permute.xlu1 %5459  ;;  %v5462_v48 = vpop.permute.xlu0 %5461 }
 0xa60   : > { %v5463_v62 = vsel %vm4307_vm0, %v5458_v4, %v5460_v54  ;;  %v5464_v2 = vsel %vm4307_vm0, %v5460_v54, %v5462_v48 }
 0xa61   : > { %v5469_v35 = vsel %vm1750_vm10, %v5463_v62, 0  ;;  %6307 = vmatprep.subr.msk.bf16.mxu0 %vm1750_vm10, %v5464_v2 }
 0xa62   : > { %5489 = vmatpush1.bf16.msra.mxu0 %v5469_v35 }
 0xa63   : > { %v5527_v21 = vpop.permute.xlu1 %5526  ;;  %6313 = vmatprep.subr.msk.bf16.mxu0 %vm1750_vm10, %v5591_v50  ;;  %v5649_v37 = vpop.permute.xlu0 %5648 }
 0xa64   : > { %v5529_v60 = vsel %vm4369_vm1, %v5525_v5, %v5527_v21  ;;  %v5652_v41 = vsel %vm4487_vm2, %v5647_v30, %v5649_v37 }
 0xa65   : > { %6308 = vmatmul.mubr.msk.bf16.vlgmr.msra.gmra.mxu0 %vm3877_vm11, %v6306_v61  ;;  %6310 = vmatprep.subr.msk.bf16.mxu1 %vm1750_vm10, %v5529_v60  ;;  %v5658_v40 = vsel %vm1750_vm10, %v5652_v41, 0 }
 0xa66   : > { %5554 = vmatpush1.bf16.msra.mxu1 %v5534_v44  ;;  %5616 = vmatpush1.bf16.msra.mxu0 %v5596_v3 }
 0xa67   : > { %v5711_v26 = vpop.permute.xlu1 %5710  ;;  %v5709_v46 = vpop.permute.xlu0 %5708  ;;  %5633 = vmatprep.mubr.bf16.mxu0 %v7225_v1 }
 0xa68   : > { %v5714_v31 = vsel %vm4546_vm6, %v5709_v46, %v5711_v26 }
 0xa69   : > { %6311 = vmatmul.mubr.msk.bf16.vlgmr.msra.gmra.mxu1 %vm3877_vm11, %v6309_v22  ;;  %v5720_v19 = vsel %vm1750_vm10, %v5714_v31, 0 }
 0xa6a   : > { %5695 = vmatprep.mubr.bf16.mxu1 %v7225_v1 }
 0xa6b   : > { %v5651_v24 = vpop.permute.xlu1 %5650  ;;  %v5773_v16 = vpop.permute.xlu0 %5772 }
 0xa6c   : > { %v5653_v63 = vsel %vm4487_vm2, %v5649_v37, %v5651_v24 }
 0xa6d   : > { %6314 = vmatmul.mubr.msk.bf16.vlgmr.msra.gmra.mxu0 %vm3877_vm11, %v6312_v27  ;;  %6316 = vmatprep.subr.msk.bf16.mxu1 %vm1750_vm10, %v5653_v63 }
 0xa6e   : > { %5678 = vmatpush1.bf16.msra.mxu1 %v5658_v40  ;;  %5757 = vmatprep.mubr.bf16.mxu0 %v7225_v1 }
 0xa6f   : > { %v5771_v6 = vpop.permute.xlu1 %5770  ;;  %v5713_v42 = vpop.permute.xlu0 %5712 }
 0xa70   : > { %v5715_v45 = vsel %vm4546_vm6, %v5711_v26, %v5713_v42  ;;  %v5776_v51 = vsel %vm4605_vm5, %v5771_v6, %v5773_v16 }
 0xa71   : > { %6317 = vmatmul.mubr.msk.bf16.vlgmr.msra.gmra.mxu1 %vm3877_vm11, %v6315_v47  ;;  %6319 = vmatprep.subr.msk.bf16.mxu0 %vm1750_vm10, %v5715_v45  ;;  %v5782_v34 = vsel %vm1750_vm10, %v5776_v51, 0 }
 0xa72   : > { %5740 = vmatpush1.bf16.msra.mxu0 %v5720_v19  ;;  %5819 = vmatprep.mubr.bf16.mxu1 %v7225_v1 }
 0xa73   : > { %v5775_v59 = vpop.permute.xlu1 %5774  ;;  %v5833_v13 = vpop.permute.xlu0 %5832 }
 0xa74   : > { %v5777_v12 = vsel %vm4605_vm5, %v5773_v16, %v5775_v59 }
 0xa75   : > { %6320 = vmatmul.mubr.msk.bf16.vlgmr.msra.gmra.mxu0 %vm3877_vm11, %v6318_v17  ;;  %6322 = vmatprep.subr.msk.bf16.mxu1 %vm1750_vm10, %v5777_v12 }
 0xa76   : > { %5802 = vmatpush1.bf16.msra.mxu1 %v5782_v34  ;;  %5881 = vmatprep.mubr.bf16.mxu0 %v7225_v1 }
 0xa77   : > { %v5835_v8 = vpop.permute.xlu1 %5834  ;;  %v5837_v28 = vpop.permute.xlu0 %5836 }
 0xa78   : > { %v5838_v7 = vsel %vm4664_vm8, %v5833_v13, %v5835_v8  ;;  %v5839_v38 = vsel %vm4664_vm8, %v5835_v8, %v5837_v28 }
 0xa79   : > { %v5844_v0 = vsel %vm1750_vm10, %v5838_v7, 0  ;;  %6323 = vmatmul.mubr.msk.bf16.vlgmr.msra.gmra.mxu1 %vm3877_vm11, %v6321_v55  ;;  %6325 = vmatprep.subr.msk.bf16.mxu0 %vm1750_vm10, %v5839_v38 }
 0xa7a   : > { %5864 = vmatpush1.bf16.msra.mxu0 %v5844_v0 }
 0xa7d   : > { %6326 = vmatmul.mubr.msk.bf16.vlgmr.msra.gmra.mxu0 %vm3877_vm11, %v6324_v9 }
 0xa84   : > { %v5896_v31 = vpop.permute.xlu1 %5895 }
 0xaa2   : > { %v5445_v1 = vpop.f32.mrf.mxu1 }
 0xaa4   : > { %v5447_v18 = vpop.f32.mrf.mxu1 }
 0xaa6   : > { %v5449_v39 = vpop.f32.mrf.mxu1 }
 0xaa8   : > { %v5450_v36 = vpop.f32.mrf.mxu1 }
 0xb1d   : > { %v5395_v58 = vpop.f32.mrf.mxu0 }
 0xb1e   : > { %v5446_v53 = vadd.f32 %v5445_v1, %v5395_v58 }
 0xb1f   : > { %v5397_v23 = vpop.f32.mrf.mxu0 }
 0xb20   : > { %v5448_v5 = vadd.f32 %v5447_v18, %v5397_v23 }
 0xb21   : > { %v5399_v52 = vpop.f32.mrf.mxu0 }
 0xb23   : > { %v5400_v11 = vpop.f32.mrf.mxu0 }
 0xb25   : > { %v5508_v49 = vpop.f32.mrf.mxu0 }
 0xb26   : > { %v5515_v54 = vadd.f32 %v5508_v49, %v5446_v53 }
 0xb27   : > { %v5510_v57 = vpop.f32.mrf.mxu0 }
 0xb28   : > { %v5516_v2 = vadd.f32 %v5510_v57, %v5448_v5 }
 0xb29   : > { %v5512_v25 = vpop.f32.mrf.mxu0  ;;  %v5573_v14 = vpop.f32.mrf.mxu1 }
 0xb2a   : > { %v5580_v35 = vadd.f32 %v5573_v14, %v5515_v54 }
 0xb2b   : > { %v5513_v10 = vpop.f32.mrf.mxu0  ;;  %v5575_v4 = vpop.f32.mrf.mxu1 }
 0xb2c   : > { %v5581_v15 = vadd.f32 %v5575_v4, %v5516_v2 }
 0xb2d   : > { %v5577_v43 = vpop.f32.mrf.mxu1  ;;  %v5635_v32 = vpop.f32.mrf.mxu0 }
 0xb2e   : > { %v5642_v61 = vadd.f32 %v5635_v32, %v5580_v35 }
 0xb2f   : > { %v5578_v29 = vpop.f32.mrf.mxu1  ;;  %v5637_v33 = vpop.f32.mrf.mxu0 }
 0xb30   : > { %v5643_v60 = vadd.f32 %v5637_v33, %v5581_v15 }
 0xb31   : > { %v5639_v56 = vpop.f32.mrf.mxu0  ;;  %v5697_v30 = vpop.f32.mrf.mxu1 }
 0xb32   : > { %v5704_v3 = vadd.f32 %v5697_v30, %v5642_v61 }
 0xb33   : > { %v5640_v48 = vpop.f32.mrf.mxu0  ;;  %v5699_v62 = vpop.f32.mrf.mxu1 }
 0xb34   : > { %v5705_v26 = vadd.f32 %v5699_v62, %v5643_v60 }
 0xb35   : > { %v5701_v20 = vpop.f32.mrf.mxu1  ;;  %v5759_v50 = vpop.f32.mrf.mxu0 }
 0xb36   : > { %v5766_v46 = vadd.f32 %v5759_v50, %v5704_v3 }
 0xb37   : > { %v5702_v21 = vpop.f32.mrf.mxu1  ;;  %v5761_v37 = vpop.f32.mrf.mxu0 }
 0xb38   : > { %v5767_v24 = vadd.f32 %v5761_v37, %v5705_v26 }
 0xb39   : > { %v5763_v44 = vpop.f32.mrf.mxu0  ;;  %v5821_v22 = vpop.f32.mrf.mxu1 }
 0xb3a   : > { %v5828_v16 = vadd.f32 %v5821_v22, %v5766_v46 }
 0xb3b   : > { %v5764_v41 = vpop.f32.mrf.mxu0  ;;  %v5823_v27 = vpop.f32.mrf.mxu1 }
 0xb3c   : > { %v5829_v47 = vadd.f32 %v5823_v27, %v5767_v24 }
 0xb3d   : > { %v5883_v63 = vpop.f32.mrf.mxu0  ;;  %v5825_v40 = vpop.f32.mrf.mxu1 }
 0xb3e   : > { %v5890_v6 = vadd.f32 %v5883_v63, %v5828_v16 }
 0xb3f   : > { %v5885_v42 = vpop.f32.mrf.mxu0  ;;  %v5826_v45 = vpop.f32.mrf.mxu1 }
 0xb40   : > { %v5898_v19 = vadd.f32 %v5896_v31, %v5890_v6  ;;  %v5891_v51 = vadd.f32 %v5885_v42, %v5829_v47 }
 0xb41   : > { %v5887_v17 = vpop.f32.mrf.mxu0 }
 0xb42   : > { %v5900_v59 = vmax.f32 %v5898_v19, 0.0  ;;  %v5899_v13 = vadd.f32 %v5896_v31, %v5891_v51 }
 0xb43   : > { %v5888_v12 = vpop.f32.mrf.mxu0 }
 0xb44   : > { %5902 = vst [vmem:[%s675_s18] sm:$0xff] %v5900_v59  ;;  %v5901_v34 = vmax.f32 %v5899_v13, 0.0 }
 0xb46   : > { %5903 = vst [vmem:[%s675_s18 + $0x8] sm:$0xff] %v5901_v34 }
 0xb47   : > { %7158 = shalt.err (!%p7155_p1)
}
 0xb48   : > { %s7159_s29 = scalar_lea.hbm %s5917_s1, 256  ;;  %s7163_s18 = scalar_lea.hbm %s8967_s4, 512 }
 0xb49   : > { %p7160_p4 = scmp.ne.s32.totalorder %s5917_s1, %s7159_s29  ;;  %p7164_p11 = scmp.lt.s32.totalorder %s5917_s1, %s8967_s4 }
 0xb4a   : > { %p7165_p8 = scmp.lt.s32.totalorder %s7163_s18, %s7159_s29 }
 0xb4b   : > { %p7161_p7 = pnand %p7160_p4, %p8968_p10 }
 0xb4c   : > { %p7166_p3 = por %p7165_p8, %p7164_p11 }
 0xb4d   : > { %p7162_p6 = pneg %p7161_p7 }
 0xb4f   : > { %p7167_p9 = pnand %p7166_p3, %p7162_p6 }
 0xb51   : > { %7170 = shalt.err (!%p7167_p9)
}
 0xb52   : > { %6741 = dma.vmem_to_hbm [thread:$0]  (%p8968_p10), %s5920_s19, 256, %s5917_s1, %s5905_s2  }
 0xb53 PF: > { %s8969_s27 = sld [smem:[#allocation13_spill]]  ;;  %p8972_p13 = scmp.ge.s32.totalorder %s7217_s30, 2 }
 0xb54   : > { %s8970_s26 = sld [smem:[#allocation15_spill]] }
 0xb59   : > { %s5931_s0 = sand.u32 1, %s8969_s27  }
 0xb5a   : > { %p8971_p12 = scmp.ne.s32.totalorder %s8970_s26, 0  ;;  %s5932_s5 = scalar_lea.sflag [#allocation4], %s5931_s0 }
 0xb5c   : > { %p6755_p0 = pnand %p8972_p13, %p8971_p12 }
 0xb5e   : > { %p6756_p5 = pneg %p6755_p0 }
 0xb60   : > { %7200 = dma.done.wait (%p6756_p5), %s5932_s5, 256  }
 0xb61   : > { %7202 = vsyncadd (%p6756_p5), %s5932_s5, 4294967040  ;;  %s8973_s30 = sld [smem:[#allocation16_spill]]  ;;  %s8976_s27 = smov %s7209_s28 }
 0xb62   : > { %s8974_s24 = sld [smem:[#allocation14_spill]] }
 0xb63   : > { %s8975_s29 = sld [smem:[#allocation17_spill]] }
 0xb67   : > { %p34_p2 = scmp.ge.s32.totalorder %s8973_s30, 4  }
 0xb68   : > { %s8977_s28 = smov %s8974_s24 }
 0xb69   :  { %36 = sbr.rel (!%p34_p2) target bundleno = 19 (0x13), region = 216 }
 0xb6e   :  { %5937 = vsyncpa [#allocation3], 1 }
 0xb6f   :  { %5939 = vsyncpa [#allocation3 + $0x1], 1 }
 0xb70   :  { %5940 = vsyncpa [#allocation6], 1 }
 0xb71   :  { %5942 = vsyncpa [#allocation6 + $0x1], 1 }
 0xb72   :  { %5943 = vsyncpa [#allocation4], 1 }
 0xb73   :  { %5945 = vsyncpa [#allocation4 + $0x1], 1 }

</bundles_post_ra>
